<compile_context>
chip_gen: v7x
topology: tpu7x:2x2x1
jax: 0.10.0
libtpu: 0.0.40
codegen_flags: <defaults>
</compile_context>

<pallas_src>
import jax
import jax.numpy as jnp
from jax.experimental import pallas as pl
from jax.experimental.pallas import tpu as pltpu

# ----------------------------- config (small synthetic shapes) -----------------------------
B, S = 2, 8            # batch, sequence length
H = 32                 # hidden size
NH, DH = 4, 8          # attention heads, head dim (NH * DH == H)
FF = 64                # FFN intermediate size
VOCAB = 100            # vocab size for the synthetic embedding table
NUM_LAYERS = 2         # encoder layers
LN_EPS = 1e-7          # DeBERTa layer-norm eps
TARGET_SIZES = {       # synthetic per-head class counts (MulticlassHead output sizes)
    "task_type": 8,
    "creativity_scope": 5,
    "reasoning": 5,
    "contextual_knowledge": 5,
}
C_TOTAL = sum(TARGET_SIZES.values())


def _vmem_spec():
    # whole-array block resident in VMEM (total model + activations << 1 MiB)
    return pl.BlockSpec(memory_space=pltpu.MemorySpace.VMEM)


# ----------------------------------- kernel helpers -----------------------------------
def _layernorm(x, g, b):
    mu = jnp.mean(x, axis=-1, keepdims=True)
    var = jnp.mean((x - mu) ** 2, axis=-1, keepdims=True)
    return (x - mu) * jax.lax.rsqrt(var + LN_EPS) * g + b


def _bf16(x):
    return x.astype(jnp.bfloat16)


# ----------------------------------- fused Pallas kernel -----------------------------------
def fused_forward_kernel(x_ref, mask_ref,
                         emb_g_ref, emb_b_ref,
                         wqkv_ref, bqkv_ref, wo_ref, bo_ref,
                         ln1g_ref, ln1b_ref,
                         w1_ref, b1_ref, w2_ref, b2_ref,
                         ln2g_ref, ln2b_ref,
                         hw_ref, hb_ref,
                         o_ref):
    m = mask_ref[...]                                   # (B, S) float32
    # additive padding bias computed ONCE for all layers
    attn_bias = (1.0 - m)[:, None, :] * (-1e9)          # (B, 1, S)

    # embedding LayerNorm (fp32)
    x = _layernorm(x_ref[...], emb_g_ref[...], emb_b_ref[...])   # (B, S, H)

    for l in range(NUM_LAYERS):                         # tiny static loop -> unrolled
        # ---- fused QKV projection: single bf16 MXU matmul, fp32 accumulate ----
        qkv = jnp.einsum('bsh,hd->bsd', _bf16(x), wqkv_ref[l],
                         preferred_element_type=jnp.float32) + bqkv_ref[l]   # (B, S, 3H)

        wo = wo_ref[l]                                  # (H, H) fp32 (row-sliced per head)
        attn_out = bo_ref[l]                            # (1, 1, H); heads accumulate onto it
        for h in range(NH):                             # static per-head loop, no lane concat
            q_h = qkv[:, :, h * DH:(h + 1) * DH]
            k_h = qkv[:, :, H + h * DH:H + (h + 1) * DH]
            v_h = qkv[:, :, 2 * H + h * DH:2 * H + (h + 1) * DH]
            # 1/sqrt(DH) is folded into Wq at init time
            s = jnp.einsum('bqd,bkd->bqk', _bf16(q_h), _bf16(k_h),
                           preferred_element_type=jnp.float32) + attn_bias   # (B, S, S) fp32
            s = s - jnp.max(s, axis=-1, keepdims=True)
            p = jnp.exp(s)
            p = p * pl.reciprocal(jnp.sum(p, axis=-1, keepdims=True), approx=True)
            ctx_h = jnp.einsum('bqk,bkd->bqd', _bf16(p), _bf16(v_h),
                               preferred_element_type=jnp.float32)           # (B, S, DH)
            # project this head's context through its slice of Wo and accumulate
            attn_out = attn_out + jnp.einsum(
                'bqd,dh->bqh', _bf16(ctx_h), _bf16(wo[h * DH:(h + 1) * DH, :]),
                preferred_element_type=jnp.float32)

        x1 = _layernorm(x + attn_out, ln1g_ref[l], ln1b_ref[l])

        # ---- FFN (bf16 matmuls, fp32 elementwise) ----
        ff = jnp.einsum('bsh,hf->bsf', _bf16(x1), w1_ref[l],
                        preferred_element_type=jnp.float32) + b1_ref[l]      # (B, S, FF)
        # TODO(synk): HF DeBERTa uses exact erf GELU; tanh approximation used here
        ff = jax.nn.gelu(ff)
        ff = jnp.einsum('bsf,fh->bsh', _bf16(ff), w2_ref[l],
                        preferred_element_type=jnp.float32) + b2_ref[l]      # (B, S, H)
        x = _layernorm(x1 + ff, ln2g_ref[l], ln2b_ref[l])

    # ---- MeanPooling (fp32, matches torch.clamp(min=1e-9)) + concatenated heads ----
    mm = m[:, :, None]                                  # (B, S, 1)
    sum_emb = jnp.sum(x * mm, axis=1)                   # (B, H)
    sum_mask = jnp.maximum(jnp.sum(mm, axis=1), 1e-9)   # (B, 1)
    pooled = sum_emb * pl.reciprocal(sum_mask, approx=True)
    o_ref[...] = jnp.dot(_bf16(pooled), hw_ref[...],
                         preferred_element_type=jnp.float32) + hb_ref[...]


# ----------------------------------- wrapper -----------------------------------
def onnx_export_wrapper_forward(params, input_ids, attention_mask):
    mask_f = attention_mask.astype(jnp.float32)

    # embedding lookup (plain-JAX glue: gather)
    x = params['emb'][input_ids]                        # (B, S, H)

    logits = pl.pallas_call(
        fused_forward_kernel,
        out_shape=jax.ShapeDtypeStruct((B, C_TOTAL), jnp.float32),
        in_specs=[_vmem_spec()] * 18,
        out_specs=_vmem_spec(),
    )(x, mask_f,
      params['emb_ln_g'], params['emb_ln_b'],
      params['wqkv'], params['bqkv'], params['wo'], params['bo'],
      params['ln1g'], params['ln1b'],
      params['w1'], params['b1'], params['w2'], params['b2'],
      params['ln2g'], params['ln2b'],
      params['head_w'], params['head_b'])

    # split concatenated logits back into one tensor per head (glue)
    outs, off = [], 0
    for sz in TARGET_SIZES.values():
        outs.append(logits[:, off:off + sz])
        off += sz
    return tuple(outs)


# ----------------------------------- parameter init -----------------------------------
def init_params(key):
    keys = jax.random.split(key, 2 + NUM_LAYERS)

    def dense(k, shape):
        return (0.02 * jax.random.normal(k, shape)).astype(jnp.float32)

    params = {
        'emb': dense(keys[0], (VOCAB, H)),
        'emb_ln_g': jnp.ones((1, 1, H), jnp.float32),
        'emb_ln_b': jnp.zeros((1, 1, H), jnp.float32),
    }

    scale = 1.0 / (DH ** 0.5)
    wqkv, bqkv, wo, bo = [], [], [], []
    ln1g, ln1b, w1, b1, w2, b2, ln2g, ln2b = [], [], [], [], [], [], [], []
    for i in range(NUM_LAYERS):
        lk = jax.random.split(keys[1 + i], 6)
        wq = dense(lk[0], (H, H)) * scale               # fold 1/sqrt(DH) into Wq
        wk = dense(lk[1], (H, H))
        wv = dense(lk[2], (H, H))
        wqkv.append(jnp.concatenate([wq, wk, wv], axis=1))           # (H, 3H)
        bqkv.append(jnp.zeros((1, 1, 3 * H), jnp.float32))           # (zero bias; q-part would also be scaled)
        wo.append(dense(lk[3], (H, H)))
        bo.append(jnp.zeros((1, 1, H), jnp.float32))
        ln1g.append(jnp.ones((1, 1, H), jnp.float32))
        ln1b.append(jnp.zeros((1, 1, H), jnp.float32))
        w1.append(dense(lk[4], (H, FF)))
        b1.append(jnp.zeros((1, 1, FF), jnp.float32))
        w2.append(dense(lk[5], (FF, H)))
        b2.append(jnp.zeros((1, 1, H), jnp.float32))
        ln2g.append(jnp.ones((1, 1, H), jnp.float32))
        ln2b.append(jnp.zeros((1, 1, H), jnp.float32))

    params.update(
        wqkv=jnp.stack(wqkv).astype(jnp.bfloat16),      # (L, H, 3H) bf16 (MXU-native)
        bqkv=jnp.stack(bqkv),                           # (L, 1, 1, 3H) fp32
        wo=jnp.stack(wo),                               # (L, H, H) fp32 (row-sliced per head)
        bo=jnp.stack(bo),
        ln1g=jnp.stack(ln1g), ln1b=jnp.stack(ln1b),
        w1=jnp.stack(w1).astype(jnp.bfloat16),          # (L, H, FF) bf16
        b1=jnp.stack(b1),
        w2=jnp.stack(w2).astype(jnp.bfloat16),          # (L, FF, H) bf16
        b2=jnp.stack(b2),
        ln2g=jnp.stack(ln2g), ln2b=jnp.stack(ln2b),
    )

    hk = jax.random.split(keys[1 + NUM_LAYERS], 2)
    params['head_w'] = dense(hk[0], (H, C_TOTAL)).astype(jnp.bfloat16)  # concatenated head weights
    params['head_b'] = dense(hk[1], (1, C_TOTAL))                       # concatenated head biases
    return params


# ----------------------------------- main -----------------------------------
if __name__ == "__main__":
    key = jax.random.PRNGKey(0)
    pkey, ikey = jax.random.split(key)

    params = init_params(pkey)
    input_ids = jax.random.randint(ikey, (B, S), 0, VOCAB, dtype=jnp.int32)
    # second sequence is padded after token 5 to exercise mean-pooling masking
    attention_mask = jnp.array([[1] * S, [1] * 5 + [0] * (S - 5)], dtype=jnp.int32)

    outs = onnx_export_wrapper_forward(params, input_ids, attention_mask)
    outs = jax.block_until_ready(outs)

    assert len(outs) == len(TARGET_SIZES)
    for (name, sz), o in zip(TARGET_SIZES.items(), outs):
        assert o.shape == (B, sz) and o.dtype == jnp.float32, (name, o.shape, o.dtype)
        assert bool(jnp.all(jnp.isfinite(o)))
    print("KERNEL_OK")
</pallas_src>

<mosaic_0001>
module attributes {stable_mosaic.version = 11 : i64} {
  func.func @fused_forward_kernel(%arg0: memref<2x8x32xf32, #tpu.memory_space<vmem>>, %arg1: memref<2x8xf32, #tpu.memory_space<vmem>>, %arg2: memref<1x1x32xf32, #tpu.memory_space<vmem>>, %arg3: memref<1x1x32xf32, #tpu.memory_space<vmem>>, %arg4: memref<2x32x96xbf16, #tpu.memory_space<vmem>>, %arg5: memref<2x1x1x96xf32, #tpu.memory_space<vmem>>, %arg6: memref<2x32x32xf32, #tpu.memory_space<vmem>>, %arg7: memref<2x1x1x32xf32, #tpu.memory_space<vmem>>, %arg8: memref<2x1x1x32xf32, #tpu.memory_space<vmem>>, %arg9: memref<2x1x1x32xf32, #tpu.memory_space<vmem>>, %arg10: memref<2x32x64xbf16, #tpu.memory_space<vmem>>, %arg11: memref<2x1x1x64xf32, #tpu.memory_space<vmem>>, %arg12: memref<2x64x32xbf16, #tpu.memory_space<vmem>>, %arg13: memref<2x1x1x32xf32, #tpu.memory_space<vmem>>, %arg14: memref<2x1x1x32xf32, #tpu.memory_space<vmem>>, %arg15: memref<2x1x1x32xf32, #tpu.memory_space<vmem>>, %arg16: memref<32x23xbf16, #tpu.memory_space<vmem>>, %arg17: memref<1x23xf32, #tpu.memory_space<vmem>>, %arg18: memref<2x23xf32, #tpu.memory_space<vmem>>) attributes {dimension_semantics = [], scalar_prefetch = 0 : i64, scratch_operands = 0 : i64, tpu.core_type = #tpu.core_type<tc>} {
    %c0 = arith.constant 0 : index
    %c0_0 = arith.constant 0 : index
    %0 = vector.load %arg1[%c0, %c0_0] : memref<2x8xf32, #tpu.memory_space<vmem>>, vector<2x8xf32>
    %cst = arith.constant 1.000000e+00 : f32
    %1 = vector.broadcast %cst : f32 to vector<2x8xf32>
    %2 = arith.subf %1, %0 : vector<2x8xf32>
    %3 = vector.shape_cast %2 : vector<2x8xf32> to vector<2x1x8xf32>
    %cst_1 = arith.constant -1.000000e+09 : f32
    %4 = vector.broadcast %cst_1 : f32 to vector<2x1x8xf32>
    %5 = arith.mulf %3, %4 : vector<2x1x8xf32>
    %c0_2 = arith.constant 0 : index
    %c0_3 = arith.constant 0 : index
    %c0_4 = arith.constant 0 : index
    %6 = vector.load %arg0[%c0_2, %c0_3, %c0_4] : memref<2x8x32xf32, #tpu.memory_space<vmem>>, vector<2x8x32xf32>
    %c0_5 = arith.constant 0 : index
    %c0_6 = arith.constant 0 : index
    %c0_7 = arith.constant 0 : index
    %7 = vector.load %arg2[%c0_5, %c0_6, %c0_7] : memref<1x1x32xf32, #tpu.memory_space<vmem>>, vector<1x1x32xf32>
    %c0_8 = arith.constant 0 : index
    %c0_9 = arith.constant 0 : index
    %c0_10 = arith.constant 0 : index
    %8 = vector.load %arg3[%c0_8, %c0_9, %c0_10] : memref<1x1x32xf32, #tpu.memory_space<vmem>>, vector<1x1x32xf32>
    %cst_11 = arith.constant dense<0.000000e+00> : vector<2x8xf32>
    %9 = vector.multi_reduction <add>, %6, %cst_11 [2] : vector<2x8x32xf32> to vector<2x8xf32>
    %10 = vector.shape_cast %9 : vector<2x8xf32> to vector<2x8x1xf32>
    %cst_12 = arith.constant 3.200000e+01 : f32
    %11 = vector.broadcast %cst_12 : f32 to vector<2x8x1xf32>
    %12 = arith.divf %10, %11 : vector<2x8x1xf32>
    %13 = vector.broadcast %12 : vector<2x8x1xf32> to vector<2x8x32xf32>
    %14 = arith.subf %6, %13 : vector<2x8x32xf32>
    %15 = arith.mulf %14, %14 : vector<2x8x32xf32>
    %cst_13 = arith.constant dense<0.000000e+00> : vector<2x8xf32>
    %16 = vector.multi_reduction <add>, %15, %cst_13 [2] : vector<2x8x32xf32> to vector<2x8xf32>
    %17 = vector.shape_cast %16 : vector<2x8xf32> to vector<2x8x1xf32>
    %cst_14 = arith.constant 3.200000e+01 : f32
    %18 = vector.broadcast %cst_14 : f32 to vector<2x8x1xf32>
    %19 = arith.divf %17, %18 : vector<2x8x1xf32>
    %20 = vector.broadcast %12 : vector<2x8x1xf32> to vector<2x8x32xf32>
    %21 = arith.subf %6, %20 : vector<2x8x32xf32>
    %cst_15 = arith.constant 1.000000e-07 : f32
    %22 = vector.broadcast %cst_15 : f32 to vector<2x8x1xf32>
    %23 = arith.addf %19, %22 : vector<2x8x1xf32>
    %24 = math.rsqrt %23 : vector<2x8x1xf32>
    %25 = vector.broadcast %24 : vector<2x8x1xf32> to vector<2x8x32xf32>
    %26 = arith.mulf %21, %25 : vector<2x8x32xf32>
    %27 = vector.broadcast %7 : vector<1x1x32xf32> to vector<2x8x32xf32>
    %28 = arith.mulf %26, %27 : vector<2x8x32xf32>
    %29 = vector.broadcast %8 : vector<1x1x32xf32> to vector<2x8x32xf32>
    %30 = arith.addf %28, %29 : vector<2x8x32xf32>
    %31 = arith.truncf %30 : vector<2x8x32xf32> to vector<2x8x32xbf16>
    %c0_16 = arith.constant 0 : index
    %c0_17 = arith.constant 0 : index
    %c0_18 = arith.constant 0 : index
    %32 = vector.load %arg4[%c0_16, %c0_17, %c0_18] : memref<2x32x96xbf16, #tpu.memory_space<vmem>>, vector<1x32x96xbf16>
    %33 = vector.shape_cast %32 : vector<1x32x96xbf16> to vector<32x96xbf16>
    "tpu.trace_start"() <{level = 10 : i32, message = "bsh,hd->bsd"}> : () -> ()
    %cst_19 = arith.constant dense<0.000000e+00> : vector<2x8x96xf32>
    %34 = tpu.matmul %31, %33, %cst_19 {dimension_numbers = #tpu.dot_dimension_numbers<[2], [0], [0, 1], [1], [0, 0, 0, 1, 1, 1], [], []>} : vector<2x8x32xbf16>, vector<32x96xbf16>, vector<2x8x96xf32> -> vector<2x8x96xf32>
    "tpu.trace_stop"() : () -> ()
    %c0_20 = arith.constant 0 : index
    %c0_21 = arith.constant 0 : index
    %c0_22 = arith.constant 0 : index
    %c0_23 = arith.constant 0 : index
    %35 = vector.load %arg5[%c0_20, %c0_21, %c0_22, %c0_23] : memref<2x1x1x96xf32, #tpu.memory_space<vmem>>, vector<1x1x1x96xf32>
    %36 = vector.shape_cast %35 : vector<1x1x1x96xf32> to vector<1x1x96xf32>
    %37 = vector.broadcast %36 : vector<1x1x96xf32> to vector<2x8x96xf32>
    %38 = arith.addf %34, %37 : vector<2x8x96xf32>
    %c0_24 = arith.constant 0 : index
    %c0_25 = arith.constant 0 : index
    %c0_26 = arith.constant 0 : index
    %39 = vector.load %arg6[%c0_24, %c0_25, %c0_26] : memref<2x32x32xf32, #tpu.memory_space<vmem>>, vector<1x32x32xf32>
    %40 = vector.shape_cast %39 : vector<1x32x32xf32> to vector<32x32xf32>
    %c0_27 = arith.constant 0 : index
    %c0_28 = arith.constant 0 : index
    %c0_29 = arith.constant 0 : index
    %c0_30 = arith.constant 0 : index
    %41 = vector.load %arg7[%c0_27, %c0_28, %c0_29, %c0_30] : memref<2x1x1x32xf32, #tpu.memory_space<vmem>>, vector<1x1x1x32xf32>
    %42 = vector.shape_cast %41 : vector<1x1x1x32xf32> to vector<1x1x32xf32>
    %43 = vector.extract_strided_slice %38 {offsets = [0, 0, 0], sizes = [2, 8, 8], strides = [1, 1, 1]} : vector<2x8x96xf32> to vector<2x8x8xf32>
    %44 = vector.extract_strided_slice %38 {offsets = [0, 0, 32], sizes = [2, 8, 8], strides = [1, 1, 1]} : vector<2x8x96xf32> to vector<2x8x8xf32>
    %45 = vector.extract_strided_slice %38 {offsets = [0, 0, 64], sizes = [2, 8, 8], strides = [1, 1, 1]} : vector<2x8x96xf32> to vector<2x8x8xf32>
    %46 = arith.truncf %43 : vector<2x8x8xf32> to vector<2x8x8xbf16>
    %47 = arith.truncf %44 : vector<2x8x8xf32> to vector<2x8x8xbf16>
    "tpu.trace_start"() <{level = 10 : i32, message = "bqd,bkd->bqk"}> : () -> ()
    %cst_31 = arith.constant dense<0.000000e+00> : vector<2x8x8xf32>
    %48 = tpu.matmul %46, %47, %cst_31 {dimension_numbers = #tpu.dot_dimension_numbers<[2], [2], [1], [1], [0, 0, 0, 1, 1, 1], [0], [0]>} : vector<2x8x8xbf16>, vector<2x8x8xbf16>, vector<2x8x8xf32> -> vector<2x8x8xf32>
    "tpu.trace_stop"() : () -> ()
    %49 = vector.broadcast %5 : vector<2x1x8xf32> to vector<2x8x8xf32>
    %50 = arith.addf %48, %49 : vector<2x8x8xf32>
    %cst_32 = arith.constant dense<0xFF800000> : vector<2x8xf32>
    %51 = vector.multi_reduction <maximumf>, %50, %cst_32 [2] : vector<2x8x8xf32> to vector<2x8xf32>
    %52 = vector.shape_cast %51 : vector<2x8xf32> to vector<2x8x1xf32>
    %53 = vector.broadcast %52 : vector<2x8x1xf32> to vector<2x8x8xf32>
    %54 = arith.subf %50, %53 : vector<2x8x8xf32>
    %55 = math.exp %54 : vector<2x8x8xf32>
    %cst_33 = arith.constant dense<0.000000e+00> : vector<2x8xf32>
    %56 = vector.multi_reduction <add>, %55, %cst_33 [2] : vector<2x8x8xf32> to vector<2x8xf32>
    %57 = vector.shape_cast %56 : vector<2x8xf32> to vector<2x8x1xf32>
    %58 = tpu.reciprocal %57 {approx = true} : vector<2x8x1xf32> -> vector<2x8x1xf32>
    %59 = vector.broadcast %58 : vector<2x8x1xf32> to vector<2x8x8xf32>
    %60 = arith.mulf %55, %59 : vector<2x8x8xf32>
    %61 = arith.truncf %60 : vector<2x8x8xf32> to vector<2x8x8xbf16>
    %62 = arith.truncf %45 : vector<2x8x8xf32> to vector<2x8x8xbf16>
    "tpu.trace_start"() <{level = 10 : i32, message = "bqk,bkd->bqd"}> : () -> ()
    %cst_34 = arith.constant dense<0.000000e+00> : vector<2x8x8xf32>
    %63 = tpu.matmul %61, %62, %cst_34 {dimension_numbers = #tpu.dot_dimension_numbers<[2], [1], [1], [2], [0, 0, 0, 1, 1, 2], [0], [0]>} : vector<2x8x8xbf16>, vector<2x8x8xbf16>, vector<2x8x8xf32> -> vector<2x8x8xf32>
    "tpu.trace_stop"() : () -> ()
    %64 = arith.truncf %63 : vector<2x8x8xf32> to vector<2x8x8xbf16>
    %65 = vector.extract_strided_slice %40 {offsets = [0, 0], sizes = [8, 32], strides = [1, 1]} : vector<32x32xf32> to vector<8x32xf32>
    %66 = arith.truncf %65 : vector<8x32xf32> to vector<8x32xbf16>
    "tpu.trace_start"() <{level = 10 : i32, message = "bqd,dh->bqh"}> : () -> ()
    %cst_35 = arith.constant dense<0.000000e+00> : vector<2x8x32xf32>
    %67 = tpu.matmul %64, %66, %cst_35 {dimension_numbers = #tpu.dot_dimension_numbers<[2], [0], [0, 1], [1], [0, 0, 0, 1, 1, 1], [], []>} : vector<2x8x8xbf16>, vector<8x32xbf16>, vector<2x8x32xf32> -> vector<2x8x32xf32>
    "tpu.trace_stop"() : () -> ()
    %68 = vector.broadcast %42 : vector<1x1x32xf32> to vector<2x8x32xf32>
    %69 = arith.addf %68, %67 : vector<2x8x32xf32>
    %70 = vector.extract_strided_slice %38 {offsets = [0, 0, 8], sizes = [2, 8, 8], strides = [1, 1, 1]} : vector<2x8x96xf32> to vector<2x8x8xf32>
    %71 = vector.extract_strided_slice %38 {offsets = [0, 0, 40], sizes = [2, 8, 8], strides = [1, 1, 1]} : vector<2x8x96xf32> to vector<2x8x8xf32>
    %72 = vector.extract_strided_slice %38 {offsets = [0, 0, 72], sizes = [2, 8, 8], strides = [1, 1, 1]} : vector<2x8x96xf32> to vector<2x8x8xf32>
    %73 = arith.truncf %70 : vector<2x8x8xf32> to vector<2x8x8xbf16>
    %74 = arith.truncf %71 : vector<2x8x8xf32> to vector<2x8x8xbf16>
    "tpu.trace_start"() <{level = 10 : i32, message = "bqd,bkd->bqk"}> : () -> ()
    %cst_36 = arith.constant dense<0.000000e+00> : vector<2x8x8xf32>
    %75 = tpu.matmul %73, %74, %cst_36 {dimension_numbers = #tpu.dot_dimension_numbers<[2], [2], [1], [1], [0, 0, 0, 1, 1, 1], [0], [0]>} : vector<2x8x8xbf16>, vector<2x8x8xbf16>, vector<2x8x8xf32> -> vector<2x8x8xf32>
    "tpu.trace_stop"() : () -> ()
    %76 = vector.broadcast %5 : vector<2x1x8xf32> to vector<2x8x8xf32>
    %77 = arith.addf %75, %76 : vector<2x8x8xf32>
    %cst_37 = arith.constant dense<0xFF800000> : vector<2x8xf32>
    %78 = vector.multi_reduction <maximumf>, %77, %cst_37 [2] : vector<2x8x8xf32> to vector<2x8xf32>
    %79 = vector.shape_cast %78 : vector<2x8xf32> to vector<2x8x1xf32>
    %80 = vector.broadcast %79 : vector<2x8x1xf32> to vector<2x8x8xf32>
    %81 = arith.subf %77, %80 : vector<2x8x8xf32>
    %82 = math.exp %81 : vector<2x8x8xf32>
    %cst_38 = arith.constant dense<0.000000e+00> : vector<2x8xf32>
    %83 = vector.multi_reduction <add>, %82, %cst_38 [2] : vector<2x8x8xf32> to vector<2x8xf32>
    %84 = vector.shape_cast %83 : vector<2x8xf32> to vector<2x8x1xf32>
    %85 = tpu.reciprocal %84 {approx = true} : vector<2x8x1xf32> -> vector<2x8x1xf32>
    %86 = vector.broadcast %85 : vector<2x8x1xf32> to vector<2x8x8xf32>
    %87 = arith.mulf %82, %86 : vector<2x8x8xf32>
    %88 = arith.truncf %87 : vector<2x8x8xf32> to vector<2x8x8xbf16>
    %89 = arith.truncf %72 : vector<2x8x8xf32> to vector<2x8x8xbf16>
    "tpu.trace_start"() <{level = 10 : i32, message = "bqk,bkd->bqd"}> : () -> ()
    %cst_39 = arith.constant dense<0.000000e+00> : vector<2x8x8xf32>
    %90 = tpu.matmul %88, %89, %cst_39 {dimension_numbers = #tpu.dot_dimension_numbers<[2], [1], [1], [2], [0, 0, 0, 1, 1, 2], [0], [0]>} : vector<2x8x8xbf16>, vector<2x8x8xbf16>, vector<2x8x8xf32> -> vector<2x8x8xf32>
    "tpu.trace_stop"() : () -> ()
    %91 = arith.truncf %90 : vector<2x8x8xf32> to vector<2x8x8xbf16>
    %92 = vector.extract_strided_slice %40 {offsets = [8, 0], sizes = [8, 32], strides = [1, 1]} : vector<32x32xf32> to vector<8x32xf32>
    %93 = arith.truncf %92 : vector<8x32xf32> to vector<8x32xbf16>
    "tpu.trace_start"() <{level = 10 : i32, message = "bqd,dh->bqh"}> : () -> ()
    %cst_40 = arith.constant dense<0.000000e+00> : vector<2x8x32xf32>
    %94 = tpu.matmul %91, %93, %cst_40 {dimension_numbers = #tpu.dot_dimension_numbers<[2], [0], [0, 1], [1], [0, 0, 0, 1, 1, 1], [], []>} : vector<2x8x8xbf16>, vector<8x32xbf16>, vector<2x8x32xf32> -> vector<2x8x32xf32>
    "tpu.trace_stop"() : () -> ()
    %95 = arith.addf %69, %94 : vector<2x8x32xf32>
    %96 = vector.extract_strided_slice %38 {offsets = [0, 0, 16], sizes = [2, 8, 8], strides = [1, 1, 1]} : vector<2x8x96xf32> to vector<2x8x8xf32>
    %97 = vector.extract_strided_slice %38 {offsets = [0, 0, 48], sizes = [2, 8, 8], strides = [1, 1, 1]} : vector<2x8x96xf32> to vector<2x8x8xf32>
    %98 = vector.extract_strided_slice %38 {offsets = [0, 0, 80], sizes = [2, 8, 8], strides = [1, 1, 1]} : vector<2x8x96xf32> to vector<2x8x8xf32>
    %99 = arith.truncf %96 : vector<2x8x8xf32> to vector<2x8x8xbf16>
    %100 = arith.truncf %97 : vector<2x8x8xf32> to vector<2x8x8xbf16>
    "tpu.trace_start"() <{level = 10 : i32, message = "bqd,bkd->bqk"}> : () -> ()
    %cst_41 = arith.constant dense<0.000000e+00> : vector<2x8x8xf32>
    %101 = tpu.matmul %99, %100, %cst_41 {dimension_numbers = #tpu.dot_dimension_numbers<[2], [2], [1], [1], [0, 0, 0, 1, 1, 1], [0], [0]>} : vector<2x8x8xbf16>, vector<2x8x8xbf16>, vector<2x8x8xf32> -> vector<2x8x8xf32>
    "tpu.trace_stop"() : () -> ()
    %102 = vector.broadcast %5 : vector<2x1x8xf32> to vector<2x8x8xf32>
    %103 = arith.addf %101, %102 : vector<2x8x8xf32>
    %cst_42 = arith.constant dense<0xFF800000> : vector<2x8xf32>
    %104 = vector.multi_reduction <maximumf>, %103, %cst_42 [2] : vector<2x8x8xf32> to vector<2x8xf32>
    %105 = vector.shape_cast %104 : vector<2x8xf32> to vector<2x8x1xf32>
    %106 = vector.broadcast %105 : vector<2x8x1xf32> to vector<2x8x8xf32>
    %107 = arith.subf %103, %106 : vector<2x8x8xf32>
    %108 = math.exp %107 : vector<2x8x8xf32>
    %cst_43 = arith.constant dense<0.000000e+00> : vector<2x8xf32>
    %109 = vector.multi_reduction <add>, %108, %cst_43 [2] : vector<2x8x8xf32> to vector<2x8xf32>
    %110 = vector.shape_cast %109 : vector<2x8xf32> to vector<2x8x1xf32>
    %111 = tpu.reciprocal %110 {approx = true} : vector<2x8x1xf32> -> vector<2x8x1xf32>
    %112 = vector.broadcast %111 : vector<2x8x1xf32> to vector<2x8x8xf32>
    %113 = arith.mulf %108, %112 : vector<2x8x8xf32>
    %114 = arith.truncf %113 : vector<2x8x8xf32> to vector<2x8x8xbf16>
    %115 = arith.truncf %98 : vector<2x8x8xf32> to vector<2x8x8xbf16>
    "tpu.trace_start"() <{level = 10 : i32, message = "bqk,bkd->bqd"}> : () -> ()
    %cst_44 = arith.constant dense<0.000000e+00> : vector<2x8x8xf32>
    %116 = tpu.matmul %114, %115, %cst_44 {dimension_numbers = #tpu.dot_dimension_numbers<[2], [1], [1], [2], [0, 0, 0, 1, 1, 2], [0], [0]>} : vector<2x8x8xbf16>, vector<2x8x8xbf16>, vector<2x8x8xf32> -> vector<2x8x8xf32>
    "tpu.trace_stop"() : () -> ()
    %117 = arith.truncf %116 : vector<2x8x8xf32> to vector<2x8x8xbf16>
    %118 = vector.extract_strided_slice %40 {offsets = [16, 0], sizes = [8, 32], strides = [1, 1]} : vector<32x32xf32> to vector<8x32xf32>
    %119 = arith.truncf %118 : vector<8x32xf32> to vector<8x32xbf16>
    "tpu.trace_start"() <{level = 10 : i32, message = "bqd,dh->bqh"}> : () -> ()
    %cst_45 = arith.constant dense<0.000000e+00> : vector<2x8x32xf32>
    %120 = tpu.matmul %117, %119, %cst_45 {dimension_numbers = #tpu.dot_dimension_numbers<[2], [0], [0, 1], [1], [0, 0, 0, 1, 1, 1], [], []>} : vector<2x8x8xbf16>, vector<8x32xbf16>, vector<2x8x32xf32> -> vector<2x8x32xf32>
    "tpu.trace_stop"() : () -> ()
    %121 = arith.addf %95, %120 : vector<2x8x32xf32>
    %122 = vector.extract_strided_slice %38 {offsets = [0, 0, 24], sizes = [2, 8, 8], strides = [1, 1, 1]} : vector<2x8x96xf32> to vector<2x8x8xf32>
    %123 = vector.extract_strided_slice %38 {offsets = [0, 0, 56], sizes = [2, 8, 8], strides = [1, 1, 1]} : vector<2x8x96xf32> to vector<2x8x8xf32>
    %124 = vector.extract_strided_slice %38 {offsets = [0, 0, 88], sizes = [2, 8, 8], strides = [1, 1, 1]} : vector<2x8x96xf32> to vector<2x8x8xf32>
    %125 = arith.truncf %122 : vector<2x8x8xf32> to vector<2x8x8xbf16>
    %126 = arith.truncf %123 : vector<2x8x8xf32> to vector<2x8x8xbf16>
    "tpu.trace_start"() <{level = 10 : i32, message = "bqd,bkd->bqk"}> : () -> ()
    %cst_46 = arith.constant dense<0.000000e+00> : vector<2x8x8xf32>
    %127 = tpu.matmul %125, %126, %cst_46 {dimension_numbers = #tpu.dot_dimension_numbers<[2], [2], [1], [1], [0, 0, 0, 1, 1, 1], [0], [0]>} : vector<2x8x8xbf16>, vector<2x8x8xbf16>, vector<2x8x8xf32> -> vector<2x8x8xf32>
    "tpu.trace_stop"() : () -> ()
    %128 = vector.broadcast %5 : vector<2x1x8xf32> to vector<2x8x8xf32>
    %129 = arith.addf %127, %128 : vector<2x8x8xf32>
    %cst_47 = arith.constant dense<0xFF800000> : vector<2x8xf32>
    %130 = vector.multi_reduction <maximumf>, %129, %cst_47 [2] : vector<2x8x8xf32> to vector<2x8xf32>
    %131 = vector.shape_cast %130 : vector<2x8xf32> to vector<2x8x1xf32>
    %132 = vector.broadcast %131 : vector<2x8x1xf32> to vector<2x8x8xf32>
    %133 = arith.subf %129, %132 : vector<2x8x8xf32>
    %134 = math.exp %133 : vector<2x8x8xf32>
    %cst_48 = arith.constant dense<0.000000e+00> : vector<2x8xf32>
    %135 = vector.multi_reduction <add>, %134, %cst_48 [2] : vector<2x8x8xf32> to vector<2x8xf32>
    %136 = vector.shape_cast %135 : vector<2x8xf32> to vector<2x8x1xf32>
    %137 = tpu.reciprocal %136 {approx = true} : vector<2x8x1xf32> -> vector<2x8x1xf32>
    %138 = vector.broadcast %137 : vector<2x8x1xf32> to vector<2x8x8xf32>
    %139 = arith.mulf %134, %138 : vector<2x8x8xf32>
    %140 = arith.truncf %139 : vector<2x8x8xf32> to vector<2x8x8xbf16>
    %141 = arith.truncf %124 : vector<2x8x8xf32> to vector<2x8x8xbf16>
    "tpu.trace_start"() <{level = 10 : i32, message = "bqk,bkd->bqd"}> : () -> ()
    %cst_49 = arith.constant dense<0.000000e+00> : vector<2x8x8xf32>
    %142 = tpu.matmul %140, %141, %cst_49 {dimension_numbers = #tpu.dot_dimension_numbers<[2], [1], [1], [2], [0, 0, 0, 1, 1, 2], [0], [0]>} : vector<2x8x8xbf16>, vector<2x8x8xbf16>, vector<2x8x8xf32> -> vector<2x8x8xf32>
    "tpu.trace_stop"() : () -> ()
    %143 = arith.truncf %142 : vector<2x8x8xf32> to vector<2x8x8xbf16>
    %144 = vector.extract_strided_slice %40 {offsets = [24, 0], sizes = [8, 32], strides = [1, 1]} : vector<32x32xf32> to vector<8x32xf32>
    %145 = arith.truncf %144 : vector<8x32xf32> to vector<8x32xbf16>
    "tpu.trace_start"() <{level = 10 : i32, message = "bqd,dh->bqh"}> : () -> ()
    %cst_50 = arith.constant dense<0.000000e+00> : vector<2x8x32xf32>
    %146 = tpu.matmul %143, %145, %cst_50 {dimension_numbers = #tpu.dot_dimension_numbers<[2], [0], [0, 1], [1], [0, 0, 0, 1, 1, 1], [], []>} : vector<2x8x8xbf16>, vector<8x32xbf16>, vector<2x8x32xf32> -> vector<2x8x32xf32>
    "tpu.trace_stop"() : () -> ()
    %147 = arith.addf %121, %146 : vector<2x8x32xf32>
    %148 = arith.addf %30, %147 : vector<2x8x32xf32>
    %c0_51 = arith.constant 0 : index
    %c0_52 = arith.constant 0 : index
    %c0_53 = arith.constant 0 : index
    %c0_54 = arith.constant 0 : index
    %149 = vector.load %arg8[%c0_51, %c0_52, %c0_53, %c0_54] : memref<2x1x1x32xf32, #tpu.memory_space<vmem>>, vector<1x1x1x32xf32>
    %150 = vector.shape_cast %149 : vector<1x1x1x32xf32> to vector<1x1x32xf32>
    %c0_55 = arith.constant 0 : index
    %c0_56 = arith.constant 0 : index
    %c0_57 = arith.constant 0 : index
    %c0_58 = arith.constant 0 : index
    %151 = vector.load %arg9[%c0_55, %c0_56, %c0_57, %c0_58] : memref<2x1x1x32xf32, #tpu.memory_space<vmem>>, vector<1x1x1x32xf32>
    %152 = vector.shape_cast %151 : vector<1x1x1x32xf32> to vector<1x1x32xf32>
    %cst_59 = arith.constant dense<0.000000e+00> : vector<2x8xf32>
    %153 = vector.multi_reduction <add>, %148, %cst_59 [2] : vector<2x8x32xf32> to vector<2x8xf32>
    %154 = vector.shape_cast %153 : vector<2x8xf32> to vector<2x8x1xf32>
    %cst_60 = arith.constant 3.200000e+01 : f32
    %155 = vector.broadcast %cst_60 : f32 to vector<2x8x1xf32>
    %156 = arith.divf %154, %155 : vector<2x8x1xf32>
    %157 = vector.broadcast %156 : vector<2x8x1xf32> to vector<2x8x32xf32>
    %158 = arith.subf %148, %157 : vector<2x8x32xf32>
    %159 = arith.mulf %158, %158 : vector<2x8x32xf32>
    %cst_61 = arith.constant dense<0.000000e+00> : vector<2x8xf32>
    %160 = vector.multi_reduction <add>, %159, %cst_61 [2] : vector<2x8x32xf32> to vector<2x8xf32>
    %161 = vector.shape_cast %160 : vector<2x8xf32> to vector<2x8x1xf32>
    %cst_62 = arith.constant 3.200000e+01 : f32
    %162 = vector.broadcast %cst_62 : f32 to vector<2x8x1xf32>
    %163 = arith.divf %161, %162 : vector<2x8x1xf32>
    %164 = vector.broadcast %156 : vector<2x8x1xf32> to vector<2x8x32xf32>
    %165 = arith.subf %148, %164 : vector<2x8x32xf32>
    %cst_63 = arith.constant 1.000000e-07 : f32
    %166 = vector.broadcast %cst_63 : f32 to vector<2x8x1xf32>
    %167 = arith.addf %163, %166 : vector<2x8x1xf32>
    %168 = math.rsqrt %167 : vector<2x8x1xf32>
    %169 = vector.broadcast %168 : vector<2x8x1xf32> to vector<2x8x32xf32>
    %170 = arith.mulf %165, %169 : vector<2x8x32xf32>
    %171 = vector.broadcast %150 : vector<1x1x32xf32> to vector<2x8x32xf32>
    %172 = arith.mulf %170, %171 : vector<2x8x32xf32>
    %173 = vector.broadcast %152 : vector<1x1x32xf32> to vector<2x8x32xf32>
    %174 = arith.addf %172, %173 : vector<2x8x32xf32>
    %175 = arith.truncf %174 : vector<2x8x32xf32> to vector<2x8x32xbf16>
    %c0_64 = arith.constant 0 : index
    %c0_65 = arith.constant 0 : index
    %c0_66 = arith.constant 0 : index
    %176 = vector.load %arg10[%c0_64, %c0_65, %c0_66] : memref<2x32x64xbf16, #tpu.memory_space<vmem>>, vector<1x32x64xbf16>
    %177 = vector.shape_cast %176 : vector<1x32x64xbf16> to vector<32x64xbf16>
    "tpu.trace_start"() <{level = 10 : i32, message = "bsh,hf->bsf"}> : () -> ()
    %cst_67 = arith.constant dense<0.000000e+00> : vector<2x8x64xf32>
    %178 = tpu.matmul %175, %177, %cst_67 {dimension_numbers = #tpu.dot_dimension_numbers<[2], [0], [0, 1], [1], [0, 0, 0, 1, 1, 1], [], []>} : vector<2x8x32xbf16>, vector<32x64xbf16>, vector<2x8x64xf32> -> vector<2x8x64xf32>
    "tpu.trace_stop"() : () -> ()
    %c0_68 = arith.constant 0 : index
    %c0_69 = arith.constant 0 : index
    %c0_70 = arith.constant 0 : index
    %c0_71 = arith.constant 0 : index
    %179 = vector.load %arg11[%c0_68, %c0_69, %c0_70, %c0_71] : memref<2x1x1x64xf32, #tpu.memory_space<vmem>>, vector<1x1x1x64xf32>
    %180 = vector.shape_cast %179 : vector<1x1x1x64xf32> to vector<1x1x64xf32>
    %181 = vector.broadcast %180 : vector<1x1x64xf32> to vector<2x8x64xf32>
    %182 = arith.addf %178, %181 : vector<2x8x64xf32>
    %183 = arith.mulf %182, %182 : vector<2x8x64xf32>
    %184 = arith.mulf %182, %183 : vector<2x8x64xf32>
    %cst_72 = arith.constant 4.471500e-02 : f32
    %185 = vector.broadcast %cst_72 : f32 to vector<2x8x64xf32>
    %186 = arith.mulf %185, %184 : vector<2x8x64xf32>
    %187 = arith.addf %182, %186 : vector<2x8x64xf32>
    %cst_73 = arith.constant 0.797884583 : f32
    %188 = vector.broadcast %cst_73 : f32 to vector<2x8x64xf32>
    %189 = arith.mulf %188, %187 : vector<2x8x64xf32>
    %190 = math.tanh %189 : vector<2x8x64xf32>
    %cst_74 = arith.constant 1.000000e+00 : f32
    %191 = vector.broadcast %cst_74 : f32 to vector<2x8x64xf32>
    %192 = arith.addf %191, %190 : vector<2x8x64xf32>
    %cst_75 = arith.constant 5.000000e-01 : f32
    %193 = vector.broadcast %cst_75 : f32 to vector<2x8x64xf32>
    %194 = arith.mulf %193, %192 : vector<2x8x64xf32>
    %195 = arith.mulf %182, %194 : vector<2x8x64xf32>
    %196 = arith.truncf %195 : vector<2x8x64xf32> to vector<2x8x64xbf16>
    %c0_76 = arith.constant 0 : index
    %c0_77 = arith.constant 0 : index
    %c0_78 = arith.constant 0 : index
    %197 = vector.load %arg12[%c0_76, %c0_77, %c0_78] : memref<2x64x32xbf16, #tpu.memory_space<vmem>>, vector<1x64x32xbf16>
    %198 = vector.shape_cast %197 : vector<1x64x32xbf16> to vector<64x32xbf16>
    "tpu.trace_start"() <{level = 10 : i32, message = "bsf,fh->bsh"}> : () -> ()
    %cst_79 = arith.constant dense<0.000000e+00> : vector<2x8x32xf32>
    %199 = tpu.matmul %196, %198, %cst_79 {dimension_numbers = #tpu.dot_dimension_numbers<[2], [0], [0, 1], [1], [0, 0, 0, 1, 1, 1], [], []>} : vector<2x8x64xbf16>, vector<64x32xbf16>, vector<2x8x32xf32> -> vector<2x8x32xf32>
    "tpu.trace_stop"() : () -> ()
    %c0_80 = arith.constant 0 : index
    %c0_81 = arith.constant 0 : index
    %c0_82 = arith.constant 0 : index
    %c0_83 = arith.constant 0 : index
    %200 = vector.load %arg13[%c0_80, %c0_81, %c0_82, %c0_83] : memref<2x1x1x32xf32, #tpu.memory_space<vmem>>, vector<1x1x1x32xf32>
    %201 = vector.shape_cast %200 : vector<1x1x1x32xf32> to vector<1x1x32xf32>
    %202 = vector.broadcast %201 : vector<1x1x32xf32> to vector<2x8x32xf32>
    %203 = arith.addf %199, %202 : vector<2x8x32xf32>
    %204 = arith.addf %174, %203 : vector<2x8x32xf32>
    %c0_84 = arith.constant 0 : index
    %c0_85 = arith.constant 0 : index
    %c0_86 = arith.constant 0 : index
    %c0_87 = arith.constant 0 : index
    %205 = vector.load %arg14[%c0_84, %c0_85, %c0_86, %c0_87] : memref<2x1x1x32xf32, #tpu.memory_space<vmem>>, vector<1x1x1x32xf32>
    %206 = vector.shape_cast %205 : vector<1x1x1x32xf32> to vector<1x1x32xf32>
    %c0_88 = arith.constant 0 : index
    %c0_89 = arith.constant 0 : index
    %c0_90 = arith.constant 0 : index
    %c0_91 = arith.constant 0 : index
    %207 = vector.load %arg15[%c0_88, %c0_89, %c0_90, %c0_91] : memref<2x1x1x32xf32, #tpu.memory_space<vmem>>, vector<1x1x1x32xf32>
    %208 = vector.shape_cast %207 : vector<1x1x1x32xf32> to vector<1x1x32xf32>
    %cst_92 = arith.constant dense<0.000000e+00> : vector<2x8xf32>
    %209 = vector.multi_reduction <add>, %204, %cst_92 [2] : vector<2x8x32xf32> to vector<2x8xf32>
    %210 = vector.shape_cast %209 : vector<2x8xf32> to vector<2x8x1xf32>
    %cst_93 = arith.constant 3.200000e+01 : f32
    %211 = vector.broadcast %cst_93 : f32 to vector<2x8x1xf32>
    %212 = arith.divf %210, %211 : vector<2x8x1xf32>
    %213 = vector.broadcast %212 : vector<2x8x1xf32> to vector<2x8x32xf32>
    %214 = arith.subf %204, %213 : vector<2x8x32xf32>
    %215 = arith.mulf %214, %214 : vector<2x8x32xf32>
    %cst_94 = arith.constant dense<0.000000e+00> : vector<2x8xf32>
    %216 = vector.multi_reduction <add>, %215, %cst_94 [2] : vector<2x8x32xf32> to vector<2x8xf32>
    %217 = vector.shape_cast %216 : vector<2x8xf32> to vector<2x8x1xf32>
    %cst_95 = arith.constant 3.200000e+01 : f32
    %218 = vector.broadcast %cst_95 : f32 to vector<2x8x1xf32>
    %219 = arith.divf %217, %218 : vector<2x8x1xf32>
    %220 = vector.broadcast %212 : vector<2x8x1xf32> to vector<2x8x32xf32>
    %221 = arith.subf %204, %220 : vector<2x8x32xf32>
    %cst_96 = arith.constant 1.000000e-07 : f32
    %222 = vector.broadcast %cst_96 : f32 to vector<2x8x1xf32>
    %223 = arith.addf %219, %222 : vector<2x8x1xf32>
    %224 = math.rsqrt %223 : vector<2x8x1xf32>
    %225 = vector.broadcast %224 : vector<2x8x1xf32> to vector<2x8x32xf32>
    %226 = arith.mulf %221, %225 : vector<2x8x32xf32>
    %227 = vector.broadcast %206 : vector<1x1x32xf32> to vector<2x8x32xf32>
    %228 = arith.mulf %226, %227 : vector<2x8x32xf32>
    %229 = vector.broadcast %208 : vector<1x1x32xf32> to vector<2x8x32xf32>
    %230 = arith.addf %228, %229 : vector<2x8x32xf32>
    %231 = arith.truncf %230 : vector<2x8x32xf32> to vector<2x8x32xbf16>
    %c1 = arith.constant 1 : index
    %c0_97 = arith.constant 0 : index
    %c0_98 = arith.constant 0 : index
    %232 = vector.load %arg4[%c1, %c0_97, %c0_98] : memref<2x32x96xbf16, #tpu.memory_space<vmem>>, vector<1x32x96xbf16>
    %233 = vector.shape_cast %232 : vector<1x32x96xbf16> to vector<32x96xbf16>
    "tpu.trace_start"() <{level = 10 : i32, message = "bsh,hd->bsd"}> : () -> ()
    %cst_99 = arith.constant dense<0.000000e+00> : vector<2x8x96xf32>
    %234 = tpu.matmul %231, %233, %cst_99 {dimension_numbers = #tpu.dot_dimension_numbers<[2], [0], [0, 1], [1], [0, 0, 0, 1, 1, 1], [], []>} : vector<2x8x32xbf16>, vector<32x96xbf16>, vector<2x8x96xf32> -> vector<2x8x96xf32>
    "tpu.trace_stop"() : () -> ()
    %c1_100 = arith.constant 1 : index
    %c0_101 = arith.constant 0 : index
    %c0_102 = arith.constant 0 : index
    %c0_103 = arith.constant 0 : index
    %235 = vector.load %arg5[%c1_100, %c0_101, %c0_102, %c0_103] : memref<2x1x1x96xf32, #tpu.memory_space<vmem>>, vector<1x1x1x96xf32>
    %236 = vector.shape_cast %235 : vector<1x1x1x96xf32> to vector<1x1x96xf32>
    %237 = vector.broadcast %236 : vector<1x1x96xf32> to vector<2x8x96xf32>
    %238 = arith.addf %234, %237 : vector<2x8x96xf32>
    %c1_104 = arith.constant 1 : index
    %c0_105 = arith.constant 0 : index
    %c0_106 = arith.constant 0 : index
    %239 = vector.load %arg6[%c1_104, %c0_105, %c0_106] : memref<2x32x32xf32, #tpu.memory_space<vmem>>, vector<1x32x32xf32>
    %240 = vector.shape_cast %239 : vector<1x32x32xf32> to vector<32x32xf32>
    %c1_107 = arith.constant 1 : index
    %c0_108 = arith.constant 0 : index
    %c0_109 = arith.constant 0 : index
    %c0_110 = arith.constant 0 : index
    %241 = vector.load %arg7[%c1_107, %c0_108, %c0_109, %c0_110] : memref<2x1x1x32xf32, #tpu.memory_space<vmem>>, vector<1x1x1x32xf32>
    %242 = vector.shape_cast %241 : vector<1x1x1x32xf32> to vector<1x1x32xf32>
    %243 = vector.extract_strided_slice %238 {offsets = [0, 0, 0], sizes = [2, 8, 8], strides = [1, 1, 1]} : vector<2x8x96xf32> to vector<2x8x8xf32>
    %244 = vector.extract_strided_slice %238 {offsets = [0, 0, 32], sizes = [2, 8, 8], strides = [1, 1, 1]} : vector<2x8x96xf32> to vector<2x8x8xf32>
    %245 = vector.extract_strided_slice %238 {offsets = [0, 0, 64], sizes = [2, 8, 8], strides = [1, 1, 1]} : vector<2x8x96xf32> to vector<2x8x8xf32>
    %246 = arith.truncf %243 : vector<2x8x8xf32> to vector<2x8x8xbf16>
    %247 = arith.truncf %244 : vector<2x8x8xf32> to vector<2x8x8xbf16>
    "tpu.trace_start"() <{level = 10 : i32, message = "bqd,bkd->bqk"}> : () -> ()
    %cst_111 = arith.constant dense<0.000000e+00> : vector<2x8x8xf32>
    %248 = tpu.matmul %246, %247, %cst_111 {dimension_numbers = #tpu.dot_dimension_numbers<[2], [2], [1], [1], [0, 0, 0, 1, 1, 1], [0], [0]>} : vector<2x8x8xbf16>, vector<2x8x8xbf16>, vector<2x8x8xf32> -> vector<2x8x8xf32>
    "tpu.trace_stop"() : () -> ()
    %249 = vector.broadcast %5 : vector<2x1x8xf32> to vector<2x8x8xf32>
    %250 = arith.addf %248, %249 : vector<2x8x8xf32>
    %cst_112 = arith.constant dense<0xFF800000> : vector<2x8xf32>
    %251 = vector.multi_reduction <maximumf>, %250, %cst_112 [2] : vector<2x8x8xf32> to vector<2x8xf32>
    %252 = vector.shape_cast %251 : vector<2x8xf32> to vector<2x8x1xf32>
    %253 = vector.broadcast %252 : vector<2x8x1xf32> to vector<2x8x8xf32>
    %254 = arith.subf %250, %253 : vector<2x8x8xf32>
    %255 = math.exp %254 : vector<2x8x8xf32>
    %cst_113 = arith.constant dense<0.000000e+00> : vector<2x8xf32>
    %256 = vector.multi_reduction <add>, %255, %cst_113 [2] : vector<2x8x8xf32> to vector<2x8xf32>
    %257 = vector.shape_cast %256 : vector<2x8xf32> to vector<2x8x1xf32>
    %258 = tpu.reciprocal %257 {approx = true} : vector<2x8x1xf32> -> vector<2x8x1xf32>
    %259 = vector.broadcast %258 : vector<2x8x1xf32> to vector<2x8x8xf32>
    %260 = arith.mulf %255, %259 : vector<2x8x8xf32>
    %261 = arith.truncf %260 : vector<2x8x8xf32> to vector<2x8x8xbf16>
    %262 = arith.truncf %245 : vector<2x8x8xf32> to vector<2x8x8xbf16>
    "tpu.trace_start"() <{level = 10 : i32, message = "bqk,bkd->bqd"}> : () -> ()
    %cst_114 = arith.constant dense<0.000000e+00> : vector<2x8x8xf32>
    %263 = tpu.matmul %261, %262, %cst_114 {dimension_numbers = #tpu.dot_dimension_numbers<[2], [1], [1], [2], [0, 0, 0, 1, 1, 2], [0], [0]>} : vector<2x8x8xbf16>, vector<2x8x8xbf16>, vector<2x8x8xf32> -> vector<2x8x8xf32>
    "tpu.trace_stop"() : () -> ()
    %264 = arith.truncf %263 : vector<2x8x8xf32> to vector<2x8x8xbf16>
    %265 = vector.extract_strided_slice %240 {offsets = [0, 0], sizes = [8, 32], strides = [1, 1]} : vector<32x32xf32> to vector<8x32xf32>
    %266 = arith.truncf %265 : vector<8x32xf32> to vector<8x32xbf16>
    "tpu.trace_start"() <{level = 10 : i32, message = "bqd,dh->bqh"}> : () -> ()
    %cst_115 = arith.constant dense<0.000000e+00> : vector<2x8x32xf32>
    %267 = tpu.matmul %264, %266, %cst_115 {dimension_numbers = #tpu.dot_dimension_numbers<[2], [0], [0, 1], [1], [0, 0, 0, 1, 1, 1], [], []>} : vector<2x8x8xbf16>, vector<8x32xbf16>, vector<2x8x32xf32> -> vector<2x8x32xf32>
    "tpu.trace_stop"() : () -> ()
    %268 = vector.broadcast %242 : vector<1x1x32xf32> to vector<2x8x32xf32>
    %269 = arith.addf %268, %267 : vector<2x8x32xf32>
    %270 = vector.extract_strided_slice %238 {offsets = [0, 0, 8], sizes = [2, 8, 8], strides = [1, 1, 1]} : vector<2x8x96xf32> to vector<2x8x8xf32>
    %271 = vector.extract_strided_slice %238 {offsets = [0, 0, 40], sizes = [2, 8, 8], strides = [1, 1, 1]} : vector<2x8x96xf32> to vector<2x8x8xf32>
    %272 = vector.extract_strided_slice %238 {offsets = [0, 0, 72], sizes = [2, 8, 8], strides = [1, 1, 1]} : vector<2x8x96xf32> to vector<2x8x8xf32>
    %273 = arith.truncf %270 : vector<2x8x8xf32> to vector<2x8x8xbf16>
    %274 = arith.truncf %271 : vector<2x8x8xf32> to vector<2x8x8xbf16>
    "tpu.trace_start"() <{level = 10 : i32, message = "bqd,bkd->bqk"}> : () -> ()
    %cst_116 = arith.constant dense<0.000000e+00> : vector<2x8x8xf32>
    %275 = tpu.matmul %273, %274, %cst_116 {dimension_numbers = #tpu.dot_dimension_numbers<[2], [2], [1], [1], [0, 0, 0, 1, 1, 1], [0], [0]>} : vector<2x8x8xbf16>, vector<2x8x8xbf16>, vector<2x8x8xf32> -> vector<2x8x8xf32>
    "tpu.trace_stop"() : () -> ()
    %276 = vector.broadcast %5 : vector<2x1x8xf32> to vector<2x8x8xf32>
    %277 = arith.addf %275, %276 : vector<2x8x8xf32>
    %cst_117 = arith.constant dense<0xFF800000> : vector<2x8xf32>
    %278 = vector.multi_reduction <maximumf>, %277, %cst_117 [2] : vector<2x8x8xf32> to vector<2x8xf32>
    %279 = vector.shape_cast %278 : vector<2x8xf32> to vector<2x8x1xf32>
    %280 = vector.broadcast %279 : vector<2x8x1xf32> to vector<2x8x8xf32>
    %281 = arith.subf %277, %280 : vector<2x8x8xf32>
    %282 = math.exp %281 : vector<2x8x8xf32>
    %cst_118 = arith.constant dense<0.000000e+00> : vector<2x8xf32>
    %283 = vector.multi_reduction <add>, %282, %cst_118 [2] : vector<2x8x8xf32> to vector<2x8xf32>
    %284 = vector.shape_cast %283 : vector<2x8xf32> to vector<2x8x1xf32>
    %285 = tpu.reciprocal %284 {approx = true} : vector<2x8x1xf32> -> vector<2x8x1xf32>
    %286 = vector.broadcast %285 : vector<2x8x1xf32> to vector<2x8x8xf32>
    %287 = arith.mulf %282, %286 : vector<2x8x8xf32>
    %288 = arith.truncf %287 : vector<2x8x8xf32> to vector<2x8x8xbf16>
    %289 = arith.truncf %272 : vector<2x8x8xf32> to vector<2x8x8xbf16>
    "tpu.trace_start"() <{level = 10 : i32, message = "bqk,bkd->bqd"}> : () -> ()
    %cst_119 = arith.constant dense<0.000000e+00> : vector<2x8x8xf32>
    %290 = tpu.matmul %288, %289, %cst_119 {dimension_numbers = #tpu.dot_dimension_numbers<[2], [1], [1], [2], [0, 0, 0, 1, 1, 2], [0], [0]>} : vector<2x8x8xbf16>, vector<2x8x8xbf16>, vector<2x8x8xf32> -> vector<2x8x8xf32>
    "tpu.trace_stop"() : () -> ()
    %291 = arith.truncf %290 : vector<2x8x8xf32> to vector<2x8x8xbf16>
    %292 = vector.extract_strided_slice %240 {offsets = [8, 0], sizes = [8, 32], strides = [1, 1]} : vector<32x32xf32> to vector<8x32xf32>
    %293 = arith.truncf %292 : vector<8x32xf32> to vector<8x32xbf16>
    "tpu.trace_start"() <{level = 10 : i32, message = "bqd,dh->bqh"}> : () -> ()
    %cst_120 = arith.constant dense<0.000000e+00> : vector<2x8x32xf32>
    %294 = tpu.matmul %291, %293, %cst_120 {dimension_numbers = #tpu.dot_dimension_numbers<[2], [0], [0, 1], [1], [0, 0, 0, 1, 1, 1], [], []>} : vector<2x8x8xbf16>, vector<8x32xbf16>, vector<2x8x32xf32> -> vector<2x8x32xf32>
    "tpu.trace_stop"() : () -> ()
    %295 = arith.addf %269, %294 : vector<2x8x32xf32>
    %296 = vector.extract_strided_slice %238 {offsets = [0, 0, 16], sizes = [2, 8, 8], strides = [1, 1, 1]} : vector<2x8x96xf32> to vector<2x8x8xf32>
    %297 = vector.extract_strided_slice %238 {offsets = [0, 0, 48], sizes = [2, 8, 8], strides = [1, 1, 1]} : vector<2x8x96xf32> to vector<2x8x8xf32>
    %298 = vector.extract_strided_slice %238 {offsets = [0, 0, 80], sizes = [2, 8, 8], strides = [1, 1, 1]} : vector<2x8x96xf32> to vector<2x8x8xf32>
    %299 = arith.truncf %296 : vector<2x8x8xf32> to vector<2x8x8xbf16>
    %300 = arith.truncf %297 : vector<2x8x8xf32> to vector<2x8x8xbf16>
    "tpu.trace_start"() <{level = 10 : i32, message = "bqd,bkd->bqk"}> : () -> ()
    %cst_121 = arith.constant dense<0.000000e+00> : vector<2x8x8xf32>
    %301 = tpu.matmul %299, %300, %cst_121 {dimension_numbers = #tpu.dot_dimension_numbers<[2], [2], [1], [1], [0, 0, 0, 1, 1, 1], [0], [0]>} : vector<2x8x8xbf16>, vector<2x8x8xbf16>, vector<2x8x8xf32> -> vector<2x8x8xf32>
    "tpu.trace_stop"() : () -> ()
    %302 = vector.broadcast %5 : vector<2x1x8xf32> to vector<2x8x8xf32>
    %303 = arith.addf %301, %302 : vector<2x8x8xf32>
    %cst_122 = arith.constant dense<0xFF800000> : vector<2x8xf32>
    %304 = vector.multi_reduction <maximumf>, %303, %cst_122 [2] : vector<2x8x8xf32> to vector<2x8xf32>
    %305 = vector.shape_cast %304 : vector<2x8xf32> to vector<2x8x1xf32>
    %306 = vector.broadcast %305 : vector<2x8x1xf32> to vector<2x8x8xf32>
    %307 = arith.subf %303, %306 : vector<2x8x8xf32>
    %308 = math.exp %307 : vector<2x8x8xf32>
    %cst_123 = arith.constant dense<0.000000e+00> : vector<2x8xf32>
    %309 = vector.multi_reduction <add>, %308, %cst_123 [2] : vector<2x8x8xf32> to vector<2x8xf32>
    %310 = vector.shape_cast %309 : vector<2x8xf32> to vector<2x8x1xf32>
    %311 = tpu.reciprocal %310 {approx = true} : vector<2x8x1xf32> -> vector<2x8x1xf32>
    %312 = vector.broadcast %311 : vector<2x8x1xf32> to vector<2x8x8xf32>
    %313 = arith.mulf %308, %312 : vector<2x8x8xf32>
    %314 = arith.truncf %313 : vector<2x8x8xf32> to vector<2x8x8xbf16>
    %315 = arith.truncf %298 : vector<2x8x8xf32> to vector<2x8x8xbf16>
    "tpu.trace_start"() <{level = 10 : i32, message = "bqk,bkd->bqd"}> : () -> ()
    %cst_124 = arith.constant dense<0.000000e+00> : vector<2x8x8xf32>
    %316 = tpu.matmul %314, %315, %cst_124 {dimension_numbers = #tpu.dot_dimension_numbers<[2], [1], [1], [2], [0, 0, 0, 1, 1, 2], [0], [0]>} : vector<2x8x8xbf16>, vector<2x8x8xbf16>, vector<2x8x8xf32> -> vector<2x8x8xf32>
    "tpu.trace_stop"() : () -> ()
    %317 = arith.truncf %316 : vector<2x8x8xf32> to vector<2x8x8xbf16>
    %318 = vector.extract_strided_slice %240 {offsets = [16, 0], sizes = [8, 32], strides = [1, 1]} : vector<32x32xf32> to vector<8x32xf32>
    %319 = arith.truncf %318 : vector<8x32xf32> to vector<8x32xbf16>
    "tpu.trace_start"() <{level = 10 : i32, message = "bqd,dh->bqh"}> : () -> ()
    %cst_125 = arith.constant dense<0.000000e+00> : vector<2x8x32xf32>
    %320 = tpu.matmul %317, %319, %cst_125 {dimension_numbers = #tpu.dot_dimension_numbers<[2], [0], [0, 1], [1], [0, 0, 0, 1, 1, 1], [], []>} : vector<2x8x8xbf16>, vector<8x32xbf16>, vector<2x8x32xf32> -> vector<2x8x32xf32>
    "tpu.trace_stop"() : () -> ()
    %321 = arith.addf %295, %320 : vector<2x8x32xf32>
    %322 = vector.extract_strided_slice %238 {offsets = [0, 0, 24], sizes = [2, 8, 8], strides = [1, 1, 1]} : vector<2x8x96xf32> to vector<2x8x8xf32>
    %323 = vector.extract_strided_slice %238 {offsets = [0, 0, 56], sizes = [2, 8, 8], strides = [1, 1, 1]} : vector<2x8x96xf32> to vector<2x8x8xf32>
    %324 = vector.extract_strided_slice %238 {offsets = [0, 0, 88], sizes = [2, 8, 8], strides = [1, 1, 1]} : vector<2x8x96xf32> to vector<2x8x8xf32>
    %325 = arith.truncf %322 : vector<2x8x8xf32> to vector<2x8x8xbf16>
    %326 = arith.truncf %323 : vector<2x8x8xf32> to vector<2x8x8xbf16>
    "tpu.trace_start"() <{level = 10 : i32, message = "bqd,bkd->bqk"}> : () -> ()
    %cst_126 = arith.constant dense<0.000000e+00> : vector<2x8x8xf32>
    %327 = tpu.matmul %325, %326, %cst_126 {dimension_numbers = #tpu.dot_dimension_numbers<[2], [2], [1], [1], [0, 0, 0, 1, 1, 1], [0], [0]>} : vector<2x8x8xbf16>, vector<2x8x8xbf16>, vector<2x8x8xf32> -> vector<2x8x8xf32>
    "tpu.trace_stop"() : () -> ()
    %328 = vector.broadcast %5 : vector<2x1x8xf32> to vector<2x8x8xf32>
    %329 = arith.addf %327, %328 : vector<2x8x8xf32>
    %cst_127 = arith.constant dense<0xFF800000> : vector<2x8xf32>
    %330 = vector.multi_reduction <maximumf>, %329, %cst_127 [2] : vector<2x8x8xf32> to vector<2x8xf32>
    %331 = vector.shape_cast %330 : vector<2x8xf32> to vector<2x8x1xf32>
    %332 = vector.broadcast %331 : vector<2x8x1xf32> to vector<2x8x8xf32>
    %333 = arith.subf %329, %332 : vector<2x8x8xf32>
    %334 = math.exp %333 : vector<2x8x8xf32>
    %cst_128 = arith.constant dense<0.000000e+00> : vector<2x8xf32>
    %335 = vector.multi_reduction <add>, %334, %cst_128 [2] : vector<2x8x8xf32> to vector<2x8xf32>
    %336 = vector.shape_cast %335 : vector<2x8xf32> to vector<2x8x1xf32>
    %337 = tpu.reciprocal %336 {approx = true} : vector<2x8x1xf32> -> vector<2x8x1xf32>
    %338 = vector.broadcast %337 : vector<2x8x1xf32> to vector<2x8x8xf32>
    %339 = arith.mulf %334, %338 : vector<2x8x8xf32>
    %340 = arith.truncf %339 : vector<2x8x8xf32> to vector<2x8x8xbf16>
    %341 = arith.truncf %324 : vector<2x8x8xf32> to vector<2x8x8xbf16>
    "tpu.trace_start"() <{level = 10 : i32, message = "bqk,bkd->bqd"}> : () -> ()
    %cst_129 = arith.constant dense<0.000000e+00> : vector<2x8x8xf32>
    %342 = tpu.matmul %340, %341, %cst_129 {dimension_numbers = #tpu.dot_dimension_numbers<[2], [1], [1], [2], [0, 0, 0, 1, 1, 2], [0], [0]>} : vector<2x8x8xbf16>, vector<2x8x8xbf16>, vector<2x8x8xf32> -> vector<2x8x8xf32>
    "tpu.trace_stop"() : () -> ()
    %343 = arith.truncf %342 : vector<2x8x8xf32> to vector<2x8x8xbf16>
    %344 = vector.extract_strided_slice %240 {offsets = [24, 0], sizes = [8, 32], strides = [1, 1]} : vector<32x32xf32> to vector<8x32xf32>
    %345 = arith.truncf %344 : vector<8x32xf32> to vector<8x32xbf16>
    "tpu.trace_start"() <{level = 10 : i32, message = "bqd,dh->bqh"}> : () -> ()
    %cst_130 = arith.constant dense<0.000000e+00> : vector<2x8x32xf32>
    %346 = tpu.matmul %343, %345, %cst_130 {dimension_numbers = #tpu.dot_dimension_numbers<[2], [0], [0, 1], [1], [0, 0, 0, 1, 1, 1], [], []>} : vector<2x8x8xbf16>, vector<8x32xbf16>, vector<2x8x32xf32> -> vector<2x8x32xf32>
    "tpu.trace_stop"() : () -> ()
    %347 = arith.addf %321, %346 : vector<2x8x32xf32>
    %348 = arith.addf %230, %347 : vector<2x8x32xf32>
    %c1_131 = arith.constant 1 : index
    %c0_132 = arith.constant 0 : index
    %c0_133 = arith.constant 0 : index
    %c0_134 = arith.constant 0 : index
    %349 = vector.load %arg8[%c1_131, %c0_132, %c0_133, %c0_134] : memref<2x1x1x32xf32, #tpu.memory_space<vmem>>, vector<1x1x1x32xf32>
    %350 = vector.shape_cast %349 : vector<1x1x1x32xf32> to vector<1x1x32xf32>
    %c1_135 = arith.constant 1 : index
    %c0_136 = arith.constant 0 : index
    %c0_137 = arith.constant 0 : index
    %c0_138 = arith.constant 0 : index
    %351 = vector.load %arg9[%c1_135, %c0_136, %c0_137, %c0_138] : memref<2x1x1x32xf32, #tpu.memory_space<vmem>>, vector<1x1x1x32xf32>
    %352 = vector.shape_cast %351 : vector<1x1x1x32xf32> to vector<1x1x32xf32>
    %cst_139 = arith.constant dense<0.000000e+00> : vector<2x8xf32>
    %353 = vector.multi_reduction <add>, %348, %cst_139 [2] : vector<2x8x32xf32> to vector<2x8xf32>
    %354 = vector.shape_cast %353 : vector<2x8xf32> to vector<2x8x1xf32>
    %cst_140 = arith.constant 3.200000e+01 : f32
    %355 = vector.broadcast %cst_140 : f32 to vector<2x8x1xf32>
    %356 = arith.divf %354, %355 : vector<2x8x1xf32>
    %357 = vector.broadcast %356 : vector<2x8x1xf32> to vector<2x8x32xf32>
    %358 = arith.subf %348, %357 : vector<2x8x32xf32>
    %359 = arith.mulf %358, %358 : vector<2x8x32xf32>
    %cst_141 = arith.constant dense<0.000000e+00> : vector<2x8xf32>
    %360 = vector.multi_reduction <add>, %359, %cst_141 [2] : vector<2x8x32xf32> to vector<2x8xf32>
    %361 = vector.shape_cast %360 : vector<2x8xf32> to vector<2x8x1xf32>
    %cst_142 = arith.constant 3.200000e+01 : f32
    %362 = vector.broadcast %cst_142 : f32 to vector<2x8x1xf32>
    %363 = arith.divf %361, %362 : vector<2x8x1xf32>
    %364 = vector.broadcast %356 : vector<2x8x1xf32> to vector<2x8x32xf32>
    %365 = arith.subf %348, %364 : vector<2x8x32xf32>
    %cst_143 = arith.constant 1.000000e-07 : f32
    %366 = vector.broadcast %cst_143 : f32 to vector<2x8x1xf32>
    %367 = arith.addf %363, %366 : vector<2x8x1xf32>
    %368 = math.rsqrt %367 : vector<2x8x1xf32>
    %369 = vector.broadcast %368 : vector<2x8x1xf32> to vector<2x8x32xf32>
    %370 = arith.mulf %365, %369 : vector<2x8x32xf32>
    %371 = vector.broadcast %350 : vector<1x1x32xf32> to vector<2x8x32xf32>
    %372 = arith.mulf %370, %371 : vector<2x8x32xf32>
    %373 = vector.broadcast %352 : vector<1x1x32xf32> to vector<2x8x32xf32>
    %374 = arith.addf %372, %373 : vector<2x8x32xf32>
    %375 = arith.truncf %374 : vector<2x8x32xf32> to vector<2x8x32xbf16>
    %c1_144 = arith.constant 1 : index
    %c0_145 = arith.constant 0 : index
    %c0_146 = arith.constant 0 : index
    %376 = vector.load %arg10[%c1_144, %c0_145, %c0_146] : memref<2x32x64xbf16, #tpu.memory_space<vmem>>, vector<1x32x64xbf16>
    %377 = vector.shape_cast %376 : vector<1x32x64xbf16> to vector<32x64xbf16>
    "tpu.trace_start"() <{level = 10 : i32, message = "bsh,hf->bsf"}> : () -> ()
    %cst_147 = arith.constant dense<0.000000e+00> : vector<2x8x64xf32>
    %378 = tpu.matmul %375, %377, %cst_147 {dimension_numbers = #tpu.dot_dimension_numbers<[2], [0], [0, 1], [1], [0, 0, 0, 1, 1, 1], [], []>} : vector<2x8x32xbf16>, vector<32x64xbf16>, vector<2x8x64xf32> -> vector<2x8x64xf32>
    "tpu.trace_stop"() : () -> ()
    %c1_148 = arith.constant 1 : index
    %c0_149 = arith.constant 0 : index
    %c0_150 = arith.constant 0 : index
    %c0_151 = arith.constant 0 : index
    %379 = vector.load %arg11[%c1_148, %c0_149, %c0_150, %c0_151] : memref<2x1x1x64xf32, #tpu.memory_space<vmem>>, vector<1x1x1x64xf32>
    %380 = vector.shape_cast %379 : vector<1x1x1x64xf32> to vector<1x1x64xf32>
    %381 = vector.broadcast %380 : vector<1x1x64xf32> to vector<2x8x64xf32>
    %382 = arith.addf %378, %381 : vector<2x8x64xf32>
    %383 = arith.mulf %382, %382 : vector<2x8x64xf32>
    %384 = arith.mulf %382, %383 : vector<2x8x64xf32>
    %cst_152 = arith.constant 4.471500e-02 : f32
    %385 = vector.broadcast %cst_152 : f32 to vector<2x8x64xf32>
    %386 = arith.mulf %385, %384 : vector<2x8x64xf32>
    %387 = arith.addf %382, %386 : vector<2x8x64xf32>
    %cst_153 = arith.constant 0.797884583 : f32
    %388 = vector.broadcast %cst_153 : f32 to vector<2x8x64xf32>
    %389 = arith.mulf %388, %387 : vector<2x8x64xf32>
    %390 = math.tanh %389 : vector<2x8x64xf32>
    %cst_154 = arith.constant 1.000000e+00 : f32
    %391 = vector.broadcast %cst_154 : f32 to vector<2x8x64xf32>
    %392 = arith.addf %391, %390 : vector<2x8x64xf32>
    %cst_155 = arith.constant 5.000000e-01 : f32
    %393 = vector.broadcast %cst_155 : f32 to vector<2x8x64xf32>
    %394 = arith.mulf %393, %392 : vector<2x8x64xf32>
    %395 = arith.mulf %382, %394 : vector<2x8x64xf32>
    %396 = arith.truncf %395 : vector<2x8x64xf32> to vector<2x8x64xbf16>
    %c1_156 = arith.constant 1 : index
    %c0_157 = arith.constant 0 : index
    %c0_158 = arith.constant 0 : index
    %397 = vector.load %arg12[%c1_156, %c0_157, %c0_158] : memref<2x64x32xbf16, #tpu.memory_space<vmem>>, vector<1x64x32xbf16>
    %398 = vector.shape_cast %397 : vector<1x64x32xbf16> to vector<64x32xbf16>
    "tpu.trace_start"() <{level = 10 : i32, message = "bsf,fh->bsh"}> : () -> ()
    %cst_159 = arith.constant dense<0.000000e+00> : vector<2x8x32xf32>
    %399 = tpu.matmul %396, %398, %cst_159 {dimension_numbers = #tpu.dot_dimension_numbers<[2], [0], [0, 1], [1], [0, 0, 0, 1, 1, 1], [], []>} : vector<2x8x64xbf16>, vector<64x32xbf16>, vector<2x8x32xf32> -> vector<2x8x32xf32>
    "tpu.trace_stop"() : () -> ()
    %c1_160 = arith.constant 1 : index
    %c0_161 = arith.constant 0 : index
    %c0_162 = arith.constant 0 : index
    %c0_163 = arith.constant 0 : index
    %400 = vector.load %arg13[%c1_160, %c0_161, %c0_162, %c0_163] : memref<2x1x1x32xf32, #tpu.memory_space<vmem>>, vector<1x1x1x32xf32>
    %401 = vector.shape_cast %400 : vector<1x1x1x32xf32> to vector<1x1x32xf32>
    %402 = vector.broadcast %401 : vector<1x1x32xf32> to vector<2x8x32xf32>
    %403 = arith.addf %399, %402 : vector<2x8x32xf32>
    %404 = arith.addf %374, %403 : vector<2x8x32xf32>
    %c1_164 = arith.constant 1 : index
    %c0_165 = arith.constant 0 : index
    %c0_166 = arith.constant 0 : index
    %c0_167 = arith.constant 0 : index
    %405 = vector.load %arg14[%c1_164, %c0_165, %c0_166, %c0_167] : memref<2x1x1x32xf32, #tpu.memory_space<vmem>>, vector<1x1x1x32xf32>
    %406 = vector.shape_cast %405 : vector<1x1x1x32xf32> to vector<1x1x32xf32>
    %c1_168 = arith.constant 1 : index
    %c0_169 = arith.constant 0 : index
    %c0_170 = arith.constant 0 : index
    %c0_171 = arith.constant 0 : index
    %407 = vector.load %arg15[%c1_168, %c0_169, %c0_170, %c0_171] : memref<2x1x1x32xf32, #tpu.memory_space<vmem>>, vector<1x1x1x32xf32>
    %408 = vector.shape_cast %407 : vector<1x1x1x32xf32> to vector<1x1x32xf32>
    %cst_172 = arith.constant dense<0.000000e+00> : vector<2x8xf32>
    %409 = vector.multi_reduction <add>, %404, %cst_172 [2] : vector<2x8x32xf32> to vector<2x8xf32>
    %410 = vector.shape_cast %409 : vector<2x8xf32> to vector<2x8x1xf32>
    %cst_173 = arith.constant 3.200000e+01 : f32
    %411 = vector.broadcast %cst_173 : f32 to vector<2x8x1xf32>
    %412 = arith.divf %410, %411 : vector<2x8x1xf32>
    %413 = vector.broadcast %412 : vector<2x8x1xf32> to vector<2x8x32xf32>
    %414 = arith.subf %404, %413 : vector<2x8x32xf32>
    %415 = arith.mulf %414, %414 : vector<2x8x32xf32>
    %cst_174 = arith.constant dense<0.000000e+00> : vector<2x8xf32>
    %416 = vector.multi_reduction <add>, %415, %cst_174 [2] : vector<2x8x32xf32> to vector<2x8xf32>
    %417 = vector.shape_cast %416 : vector<2x8xf32> to vector<2x8x1xf32>
    %cst_175 = arith.constant 3.200000e+01 : f32
    %418 = vector.broadcast %cst_175 : f32 to vector<2x8x1xf32>
    %419 = arith.divf %417, %418 : vector<2x8x1xf32>
    %420 = vector.broadcast %412 : vector<2x8x1xf32> to vector<2x8x32xf32>
    %421 = arith.subf %404, %420 : vector<2x8x32xf32>
    %cst_176 = arith.constant 1.000000e-07 : f32
    %422 = vector.broadcast %cst_176 : f32 to vector<2x8x1xf32>
    %423 = arith.addf %419, %422 : vector<2x8x1xf32>
    %424 = math.rsqrt %423 : vector<2x8x1xf32>
    %425 = vector.broadcast %424 : vector<2x8x1xf32> to vector<2x8x32xf32>
    %426 = arith.mulf %421, %425 : vector<2x8x32xf32>
    %427 = vector.broadcast %406 : vector<1x1x32xf32> to vector<2x8x32xf32>
    %428 = arith.mulf %426, %427 : vector<2x8x32xf32>
    %429 = vector.broadcast %408 : vector<1x1x32xf32> to vector<2x8x32xf32>
    %430 = arith.addf %428, %429 : vector<2x8x32xf32>
    %431 = vector.shape_cast %0 : vector<2x8xf32> to vector<2x8x1xf32>
    %432 = vector.broadcast %431 : vector<2x8x1xf32> to vector<2x8x32xf32>
    %433 = arith.mulf %430, %432 : vector<2x8x32xf32>
    %cst_177 = arith.constant dense<0.000000e+00> : vector<2x32xf32>
    %434 = vector.multi_reduction <add>, %433, %cst_177 [1] : vector<2x8x32xf32> to vector<2x32xf32>
    %cst_178 = arith.constant dense<0.000000e+00> : vector<2x1xf32>
    %435 = vector.multi_reduction <add>, %431, %cst_178 [1] : vector<2x8x1xf32> to vector<2x1xf32>
    %cst_179 = arith.constant 9.99999971E-10 : f32
    %436 = vector.broadcast %cst_179 : f32 to vector<2x1xf32>
    %437 = arith.maximumf %435, %436 : vector<2x1xf32>
    %438 = tpu.reciprocal %437 {approx = true} : vector<2x1xf32> -> vector<2x1xf32>
    %439 = vector.broadcast %438 : vector<2x1xf32> to vector<2x32xf32>
    %440 = arith.mulf %434, %439 : vector<2x32xf32>
    %441 = arith.truncf %440 : vector<2x32xf32> to vector<2x32xbf16>
    %c0_180 = arith.constant 0 : index
    %c0_181 = arith.constant 0 : index
    %442 = vector.load %arg16[%c0_180, %c0_181] : memref<32x23xbf16, #tpu.memory_space<vmem>>, vector<32x23xbf16>
    %cst_182 = arith.constant dense<0.000000e+00> : vector<2x23xf32>
    %443 = tpu.matmul %441, %442, %cst_182 {dimension_numbers = #tpu.dot_dimension_numbers<[1], [0], [0], [1], [0, 0, 1, 1], [], []>} : vector<2x32xbf16>, vector<32x23xbf16>, vector<2x23xf32> -> vector<2x23xf32>
    %c0_183 = arith.constant 0 : index
    %c0_184 = arith.constant 0 : index
    %444 = vector.load %arg17[%c0_183, %c0_184] : memref<1x23xf32, #tpu.memory_space<vmem>>, vector<1x23xf32>
    %445 = vector.broadcast %444 : vector<1x23xf32> to vector<2x23xf32>
    %446 = arith.addf %443, %445 : vector<2x23xf32>
    %c0_185 = arith.constant 0 : index
    %c0_186 = arith.constant 0 : index
    %447 = vector.load %arg18[%c0_185, %c0_186] : memref<2x23xf32, #tpu.memory_space<vmem>>, vector<2x23xf32>
    tpu.vector_store %arg18[%c0_185, %c0_186], %446 {strides = array<i32>} : memref<2x23xf32, #tpu.memory_space<vmem>>, vector<2x23xf32>,
    return
  }
}

</mosaic_0001>

<bundles_post_ra>
// kernel: tpu_custom_call.1
= control target key start
LH: loop header
LB: loop body
LE: loop exit
PB: predicated region body
PF: predicated region fallthrough
CT: control target
= control target key end

     0   :  { %s5113_s0 = inlined_call_operand.hbm [shape: f32[2,8,32], index: 0, kind: input, shape index: {}]   ;;  %s5114_s1 = inlined_call_operand.hbm [shape: f32[2,8], index: 1, kind: input, shape index: {}]   ;;  %s5115_s2 = inlined_call_operand.vmem [shape: f32[1,1,32], index: 2, kind: input, shape index: {}]   ;;  %s5116_s3 = inlined_call_operand.hbm [shape: f32[1,1,32], index: 3, kind: input, shape index: {}]   ;;  %s5117_s4 = inlined_call_operand.vmem [shape: bf16[2,32,96], index: 4, kind: input, shape index: {}]   ;;  %s5118_s5 = inlined_call_operand.hbm [shape: f32[2,1,1,96], index: 5, kind: input, shape index: {}]   ;;  %s5119_s6 = inlined_call_operand.vmem [shape: f32[2,32,32], index: 6, kind: input, shape index: {}]   ;;  %s5120_s7 = inlined_call_operand.hbm [shape: f32[2,1,1,32], index: 7, kind: input, shape index: {}]   ;;  %s5121_s8 = inlined_call_operand.hbm [shape: f32[2,1,1,32], index: 8, kind: input, shape index: {}]   ;;  %s5122_s9 = inlined_call_operand.hbm [shape: f32[2,1,1,32], index: 9, kind: input, shape index: {}]   ;;  %s5123_s10 = inlined_call_operand.vmem [shape: bf16[2,32,64], index: 10, kind: input, shape index: {}]   ;;  %s5124_s11 = inlined_call_operand.hbm [shape: f32[2,1,1,64], index: 11, kind: input, shape index: {}]   ;;  %s5125_s12 = inlined_call_operand.vmem [shape: bf16[2,64,32], index: 12, kind: input, shape index: {}]   ;;  %s5126_s13 = inlined_call_operand.hbm [shape: f32[2,1,1,32], index: 13, kind: input, shape index: {}]   ;;  %s5127_s14 = inlined_call_operand.vmem [shape: f32[2,1,1,32], index: 14, kind: input, shape index: {}]   ;;  %s5128_s15 = inlined_call_operand.vmem [shape: f32[2,1,1,32], index: 15, kind: input, shape index: {}]   ;;  %s5129_s16 = inlined_call_operand.vmem [shape: bf16[32,23], index: 16, kind: input, shape index: {}]   ;;  %s5130_s17 = inlined_call_operand.vmem [shape: f32[1,23], index: 17, kind: input, shape index: {}]   ;;  %s5131_s18 = inlined_call_operand.hbm [shape: f32[2,23], index: 18, kind: output, shape index: {}]  }
   0x1   :  { %5135 = sst [smem:[#allocation24_spill]] %s5113_s0 }
   0x2   :  { %5136 = sst [smem:[#allocation25_spill]] %s5114_s1 }
   0x3   :  { %5137 = sst [smem:[#allocation26_spill]] %s5115_s2 }
   0x4   :  { %5138 = sst [smem:[#allocation27_spill]] %s5131_s18 }
   0x5   :  { %23 = vsyncpa [#allocation3], 0 }
   0x6   :  { %24 = vsyncpa [#allocation6], 0 }
   0x7   :  { %25 = vsyncpa [#allocation9], 0 }
   0x8   :  { %26 = vsyncpa [#allocation12], 0 }
   0x9   :  { %27 = vsyncpa [#allocation15], 0 }
   0xa   :  { %28 = vsyncpa [#allocation4], 0  ;;  %s4279_s27 = smov [#allocation5]   ;;  %s4280_s29 = smov [#allocation8]  }
   0xb   :  { %s47_s28 = sshll.u32 %s4279_s27, 4  ;;  %s70_s30 = sshll.u32 %s4280_s29, 4  ;;  %s48_s28 = int_to_ptr.vmem [resolvable:$true] %s47_s28  ;;  %s4402_s30 = int_to_ptr.vmem [resolvable:$true] %s70_s30 }
   0xc   :  { %s5139_s1 = sld [smem:[#allocation25_spill]] }
  0x12   :  { %s4047_s20 = scalar_lea.hbm %s5139_s1, 32 }
  0x13   :  { %p4048_p0 = scmp.ne.s32.totalorder %s5139_s1, %s4047_s20  ;;  %p4051_p1 = scmp.lt.u32.totalorder %s4047_s20, %s5139_s1 }
  0x15   :  { %p4053_p2 = pnand %p4051_p1, %p4048_p0 }
  0x17   :  { %4056 = shalt.err (!%p4053_p2)
}
  0x18   :  { %s4057_s24 = scalar_lea.vmem %s48_s28, 32  ;;  %p4062_p4 = scmp.lt.s32.totalorder %s48_s28, %s48_s28 }
  0x19   :  { %p4058_p3 = scmp.ne.s32.totalorder %s48_s28, %s4057_s24  ;;  %p4063_p5 = scmp.lt.s32.totalorder %s4057_s24, %s4057_s24 }
  0x1b   :  { %p4064_p6 = por %p4063_p5, %p4062_p4 }
  0x1d   :  { %p4065_p7 = pnand %p4064_p6, %p4058_p3 }
  0x1f   :  { %4068 = shalt.err (!%p4065_p7)
}
  0x20   :  { %50 = dma.hbm_to_vmem [thread:$0]  %s5139_s1, 32, %s48_s28, [#allocation6]  }
  0x21   :  { %s4069_s0 = scalar_lea.hbm %s5118_s5, 32 }
  0x22   :  { %p4070_p8 = scmp.ne.s32.totalorder %s5118_s5, %s4069_s0  ;;  %p4073_p9 = scmp.lt.u32.totalorder %s4069_s0, %s5118_s5 }
  0x24   :  { %p4075_p10 = pnand %p4073_p9, %p4070_p8 }
  0x26   :  { %4078 = shalt.err (!%p4075_p10)
}
  0x27   :  { %s4079_s2 = scalar_lea.vmem %s4402_s30, 32  ;;  %p4084_p12 = scmp.lt.s32.totalorder %s4402_s30, %s4402_s30 }
  0x28   :  { %p4080_p11 = scmp.ne.s32.totalorder %s4402_s30, %s4079_s2  ;;  %p4085_p13 = scmp.lt.s32.totalorder %s4079_s2, %s4079_s2 }
  0x2a   :  { %p4086_p0 = por %p4085_p13, %p4084_p12 }
  0x2c   :  { %p4087_p1 = pnand %p4086_p0, %p4080_p11 }
  0x2e   :  { %4090 = shalt.err (!%p4087_p1)
}
  0x2f   :  { %s4281_s28 = smov 16   ;;  %s4282_s1 = smov 1  }
  0x30   :  { %76 = dma.hbm_to_vmem [thread:$0]  %s5118_s5, 32, %s4402_s30, [#allocation9], %s4281_s28, %s4281_s28, %s4282_s1  }
  0x31   :  { %s4283_s25 = smov [#allocation11]   ;;  %s4284_s27 = smov [#allocation14]  }
  0x32   :  { %s96_s26 = sshll.u32 %s4283_s25, 4  ;;  %s122_s29 = sshll.u32 %s4284_s27, 4  ;;  %s97_s26 = int_to_ptr.vmem [resolvable:$true] %s96_s26  ;;  %s4436_s29 = int_to_ptr.vmem [resolvable:$true] %s122_s29 }
  0x33   :  { %s4091_s21 = scalar_lea.hbm %s5121_s8, 32 }
  0x34   :  { %p4092_p2 = scmp.ne.s32.totalorder %s5121_s8, %s4091_s21  ;;  %p4095_p3 = scmp.lt.u32.totalorder %s4091_s21, %s5121_s8 }
  0x36   :  { %p4097_p4 = pnand %p4095_p3, %p4092_p2 }
  0x38   :  { %4100 = shalt.err (!%p4097_p4)
}
  0x39   :  { %s4101_s5 = scalar_lea.vmem %s97_s26, 32  ;;  %p4106_p6 = scmp.lt.s32.totalorder %s97_s26, %s97_s26 }
  0x3a   :  { %p4102_p5 = scmp.ne.s32.totalorder %s97_s26, %s4101_s5  ;;  %p4107_p7 = scmp.lt.s32.totalorder %s4101_s5, %s4101_s5 }
  0x3c   :  { %p4108_p8 = por %p4107_p7, %p4106_p6 }
  0x3e   :  { %p4109_p9 = pnand %p4108_p8, %p4102_p5 }
  0x40   :  { %4112 = shalt.err (!%p4109_p9)
}
  0x41   :  { %102 = dma.hbm_to_vmem [thread:$0]  %s5121_s8, 32, %s97_s26, [#allocation12], %s4281_s28, %s4281_s28, %s4282_s1  }
  0x42   :  { %s4113_s18 = scalar_lea.hbm %s5124_s11, 32 }
  0x43   :  { %p4114_p10 = scmp.ne.s32.totalorder %s5124_s11, %s4113_s18  ;;  %p4117_p11 = scmp.lt.u32.totalorder %s4113_s18, %s5124_s11 }
  0x45   :  { %p4119_p12 = pnand %p4117_p11, %p4114_p10 }
  0x47   :  { %4122 = shalt.err (!%p4119_p12)
}
  0x48   :  { %s4123_s20 = scalar_lea.vmem %s4436_s29, 32  ;;  %p4128_p0 = scmp.lt.s32.totalorder %s4436_s29, %s4436_s29 }
  0x49   :  { %p4124_p13 = scmp.ne.s32.totalorder %s4436_s29, %s4123_s20  ;;  %p4129_p1 = scmp.lt.s32.totalorder %s4123_s20, %s4123_s20 }
  0x4b   :  { %p4130_p2 = por %p4129_p1, %p4128_p0 }
  0x4d   :  { %p4131_p3 = pnand %p4130_p2, %p4124_p13 }
  0x4f   :  { %4134 = shalt.err (!%p4131_p3)
}
  0x50   :  { %128 = dma.hbm_to_vmem [thread:$0]  %s5124_s11, 32, %s4436_s29, [#allocation15], %s4281_s28, %s4281_s28, %s4282_s1  }
  0x51   :  { %s4285_s22 = smov [#allocation2]   ;;  %s5140_s23 = sld [smem:[#allocation24_spill]] }
  0x52   :  { %s34_s2 = sshll.u32 %s4285_s22, 4  ;;  %s35_s2 = int_to_ptr.vmem [resolvable:$true] %s34_s2 }
  0x57   :  { %s4135_s24 = scalar_lea.hbm %s5140_s23, 256 }
  0x58   :  { %p4136_p4 = scmp.ne.s32.totalorder %s5140_s23, %s4135_s24  ;;  %p4139_p5 = scmp.lt.u32.totalorder %s4135_s24, %s5140_s23 }
  0x5a   :  { %p4141_p6 = pnand %p4139_p5, %p4136_p4 }
  0x5c   :  { %4144 = shalt.err (!%p4141_p6)
}
  0x5d   :  { %s4145_s19 = scalar_lea.vmem %s35_s2, 256  ;;  %p4150_p8 = scmp.lt.s32.totalorder %s35_s2, %s35_s2 }
  0x5e   :  { %p4146_p7 = scmp.ne.s32.totalorder %s35_s2, %s4145_s19  ;;  %p4151_p9 = scmp.lt.s32.totalorder %s4145_s19, %s4145_s19 }
  0x60   :  { %p4152_p10 = por %p4151_p9, %p4150_p8 }
  0x62   :  { %p4153_p11 = pnand %p4152_p10, %p4146_p7 }
  0x64   :  { %4156 = shalt.err (!%p4153_p11)
}
  0x65   :  { %s4286_s11 = smov 128   ;;  %s4287_s29 = smov 8  }
  0x66   :  { %40 = dma.hbm_to_vmem [thread:$0]  %s5140_s23, 256, %s35_s2, [#allocation3], %s4286_s11, %s4286_s11, %s4287_s29  }
  0x67   :  { %s4288_s8 = smov [#allocation7]   ;;  %s4289_s22 = smov [#allocation10]  }
  0x68   :  { %s59_s26 = sshll.u32 %s4288_s8, 4  ;;  %s84_s5 = sshll.u32 %s4289_s22, 4  ;;  %s60_s26 = int_to_ptr.vmem [resolvable:$true] %s59_s26  ;;  %s85_s5 = int_to_ptr.vmem [resolvable:$true] %s84_s5 }
  0x69   :  { %s4157_s25 = scalar_lea.hbm %s5116_s3, 16 }
  0x6a   :  { %p4158_p12 = scmp.ne.s32.totalorder %s5116_s3, %s4157_s25  ;;  %p4161_p13 = scmp.lt.u32.totalorder %s4157_s25, %s5116_s3 }
  0x6c   :  { %p4163_p0 = pnand %p4161_p13, %p4158_p12 }
  0x6e   :  { %4166 = shalt.err (!%p4163_p0)
}
  0x6f   :  { %s4167_s2 = scalar_lea.vmem %s60_s26, 16  ;;  %s4171_s23 = scalar_lea.vmem %s60_s26, 32 }
  0x70   :  { %p4168_p1 = scmp.ne.s32.totalorder %s60_s26, %s4167_s2  ;;  %p4172_p2 = scmp.lt.s32.totalorder %s60_s26, %s60_s26 }
  0x71   :  { %p4173_p3 = scmp.lt.s32.totalorder %s4171_s23, %s4167_s2 }
  0x73   :  { %p4174_p4 = por %p4173_p3, %p4172_p2 }
  0x75   :  { %p4175_p5 = pnand %p4174_p4, %p4168_p1 }
  0x77   :  { %4178 = shalt.err (!%p4175_p5)
}
  0x78   :  { %62 = dma.hbm_to_vmem [thread:$0]  %s5116_s3, 16, %s60_s26, [#allocation6]  }
  0x79   :  { %s4179_s8 = scalar_lea.hbm %s5120_s7, 32 }
  0x7a   :  { %p4180_p6 = scmp.ne.s32.totalorder %s5120_s7, %s4179_s8  ;;  %p4183_p7 = scmp.lt.u32.totalorder %s4179_s8, %s5120_s7 }
  0x7c   :  { %p4185_p8 = pnand %p4183_p7, %p4180_p6 }
  0x7e   :  { %4188 = shalt.err (!%p4185_p8)
}
  0x7f   :  { %s4189_s18 = scalar_lea.vmem %s85_s5, 32  ;;  %p4194_p10 = scmp.lt.s32.totalorder %s85_s5, %s85_s5 }
  0x80   :  { %p4190_p9 = scmp.ne.s32.totalorder %s85_s5, %s4189_s18  ;;  %p4195_p11 = scmp.lt.s32.totalorder %s4189_s18, %s4189_s18 }
  0x82   :  { %p4196_p12 = por %p4195_p11, %p4194_p10 }
  0x84   :  { %p4197_p13 = pnand %p4196_p12, %p4190_p9 }
  0x86   :  { %4200 = shalt.err (!%p4197_p13)
}
  0x87   :  { %90 = dma.hbm_to_vmem [thread:$0]  %s5120_s7, 32, %s85_s5, [#allocation9], %s4281_s28, %s4281_s28, %s4282_s1  }
  0x88   :  { %s4290_s27 = smov [#allocation13]   ;;  %s4291_s19 = smov [#allocation16]  }
  0x89   :  { %s108_s0 = sshll.u32 %s4290_s27, 4  ;;  %s136_s2 = sshll.u32 %s4291_s19, 4  ;;  %s109_s0 = int_to_ptr.vmem [resolvable:$true] %s108_s0  ;;  %s137_s2 = int_to_ptr.vmem [resolvable:$true] %s136_s2 }
  0x8a   :  { %s4201_s29 = scalar_lea.hbm %s5122_s9, 32 }
  0x8b   :  { %p4202_p0 = scmp.ne.s32.totalorder %s5122_s9, %s4201_s29  ;;  %p4205_p1 = scmp.lt.u32.totalorder %s4201_s29, %s5122_s9 }
  0x8d   :  { %p4207_p2 = pnand %p4205_p1, %p4202_p0 }
  0x8f   :  { %4210 = shalt.err (!%p4207_p2)
}
  0x90   :  { %s4211_s7 = scalar_lea.vmem %s109_s0, 32  ;;  %p4216_p4 = scmp.lt.s32.totalorder %s109_s0, %s109_s0 }
  0x91   :  { %p4212_p3 = scmp.ne.s32.totalorder %s109_s0, %s4211_s7  ;;  %p4217_p5 = scmp.lt.s32.totalorder %s4211_s7, %s4211_s7 }
  0x93   :  { %p4218_p6 = por %p4217_p5, %p4216_p4 }
  0x95   :  { %p4219_p7 = pnand %p4218_p6, %p4212_p3 }
  0x97   :  { %4222 = shalt.err (!%p4219_p7)
}
  0x98   :  { %114 = dma.hbm_to_vmem [thread:$0]  %s5122_s9, 32, %s109_s0, [#allocation12], %s4281_s28, %s4281_s28, %s4282_s1  }
  0x99   :  { %s4223_s18 = scalar_lea.hbm %s5126_s13, 32 }
  0x9a   :  { %p4224_p8 = scmp.ne.s32.totalorder %s5126_s13, %s4223_s18  ;;  %p4227_p9 = scmp.lt.u32.totalorder %s4223_s18, %s5126_s13 }
  0x9c   :  { %p4229_p10 = pnand %p4227_p9, %p4224_p8 }
  0x9e   :  { %4232 = shalt.err (!%p4229_p10)
}
  0x9f   :  { %s4233_s23 = scalar_lea.vmem %s137_s2, 32  ;;  %p4238_p12 = scmp.lt.s32.totalorder %s137_s2, %s137_s2 }
  0xa0   :  { %p4234_p11 = scmp.ne.s32.totalorder %s137_s2, %s4233_s23  ;;  %p4239_p13 = scmp.lt.s32.totalorder %s4233_s23, %s4233_s23 }
  0xa2   :  { %p4240_p0 = por %p4239_p13, %p4238_p12 }
  0xa4   :  { %p4241_p1 = pnand %p4240_p0, %p4234_p11 }
  0xa6   :  { %4244 = shalt.err (!%p4241_p1)
}
  0xa7   :  { %142 = dma.hbm_to_vmem [thread:$0]  %s5126_s13, 32, %s137_s2, [#allocation15], %s4281_s28, %s4281_s28, %s4282_s1  }
  0xa8   :  { %4267 = dma.done.wait [#allocation3], 256  }
  0xa9   :  { %4268 = vsyncadd [#allocation3], 4294967040 }
  0xaa   :  { %4269 = dma.done.wait [#allocation6], 48  }
  0xab   :  { %4270 = vsyncadd [#allocation6], 4294967248 }
  0xac   :  { %4271 = dma.done.wait [#allocation9], 64  }
  0xad   :  { %4272 = vsyncadd [#allocation9], 4294967232 }
  0xae   :  { %4273 = dma.done.wait [#allocation12], 64  }
  0xaf   :  { %4274 = vsyncadd [#allocation12], 4294967232 }
  0xb0   :  { %4275 = dma.done.wait [#allocation15], 64  }
  0xb1   :  { %4276 = vsyncadd [#allocation15], 4294967232  ;;  %vm212_vm0 = vcmask 261120   ;;  %v208_v0 = vld [vmem:[#allocation2] sm:$0xff]  ;;  %v209_v1 = vld [vmem:[#allocation2 + $0x8] sm:$0xff]  ;;  %v4292_v15 = vmov 0.0   ;;  %v185_v49 = vlaneseq }
  0xb2   :  { %v213_v2 = vsel %vm212_vm0, %v208_v0, 0.0  ;;  %v216_v3 = vsel %vm212_vm0, %v209_v1, 0.0  ;;  %v3932_v14 = vld [vmem:[%s5117_s4] sm:$0xff]   ;;  %3600 = vmatprep.subr.bf16.mxu0 %v4292_v15  ;;  %3608 = vmatprep.subr.bf16.mxu1 %v4292_v15  ;;  %v3933_v16 = vld [vmem:[%s5117_s4 + $0x8] sm:$0xff]   ;;  %vm4293_vm1 = vmmov 0   ;;  %s5141_s21 = sld [smem:[#allocation26_spill]] }
  0xb3   :  { %214 = vadd.xlane.f32.xlu0 %v213_v2  ;;  %3601 = vmatpush3.bf16.msra.mxu0 %v3932_v14  ;;  %v3362_v29 = vld [vmem:[#allocation7] ss:$0 sm:$0xff]  ;;  %v3363_v34 = vld [vmem:[#allocation8] ss:$0 sm:$0xff]  ;;  %s4294_s20 = smov 96   ;;  %vm352_vm2 = vcmask 64512  }
  0xb4   :  { %3604 = vmatprep.mubr.msk.bf16.mxu0 %vm4293_vm1, %v4292_v15  ;;  %3602 = vmatprep.subr.bf16.mxu0 %v4292_v15  ;;  %v4295_v47 = vmov 1966171168   ;;  %v4592_v51 = vshrl.u32 %v185_v49, 7  ;;  %v179_v52 = vld [vmem:[#allocation5] sm:$0x3]  ;;  %s4296_s8 = smov 64  }
  0xb5   :  { %3610 = vmatprep.mubr.msk.bf16.mxu1 %vm4293_vm1, %v4292_v15  ;;  %v183_v48 = vunpack.c.l.s4 %v4295_v47  ;;  %v180_v53 = vsub.f32 1.0, %v179_v52  ;;  %s4297_s22 = smov 88   ;;  %s4298_s7 = smov 120   ;;  %vm477_vm3 = vcmask 1043456   ;;  %vm1647_vm4 = vcmask 523264  }
  0xb6   :  { %v4596_v60 = vsub.s32 0, %v4592_v51  ;;  %s4299_s24 = smov 56   ;;  %s4300_s25 = smov 80   ;;  %vm3282_vm5 = vcmask 1041409   ;;  %vm3340_vm6 = vcmask 181248  }
  0xb7   :  { %217 = vadd.xlane.f32.xlu0 %v216_v3  ;;  %3603 = vmatpush3.bf16.msra.mxu0 %v3933_v16  ;;  %v184_v50 = vunpack.c.0.s8 %v183_v48  ;;  %s4301_s18 = smov 112   ;;  %s4302_s27 = smov 48  }
  0xb8   :  { %3614 = vmatprep.subr.bf16.mxu0 %v4292_v15  ;;  %v3361_v25 = vld [vmem:[%s5141_s21] ss:$0 sm:$0xff]  ;;  %s4303_s19 = smov 72   ;;  %s4304_s23 = smov 104  }
  0xb9   :  { %v187_v54 = vsub.s32 %v184_v50, %v4592_v51  ;;  %s4305_s13 = smov 40  }
  0xbb   :  { %v188_v55 = vrot.slane %v180_v53, %v187_v54 }
  0xbd   :  { %v189_v56 = vcombine.high %v188_v55, %v188_v55  ;;  %v196_v57 = vrot.slane %v188_v55, %v187_v54 }
  0xbf   :  { %v203_v58 = vrot.slane %v189_v56, %v187_v54  ;;  %v206_v59 = vmul.f32 -1e+09, %v196_v57 }
  0xc1   :  { %v207_v61 = vmul.f32 -1e+09, %v203_v58  ;;  %v4599_v62 = vrot.slane %v206_v59, %v4596_v60 }
  0xc3   :  { %v4602_v63 = vrot.slane %v207_v61, %v4596_v60 }
 0x140   :  { %v215_v4 = vpop.xlane.xlu0 %214 }
 0x141   :  { %v220_v5 = vmul.f32 0.03125, %v215_v4 }
 0x143   :  { %v222_v6 = vsub.f32 %v208_v0, %v220_v5 }
 0x144   :  { %v218_v7 = vpop.xlane.xlu0 %217 }
 0x145   :  { %v221_v8 = vmul.f32 0.03125, %v218_v7  ;;  %v224_v9 = vmul.f32 %v222_v6, %v222_v6 }
 0x147   :  { %v223_v10 = vsub.f32 %v209_v1, %v221_v8  ;;  %v226_v11 = vsel %vm212_vm0, %v224_v9, 0.0 }
 0x148   :  { %227 = vadd.xlane.f32.xlu1 %v226_v11 }
 0x149   :  { %v225_v12 = vmul.f32 %v223_v10, %v223_v10 }
 0x14b   :  { %v229_v13 = vsel %vm212_vm0, %v225_v12, 0.0 }
 0x14c   :  { %230 = vadd.xlane.f32.xlu1 %v229_v13 }
 0x1d5   :  { %v228_v17 = vpop.xlane.xlu1 %227 }
 0x1d6   :  { %v232_v18 = vmul.f32 0.03125, %v228_v17 }
 0x1d8   :  { %v234_v19 = vadd.f32 1e-07, %v232_v18 }
 0x1d9   :  { %v231_v20 = vpop.xlane.xlu1 %230 }
 0x1da   :  { %3950 = vrsqrt.f32 %v234_v19  ;;  %v233_v21 = vmul.f32 0.03125, %v231_v20 }
 0x1dc   :  { %v235_v22 = vadd.f32 1e-07, %v233_v21 }
 0x1de   :  { %3952 = vrsqrt.f32 %v235_v22 }
 0x1e4   :  { %v3951_v23 = vpop.eup %3950 }
 0x1e5   :  { %v238_v24 = vmul.f32 %v3951_v23, %v222_v6 }
 0x1e7   :  { %v246_v28 = vmul.f32 %v3361_v25, %v238_v24 }
 0x1e8   :  { %v3953_v26 = vpop.eup %3952 }
 0x1e9   :  { %v239_v27 = vmul.f32 %v3953_v26, %v223_v10  ;;  %v4563_v31 = vadd.f32 %v3362_v29, %v246_v28 }
 0x1eb   :  { %v247_v30 = vmul.f32 %v3361_v25, %v239_v27 }
 0x1ed   :  { %v4565_v32 = vadd.f32 %v3362_v29, %v247_v30  ;;  %v330_v29 = vld [vmem:[%s5119_s6] sm:$0xff] }
 0x1ee   :  { %v571_v30 = vpack.c.bf16 %v330_v29, %v330_v29 }
 0x1ef   :  { %v3481_v33 = vpack.c.bf16 %v4565_v32, %v4563_v31 }
 0x1f1   :  { %3605 = vmatmul.mubr.msk.bf16.vlgmr.msra.gmra.mrb[0].mxu0 %vm212_vm0, %v3481_v33 }
 0x1f2   :  { %3616 = vmatprep.mubr.msk.bf16.mxu0 %vm4293_vm1, %v4292_v15 }
 0x2c4   :  { %v323_v35 = vpop.f32.mrb[0].mxu0 }
 0x2c5   :  { %v324_v36 = vadd.f32 %v3363_v34, %v323_v35  ;;  %v3606_v37 = vpop.f32.mrb[1].mxu0 }
 0x2c6   :  { %v326_v38 = vpop.f32.mrb[2].mxu0 }
 0x2c7   :  { %v4572_v39 = vpack.c.bf16 %v324_v36, %v324_v36  ;;  %v327_v40 = vadd.f32 %v3363_v34, %v326_v38  ;;  %v3607_v41 = vpop.f32.mrb[3].mxu0  ;;  %v581_v38 = vsel %vm477_vm3, %v571_v30, 0 }
 0x2c9   :  { %v4574_v42 = vpack.c.bf16 %v327_v40, %v327_v40  ;;  %350 = vrot.lane.b32.xlu0 %v4572_v39, %s4294_s20 }
 0x2cb   :  { %400 = vrot.lane.b32.xlu1 %v4574_v42, %s4294_s20 }
 0x33b   :  { %v351_v43 = vpop.permute.xlu0 %350 }
 0x33c   :  { %v357_v44 = vsel %vm352_vm2, %v351_v43, 0 }
 0x33d   :  { %3609 = vmatpush3.bf16.xpose.msra.mxu1 %v357_v44  ;;  %v401_v45 = vpop.permute.xlu1 %400 }
 0x33e   :  { %v406_v46 = vsel %vm352_vm2, %v401_v45, 0  ;;  %3620 = vmatprep.subr.bf16.mxu1 %v4292_v15 }
 0x33f   :  { %3615 = vmatpush3.bf16.xpose.msra.mxu0 %v406_v46 }
 0x340   :  { %3626 = vmatprep.subr.bf16.mxu0 %v4292_v15 }
 0x344   :  { %3611 = vmatmul.mubr.msk.bf16.vlgmr.msra.gmra.mrb[0].mxu1 %vm352_vm2, %v4572_v39 }
 0x345   :  { %3622 = vmatprep.mubr.msk.bf16.mxu1 %vm4293_vm1, %v4292_v15 }
 0x346   :  { %3617 = vmatmul.mubr.msk.bf16.vlgmr.msra.gmra.mrb[4].mxu0 %vm352_vm2, %v4574_v42 }
 0x347   :  { %3628 = vmatprep.mubr.msk.bf16.mxu0 %vm4293_vm1, %v4292_v15 }
 0x417   :  { %v393_v0 = vpop.f32.mrb[0].mxu1 }
 0x418   :  { %v394_v1 = vadd.f32 %v393_v0, %v4599_v62  ;;  %v3612_v2 = vpop.f32.mrb[1].mxu1 }
 0x419   :  { %v396_v3 = vpop.f32.mrb[2].mxu1  ;;  %v442_v4 = vpop.f32.mrb[4].mxu0 }
 0x41a   :  { %v443_v5 = vadd.f32 %v442_v4, %v4602_v63  ;;  %v3613_v6 = vpop.f32.mrb[3].mxu1  ;;  %v3618_v7 = vpop.f32.mrb[5].mxu0  ;;  %v448_v8 = vsel %vm352_vm2, %v394_v1, -inf }
 0x41b   :  { %v445_v9 = vpop.f32.mrb[6].mxu0  ;;  %449 = vmax.xlane.f32.xlu1 %v448_v8 }
 0x41c   :  { %v3619_v10 = vpop.f32.mrb[7].mxu0  ;;  %v451_v11 = vsel %vm352_vm2, %v443_v5, -inf }
 0x41d   :  { %452 = vmax.xlane.f32.xlu0 %v451_v11 }
 0x4a8   :  { %v450_v12 = vpop.xlane.xlu1 %449 }
 0x4a9   :  { %v454_v13 = vsub.f32 %v394_v1, %v450_v12 }
 0x4aa   :  { %v453_v14 = vpop.xlane.xlu0 %452 }
 0x4ab   :  { %v456_v16 = vmul.f32 1.442695, %v454_v13  ;;  %v455_v17 = vsub.f32 %v443_v5, %v453_v14 }
 0x4ad   :  { %3954 = vpow2.f32 %v456_v16  ;;  %v458_v18 = vmul.f32 1.442695, %v455_v17 }
 0x4af   :  { %3956 = vpow2.f32 %v458_v18 }
 0x4b7   :  { %v3955_v19 = vpop.eup %3954 }
 0x4b8   :  { %v460_v20 = vsel %vm352_vm2, %v3955_v19, 0.0 }
 0x4b9   :  { %v3957_v21 = vpop.eup %3956  ;;  %461 = vadd.xlane.f32.xlu0 %v460_v20 }
 0x4ba   :  { %v463_v22 = vsel %vm352_vm2, %v3957_v21, 0.0 }
 0x4bb   :  { %464 = vadd.xlane.f32.xlu1 %v463_v22 }
 0x4cc   :  { %521 = vrot.lane.b32.xlu1 %v4574_v42, %s4296_s8 }
 0x4cf   :  { %472 = vrot.lane.b32.xlu0 %v4572_v39, %s4296_s8 }
 0x4d0   :  { %634 = vrot.lane.b32.xlu1 %v4572_v39, %s4297_s22 }
 0x4d3   :  { %632 = vrot.lane.b32.xlu0 %v4572_v39, %s4298_s7 }
 0x4d4   :  { %684 = vrot.lane.b32.xlu1 %v4574_v42, %s4297_s22 }
 0x4d8   :  { %682 = vrot.lane.b32.xlu1 %v4574_v42, %s4298_s7 }
 0x546   :  { %v462_v23 = vpop.xlane.xlu0 %461 }
 0x547   :  { %3958 = vrcp.f32 %v462_v23 }
 0x548   :  { %v465_v24 = vpop.xlane.xlu1 %464 }
 0x549   :  { %3960 = vrcp.f32 %v465_v24 }
 0x54a   :  { %v473_v25 = vpop.permute.xlu0 %472 }
 0x54b   :  { %v479_v26 = vsel %vm477_vm3, %v473_v25, 0 }
 0x54c   :  { %v522_v27 = vpop.permute.xlu1 %521  ;;  %3621 = vmatpush3.bf16.msra.mxu1 %v479_v26 }
 0x54d   :  { %v527_v28 = vsel %vm477_vm3, %v522_v27, 0  ;;  %3632 = vmatprep.subr.bf16.mxu1 %v4292_v15 }
 0x54e   :  { %3627 = vmatpush3.bf16.msra.mxu0 %v527_v28  ;;  %v633_v44 = vpop.permute.xlu0 %632 }
 0x54f   :  { %3638 = vmatprep.subr.bf16.mxu0 %v4292_v15 }
 0x550   :  { %v635_v40 = vpop.permute.xlu1 %634 }
 0x551   :  { %v3959_v33 = vpop.eup %3958  ;;  %v640_v43 = vsel %vm352_vm2, %v635_v40, 0 }
 0x552   :  { %v468_v34 = vmul.f32 %v3959_v33, %v3955_v19 }
 0x553   :  { %v3961_v35 = vpop.eup %3960 }
 0x554   :  { %v469_v36 = vmul.f32 %v3961_v35, %v3957_v21  ;;  %v470_v37 = vpack.c.bf16 %v468_v34, %v468_v34  ;;  %v685_v46 = vpop.permute.xlu1 %684 }
 0x555   :  { %v690_v55 = vsel %vm352_vm2, %v685_v46, 0 }
 0x556   :  { %3623 = vmatmul.mubr.msk.bf16.vlgmr.msra.gmra.mrb[4].mxu1 %vm352_vm2, %v470_v37  ;;  %v471_v41 = vpack.c.bf16 %v469_v36, %v469_v36 }
 0x557   :  { %3633 = vmatpush3.bf16.msra.mxu1 %v581_v38  ;;  %3634 = vmatprep.mubr.msk.bf16.mxu1 %vm4293_vm1, %v4292_v15 }
 0x558   :  { %3629 = vmatmul.mubr.msk.bf16.vlgmr.msra.gmra.mrb[8].mxu0 %vm352_vm2, %v471_v41  ;;  %3644 = vmatprep.subr.bf16.mxu1 %v4292_v15  ;;  %v683_v61 = vpop.permute.xlu1 %682 }
 0x559   :  { %3639 = vmatpush3.bf16.xpose.msra.mxu0 %v640_v43  ;;  %3640 = vmatprep.mubr.msk.bf16.mxu0 %vm4293_vm1, %v4292_v15  ;;  %v331_v43 = vld [vmem:[%s5119_s6 + $0x8] sm:$0xff] }
 0x55a   :  { %3650 = vmatprep.subr.bf16.mxu0 %v4292_v15 }
 0x560   :  { %3641 = vmatmul.mubr.msk.bf16.vlgmr.msra.gmra.mrb[12].mxu0 %vm352_vm2, %v633_v44  ;;  %v854_v44 = vpack.c.bf16 %v331_v43, %v331_v43 }
 0x561   :  { %3652 = vmatprep.mubr.msk.bf16.mxu0 %vm4293_vm1, %v4292_v15 }
 0x629   :  { %v515_v45 = vpop.f32.mrb[4].mxu1 }
 0x62a   :  { %v3624_v47 = vpop.f32.mrb[5].mxu1 }
 0x62b   :  { %v518_v48 = vpop.f32.mrb[6].mxu1  ;;  %v563_v49 = vpop.f32.mrb[8].mxu0 }
 0x62c   :  { %v3482_v50 = vpack.c.bf16 %v563_v49, %v515_v45  ;;  %v3625_v52 = vpop.f32.mrb[7].mxu1  ;;  %v3630_v53 = vpop.f32.mrb[9].mxu0  ;;  %v864_v45 = vsel %vm477_vm3, %v854_v44, 0 }
 0x62d   :  { %v566_v54 = vpop.f32.mrb[10].mxu0 }
 0x62e   :  { %v3631_v56 = vpop.f32.mrb[11].mxu0  ;;  %3635 = vmatmul.mubr.msk.bf16.vlgmr.msra.gmra.mrb[8].mxu1 %vm352_vm2, %v3482_v50 }
 0x62f   :  { %3645 = vmatpush3.bf16.xpose.msra.mxu1 %v690_v55  ;;  %3646 = vmatprep.mubr.msk.bf16.mxu1 %vm4293_vm1, %v4292_v15 }
 0x630   :  { %3656 = vmatprep.subr.bf16.mxu1 %v4292_v15 }
 0x633   :  { %v676_v57 = vpop.f32.mrb[12].mxu0 }
 0x634   :  { %v677_v58 = vadd.f32 %v676_v57, %v4599_v62  ;;  %v3642_v59 = vpop.f32.mrb[13].mxu0 }
 0x635   :  { %v679_v0 = vpop.f32.mrb[14].mxu0 }
 0x636   :  { %v3643_v1 = vpop.f32.mrb[15].mxu0  ;;  %3647 = vmatmul.mubr.msk.bf16.vlgmr.msra.gmra.mrb[12].mxu1 %vm352_vm2, %v683_v61  ;;  %v732_v2 = vsel %vm352_vm2, %v677_v58, -inf }
 0x637   :  { %733 = vmax.xlane.f32.xlu0 %v732_v2  ;;  %3658 = vmatprep.mubr.msk.bf16.mxu1 %vm4293_vm1, %v4292_v15 }
 0x6c4   :  { %v734_v3 = vpop.xlane.xlu0 %733 }
 0x6c5   :  { %v738_v4 = vsub.f32 %v677_v58, %v734_v3 }
 0x6c7   :  { %v740_v5 = vmul.f32 1.442695, %v738_v4 }
 0x6c9   :  { %3962 = vpow2.f32 %v740_v5 }
 0x6d3   :  { %v3963_v6 = vpop.eup %3962 }
 0x6d4   :  { %v744_v7 = vsel %vm352_vm2, %v3963_v6, 0.0 }
 0x6d5   :  { %745 = vadd.xlane.f32.xlu0 %v744_v7 }
 0x701   :  { %v4653_v8 = vpop.f32.mrb[8].mxu1 }
 0x702   :  { %v3636_v9 = vpop.f32.mrb[9].mxu1 }
 0x703   :  { %v4655_v10 = vpop.f32.mrb[10].mxu1 }
 0x704   :  { %v3637_v11 = vpop.f32.mrb[11].mxu1 }
 0x705   :  { %v3374_v11 = vld [vmem:[#allocation10] ss:$0 sm:$0xff] }
 0x709   :  { %v726_v12 = vpop.f32.mrb[12].mxu1 }
 0x70a   :  { %v727_v13 = vadd.f32 %v726_v12, %v4602_v63  ;;  %v3648_v14 = vpop.f32.mrb[13].mxu1  ;;  %v630_v12 = vadd.f32 %v3374_v11, %v4653_v8 }
 0x70b   :  { %v729_v16 = vpop.f32.mrb[14].mxu1  ;;  %v631_v14 = vadd.f32 %v3374_v11, %v4655_v10 }
 0x70c   :  { %v3649_v17 = vpop.f32.mrb[15].mxu1  ;;  %v735_v18 = vsel %vm352_vm2, %v727_v13, -inf }
 0x70d   :  { %736 = vmax.xlane.f32.xlu1 %v735_v18 }
 0x71e   :  { %804 = vrot.lane.b32.xlu1 %v4574_v42, %s4299_s24 }
 0x722   :  { %911 = vrot.lane.b32.xlu1 %v4572_v39, %s4300_s25 }
 0x726   :  { %961 = vrot.lane.b32.xlu1 %v4574_v42, %s4300_s25 }
 0x72a   :  { %959 = vrot.lane.b32.xlu1 %v4574_v42, %s4301_s18 }
 0x762   :  { %v746_v26 = vpop.xlane.xlu0 %745 }
 0x79a   :  { %v737_v19 = vpop.xlane.xlu1 %736 }
 0x79b   :  { %v739_v20 = vsub.f32 %v727_v13, %v737_v19 }
 0x79d   :  { %v742_v21 = vmul.f32 1.442695, %v739_v20 }
 0x79e   :  { %v805_v22 = vpop.permute.xlu1 %804 }
 0x79f   :  { %3964 = vpow2.f32 %v742_v21  ;;  %v810_v23 = vsel %vm477_vm3, %v805_v22, 0 }
 0x7a0   :  { %3657 = vmatpush3.bf16.msra.mxu1 %v810_v23  ;;  %3966 = vrcp.f32 %v746_v26 }
 0x7a1   :  { %3668 = vmatprep.subr.bf16.mxu1 %v4292_v15 }
 0x7a2   :  { %v912_v37 = vpop.permute.xlu1 %911 }
 0x7a3   :  { %v917_v40 = vsel %vm352_vm2, %v912_v37, 0 }
 0x7a6   :  { %v962_v50 = vpop.permute.xlu1 %961 }
 0x7a7   :  { %v967_v56 = vsel %vm352_vm2, %v962_v50, 0 }
 0x7a9   :  { %v3965_v24 = vpop.eup %3964 }
 0x7aa   :  { %v747_v25 = vsel %vm352_vm2, %v3965_v24, 0.0  ;;  %v3967_v27 = vpop.eup %3966  ;;  %v960_v0 = vpop.permute.xlu1 %959 }
 0x7ab   :  { %748 = vadd.xlane.f32.xlu0 %v747_v25  ;;  %v752_v29 = vmul.f32 %v3967_v27, %v3963_v6 }
 0x7ad   :  { %v754_v34 = vpack.c.bf16 %v752_v29, %v752_v29 }
 0x7c1   :  { %756 = vrot.lane.b32.xlu0 %v4572_v39, %s4299_s24 }
 0x7c5   :  { %909 = vrot.lane.b32.xlu0 %v4572_v39, %s4301_s18 }
 0x838   :  { %v749_v28 = vpop.xlane.xlu0 %748 }
 0x839   :  { %3968 = vrcp.f32 %v749_v28 }
 0x83c   :  { %v757_v30 = vpop.permute.xlu0 %756 }
 0x83d   :  { %v762_v33 = vsel %vm477_vm3, %v757_v30, 0 }
 0x83e   :  { %3651 = vmatpush3.bf16.msra.mxu0 %v762_v33 }
 0x83f   :  { %3662 = vmatprep.subr.bf16.mxu0 %v4292_v15 }
 0x840   :  { %v910_v41 = vpop.permute.xlu0 %909 }
 0x841   :  { %3653 = vmatmul.mubr.msk.bf16.vlgmr.msra.gmra.mrb[16].mxu0 %vm352_vm2, %v754_v34 }
 0x842   :  { %3664 = vmatprep.mubr.msk.bf16.mxu0 %vm4293_vm1, %v4292_v15  ;;  %3663 = vmatpush3.bf16.msra.mxu0 %v864_v45 }
 0x843   :  { %v3969_v35 = vpop.eup %3968  ;;  %3674 = vmatprep.subr.bf16.mxu0 %v4292_v15 }
 0x844   :  { %v753_v36 = vmul.f32 %v3969_v35, %v3965_v24 }
 0x846   :  { %v755_v38 = vpack.c.bf16 %v753_v36, %v753_v36 }
 0x848   :  { %3659 = vmatmul.mubr.msk.bf16.vlgmr.msra.gmra.mrb[16].mxu1 %vm352_vm2, %v755_v38 }
 0x849   :  { %3669 = vmatpush3.bf16.xpose.msra.mxu1 %v917_v40  ;;  %3670 = vmatprep.mubr.msk.bf16.mxu1 %vm4293_vm1, %v4292_v15 }
 0x84a   :  { %3680 = vmatprep.subr.bf16.mxu1 %v4292_v15 }
 0x850   :  { %3671 = vmatmul.mubr.msk.bf16.vlgmr.msra.gmra.mrb[20].mxu1 %vm352_vm2, %v910_v41 }
 0x851   :  { %3682 = vmatprep.mubr.msk.bf16.mxu1 %vm4293_vm1, %v4292_v15 }
 0x914   :  { %v798_v46 = vpop.f32.mrb[16].mxu0 }
 0x915   :  { %v3654_v47 = vpop.f32.mrb[17].mxu0 }
 0x916   :  { %v801_v48 = vpop.f32.mrb[18].mxu0 }
 0x917   :  { %v3655_v49 = vpop.f32.mrb[19].mxu0 }
 0x918   :  { %v332_v49 = vld [vmem:[%s5119_s6 + $0x10] sm:$0xff] }
 0x919   :  { %v1131_v50 = vpack.c.bf16 %v332_v49, %v332_v49 }
 0x91b   :  { %v846_v52 = vpop.f32.mrb[16].mxu1 }
 0x91c   :  { %v3483_v53 = vpack.c.bf16 %v846_v52, %v798_v46  ;;  %v3660_v54 = vpop.f32.mrb[17].mxu1  ;;  %v1141_v52 = vsel %vm477_vm3, %v1131_v50, 0 }
 0x91d   :  { %v849_v55 = vpop.f32.mrb[18].mxu1 }
 0x91e   :  { %v3661_v57 = vpop.f32.mrb[19].mxu1  ;;  %3665 = vmatmul.mubr.msk.bf16.vlgmr.msra.gmra.mrb[20].mxu0 %vm352_vm2, %v3483_v53 }
 0x91f   :  { %3675 = vmatpush3.bf16.xpose.msra.mxu0 %v967_v56  ;;  %3676 = vmatprep.mubr.msk.bf16.mxu0 %vm4293_vm1, %v4292_v15 }
 0x920   :  { %3686 = vmatprep.subr.bf16.mxu0 %v4292_v15 }
 0x923   :  { %v953_v58 = vpop.f32.mrb[20].mxu1 }
 0x924   :  { %v954_v59 = vadd.f32 %v953_v58, %v4599_v62  ;;  %v3672_v61 = vpop.f32.mrb[21].mxu1 }
 0x925   :  { %v956_v1 = vpop.f32.mrb[22].mxu1 }
 0x926   :  { %v3673_v2 = vpop.f32.mrb[23].mxu1  ;;  %3677 = vmatmul.mubr.msk.bf16.vlgmr.msra.gmra.mrb[24].mxu0 %vm352_vm2, %v960_v0  ;;  %v1009_v3 = vsel %vm352_vm2, %v954_v59, -inf }
 0x927   :  { %1010 = vmax.xlane.f32.xlu0 %v1009_v3  ;;  %3688 = vmatprep.mubr.msk.bf16.mxu0 %vm4293_vm1, %v4292_v15 }
 0x9b4   :  { %v1011_v4 = vpop.xlane.xlu0 %1010 }
 0x9b5   :  { %v1015_v5 = vsub.f32 %v954_v59, %v1011_v4 }
 0x9b7   :  { %v1017_v6 = vmul.f32 1.442695, %v1015_v5 }
 0x9b9   :  { %3970 = vpow2.f32 %v1017_v6 }
 0x9c3   :  { %v3971_v7 = vpop.eup %3970 }
 0x9c4   :  { %v1021_v9 = vsel %vm352_vm2, %v3971_v7, 0.0 }
 0x9c5   :  { %1022 = vadd.xlane.f32.xlu0 %v1021_v9 }
 0x9f1   :  { %v900_v13 = vpop.f32.mrb[20].mxu0 }
 0x9f2   :  { %v4705_v16 = vadd.f32 %v900_v13, %v630_v12  ;;  %v3666_v17 = vpop.f32.mrb[21].mxu0 }
 0x9f3   :  { %v903_v18 = vpop.f32.mrb[22].mxu0 }
 0x9f4   :  { %v4707_v19 = vadd.f32 %v903_v18, %v631_v14  ;;  %v3667_v20 = vpop.f32.mrb[23].mxu0 }
 0x9f9   :  { %v1003_v21 = vpop.f32.mrb[24].mxu0 }
 0x9fa   :  { %v1004_v22 = vadd.f32 %v1003_v21, %v4602_v63  ;;  %v3678_v23 = vpop.f32.mrb[25].mxu0 }
 0x9fb   :  { %v1006_v24 = vpop.f32.mrb[26].mxu0 }
 0x9fc   :  { %v3679_v25 = vpop.f32.mrb[27].mxu0  ;;  %v1012_v26 = vsel %vm352_vm2, %v1004_v22, -inf }
 0x9fd   :  { %1013 = vmax.xlane.f32.xlu1 %v1012_v26 }
 0xa0e   :  { %1081 = vrot.lane.b32.xlu1 %v4574_v42, %s4302_s27 }
 0xa12   :  { %1188 = vrot.lane.b32.xlu1 %v4572_v39, %s4303_s19 }
 0xa16   :  { %1238 = vrot.lane.b32.xlu1 %v4574_v42, %s4303_s19 }
 0xa1a   :  { %1236 = vrot.lane.b32.xlu1 %v4574_v42, %s4304_s23 }
 0xa52   :  { %v1023_v34 = vpop.xlane.xlu0 %1022 }
 0xa8a   :  { %v1014_v8 = vpop.xlane.xlu1 %1013 }
 0xa8b   :  { %v1016_v10 = vsub.f32 %v1004_v22, %v1014_v8 }
 0xa8d   :  { %v1019_v27 = vmul.f32 1.442695, %v1016_v10 }
 0xa8e   :  { %v1082_v28 = vpop.permute.xlu1 %1081 }
 0xa8f   :  { %3972 = vpow2.f32 %v1019_v27  ;;  %v1087_v29 = vsel %vm477_vm3, %v1082_v28, 0 }
 0xa90   :  { %3687 = vmatpush3.bf16.msra.mxu0 %v1087_v29  ;;  %3974 = vrcp.f32 %v1023_v34 }
 0xa91   :  { %3698 = vmatprep.subr.bf16.mxu0 %v4292_v15 }
 0xa92   :  { %v1189_v45 = vpop.permute.xlu1 %1188 }
 0xa93   :  { %v1194_v47 = vsel %vm352_vm2, %v1189_v45, 0 }
 0xa96   :  { %v1239_v57 = vpop.permute.xlu1 %1238 }
 0xa97   :  { %v1244_v1 = vsel %vm352_vm2, %v1239_v57, 0 }
 0xa99   :  { %v3973_v30 = vpop.eup %3972 }
 0xa9a   :  { %v1024_v33 = vsel %vm352_vm2, %v3973_v30, 0.0  ;;  %v3975_v35 = vpop.eup %3974  ;;  %v1237_v6 = vpop.permute.xlu1 %1236 }
 0xa9b   :  { %1025 = vadd.xlane.f32.xlu0 %v1024_v33  ;;  %v1029_v37 = vmul.f32 %v3975_v35, %v3971_v7 }
 0xa9d   :  { %v1031_v41 = vpack.c.bf16 %v1029_v37, %v1029_v37 }
 0xab1   :  { %1033 = vrot.lane.b32.xlu0 %v4572_v39, %s4302_s27 }
 0xab5   :  { %1186 = vrot.lane.b32.xlu0 %v4572_v39, %s4304_s23 }
 0xb28   :  { %v1026_v36 = vpop.xlane.xlu0 %1025 }
 0xb29   :  { %3976 = vrcp.f32 %v1026_v36 }
 0xb2c   :  { %v1034_v38 = vpop.permute.xlu0 %1033 }
 0xb2d   :  { %v1039_v40 = vsel %vm477_vm3, %v1034_v38, 0 }
 0xb2e   :  { %3681 = vmatpush3.bf16.msra.mxu1 %v1039_v40 }
 0xb2f   :  { %3692 = vmatprep.subr.bf16.mxu1 %v4292_v15 }
 0xb30   :  { %v1187_v48 = vpop.permute.xlu0 %1186 }
 0xb31   :  { %3683 = vmatmul.mubr.msk.bf16.vlgmr.msra.gmra.mrb[24].mxu1 %vm352_vm2, %v1031_v41 }
 0xb32   :  { %3694 = vmatprep.mubr.msk.bf16.mxu1 %vm4293_vm1, %v4292_v15  ;;  %3693 = vmatpush3.bf16.msra.mxu1 %v1141_v52 }
 0xb33   :  { %v3977_v43 = vpop.eup %3976  ;;  %3704 = vmatprep.subr.bf16.mxu1 %v4292_v15 }
 0xb34   :  { %v1030_v44 = vmul.f32 %v3977_v43, %v3973_v30 }
 0xb36   :  { %v1032_v46 = vpack.c.bf16 %v1030_v44, %v1030_v44 }
 0xb38   :  { %3689 = vmatmul.mubr.msk.bf16.vlgmr.msra.gmra.mrb[28].mxu0 %vm352_vm2, %v1032_v46 }
 0xb39   :  { %3699 = vmatpush3.bf16.xpose.msra.mxu0 %v1194_v47  ;;  %3700 = vmatprep.mubr.msk.bf16.mxu0 %vm4293_vm1, %v4292_v15  ;;  %v333_v47 = vld [vmem:[%s5119_s6 + $0x18] sm:$0xff] }
 0xb3a   :  { %3710 = vmatprep.subr.bf16.mxu0 %v4292_v15 }
 0xb40   :  { %3701 = vmatmul.mubr.msk.bf16.vlgmr.msra.gmra.mrb[32].mxu0 %vm352_vm2, %v1187_v48  ;;  %v1408_v48 = vpack.c.bf16 %v333_v47, %v333_v47 }
 0xb41   :  { %3712 = vmatprep.mubr.msk.bf16.mxu0 %vm4293_vm1, %v4292_v15 }
 0xb42   :  { %v1418_v49 = vsel %vm477_vm3, %v1408_v48, 0 }
 0xc04   :  { %v1075_v53 = vpop.f32.mrb[24].mxu1 }
 0xc05   :  { %v3684_v54 = vpop.f32.mrb[25].mxu1 }
 0xc06   :  { %v1078_v55 = vpop.f32.mrb[26].mxu1 }
 0xc07   :  { %v3685_v56 = vpop.f32.mrb[27].mxu1 }
 0xc0b   :  { %v1123_v58 = vpop.f32.mrb[28].mxu0 }
 0xc0c   :  { %v3484_v59 = vpack.c.bf16 %v1123_v58, %v1075_v53  ;;  %v3690_v61 = vpop.f32.mrb[29].mxu0 }
 0xc0d   :  { %v1126_v0 = vpop.f32.mrb[30].mxu0 }
 0xc0e   :  { %v3691_v2 = vpop.f32.mrb[31].mxu0  ;;  %3695 = vmatmul.mubr.msk.bf16.vlgmr.msra.gmra.mrb[28].mxu1 %vm352_vm2, %v3484_v59 }
 0xc0f   :  { %3705 = vmatpush3.bf16.xpose.msra.mxu1 %v1244_v1  ;;  %3706 = vmatprep.mubr.msk.bf16.mxu1 %vm4293_vm1, %v4292_v15 }
 0xc10   :  { %3716 = vmatprep.subr.bf16.mxu1 %v4292_v15 }
 0xc13   :  { %v1230_v3 = vpop.f32.mrb[32].mxu0 }
 0xc14   :  { %v1231_v4 = vadd.f32 %v1230_v3, %v4599_v62  ;;  %v3702_v5 = vpop.f32.mrb[33].mxu0 }
 0xc15   :  { %v1233_v7 = vpop.f32.mrb[34].mxu0 }
 0xc16   :  { %v3703_v9 = vpop.f32.mrb[35].mxu0  ;;  %3707 = vmatmul.mubr.msk.bf16.vlgmr.msra.gmra.mrb[32].mxu1 %vm352_vm2, %v1237_v6  ;;  %v1286_v11 = vsel %vm352_vm2, %v1231_v4, -inf }
 0xc17   :  { %1287 = vmax.xlane.f32.xlu0 %v1286_v11  ;;  %3718 = vmatprep.mubr.msk.bf16.mxu1 %vm4293_vm1, %v4292_v15 }
 0xca4   :  { %v1288_v12 = vpop.xlane.xlu0 %1287 }
 0xca5   :  { %v1292_v13 = vsub.f32 %v1231_v4, %v1288_v12 }
 0xca7   :  { %v1294_v14 = vmul.f32 1.442695, %v1292_v13 }
 0xca9   :  { %3978 = vpow2.f32 %v1294_v14 }
 0xcb3   :  { %v3979_v17 = vpop.eup %3978 }
 0xcb4   :  { %v1298_v18 = vsel %vm352_vm2, %v3979_v17, 0.0 }
 0xcb5   :  { %1299 = vadd.xlane.f32.xlu0 %v1298_v18 }
 0xce1   :  { %v1177_v20 = vpop.f32.mrb[28].mxu1 }
 0xce2   :  { %v1184_v21 = vadd.f32 %v1177_v20, %v4705_v16  ;;  %v3696_v22 = vpop.f32.mrb[29].mxu1 }
 0xce3   :  { %v1180_v23 = vpop.f32.mrb[30].mxu1 }
 0xce4   :  { %v1185_v24 = vadd.f32 %v1180_v23, %v4707_v19  ;;  %v3697_v25 = vpop.f32.mrb[31].mxu1  ;;  %v3935_v23 = vld [vmem:[%s5123_s10 + $0x8] sm:$0xff]  }
 0xce9   :  { %v1280_v26 = vpop.f32.mrb[32].mxu1 }
 0xcea   :  { %v1281_v8 = vadd.f32 %v1280_v26, %v4602_v63  ;;  %v3708_v10 = vpop.f32.mrb[33].mxu1 }
 0xceb   :  { %v1283_v27 = vpop.f32.mrb[34].mxu1 }
 0xcec   :  { %v3709_v28 = vpop.f32.mrb[35].mxu1  ;;  %v1289_v29 = vsel %vm352_vm2, %v1281_v8, -inf }
 0xced   :  { %1290 = vmax.xlane.f32.xlu1 %v1289_v29  ;;  %v3393_v29 = vld [vmem:[#allocation11] ss:$0 sm:$0xff] }
 0xcfe   :  { %1358 = vrot.lane.b32.xlu1 %v4574_v42, %s4305_s13 }
 0xd42   :  { %v1300_v37 = vpop.xlane.xlu0 %1299 }
 0xd7a   :  { %v1291_v30 = vpop.xlane.xlu1 %1290 }
 0xd7b   :  { %v1293_v16 = vsub.f32 %v1281_v8, %v1291_v30 }
 0xd7d   :  { %v1296_v33 = vmul.f32 1.442695, %v1293_v16 }
 0xd7e   :  { %v1359_v34 = vpop.permute.xlu1 %1358 }
 0xd7f   :  { %3980 = vpow2.f32 %v1296_v33  ;;  %v1364_v19 = vsel %vm477_vm3, %v1359_v34, 0 }
 0xd80   :  { %3717 = vmatpush3.bf16.msra.mxu1 %v1364_v19  ;;  %3982 = vrcp.f32 %v1300_v37  ;;  %v3394_v19 = vld [vmem:[#allocation13] ss:$0 sm:$0xff] }
 0xd81   :  { %3728 = vmatprep.subr.bf16.mxu1 %v4292_v15 }
 0xd89   :  { %v3981_v35 = vpop.eup %3980 }
 0xd8a   :  { %v1301_v36 = vsel %vm352_vm2, %v3981_v35, 0.0  ;;  %v3983_v42 = vpop.eup %3982 }
 0xd8b   :  { %1302 = vadd.xlane.f32.xlu0 %v1301_v36  ;;  %v1306_v40 = vmul.f32 %v3983_v42, %v3979_v17 }
 0xd8d   :  { %v1308_v44 = vpack.c.bf16 %v1306_v40, %v1306_v40  ;;  %v3937_v40 = vld [vmem:[%s5125_s12 + $0x8] sm:$0xff]  }
 0xda1   :  { %1310 = vrot.lane.b32.xlu0 %v4572_v39, %s4305_s13 }
 0xe18   :  { %v1303_v38 = vpop.xlane.xlu0 %1302 }
 0xe19   :  { %3984 = vrcp.f32 %v1303_v38  ;;  %v3936_v38 = vld [vmem:[%s5125_s12] sm:$0xff]  }
 0xe1c   :  { %v1311_v41 = vpop.permute.xlu0 %1310 }
 0xe1d   :  { %v1316_v43 = vsel %vm477_vm3, %v1311_v41, 0  ;;  %v3938_v41 = vld [vmem:[%s5125_s12 + $0x10] sm:$0xff]  }
 0xe1e   :  { %3711 = vmatpush3.bf16.msra.mxu0 %v1316_v43  ;;  %v3939_v43 = vld [vmem:[%s5125_s12 + $0x18] sm:$0xff]  }
 0xe1f   :  { %3722 = vmatprep.subr.bf16.mxu0 %v4292_v15 }
 0xe21   :  { %3713 = vmatmul.mubr.msk.bf16.vlgmr.msra.gmra.mrb[36].mxu0 %vm352_vm2, %v1308_v44  ;;  %v3395_v44 = vld [vmem:[#allocation14] ss:$0 sm:$0xff] }
 0xe22   :  { %3724 = vmatprep.mubr.msk.bf16.mxu0 %vm4293_vm1, %v4292_v15  ;;  %3723 = vmatpush3.bf16.msra.mxu0 %v1418_v49 }
 0xe23   :  { %v3985_v45 = vpop.eup %3984  ;;  %3736 = vmatprep.subr.bf16.mxu0 %v4292_v15 }
 0xe24   :  { %v1307_v39 = vmul.f32 %v3985_v45, %v3981_v35 }
 0xe26   :  { %v1309_v46 = vpack.c.bf16 %v1307_v39, %v1307_v39 }
 0xe28   :  { %3719 = vmatmul.mubr.msk.bf16.vlgmr.msra.gmra.mrb[36].mxu1 %vm352_vm2, %v1309_v46 }
 0xe29   :  { %3732 = vmatprep.mubr.msk.bf16.mxu1 %vm4293_vm1, %v4292_v15 }
 0xef4   :  { %v1352_v50 = vpop.f32.mrb[36].mxu0 }
 0xef5   :  { %v3714_v52 = vpop.f32.mrb[37].mxu0 }
 0xef6   :  { %v1355_v53 = vpop.f32.mrb[38].mxu0 }
 0xef7   :  { %v3715_v54 = vpop.f32.mrb[39].mxu0 }
 0xefb   :  { %v1400_v55 = vpop.f32.mrb[36].mxu1 }
 0xefc   :  { %v3485_v56 = vpack.c.bf16 %v1400_v55, %v1352_v50  ;;  %v3720_v57 = vpop.f32.mrb[37].mxu1 }
 0xefd   :  { %v1403_v58 = vpop.f32.mrb[38].mxu1 }
 0xefe   :  { %v3721_v59 = vpop.f32.mrb[39].mxu1  ;;  %3725 = vmatmul.mubr.msk.bf16.vlgmr.msra.gmra.mrb[40].mxu0 %vm352_vm2, %v3485_v56 }
 0xeff   :  { %3744 = vmatprep.mubr.msk.bf16.mxu0 %vm4293_vm1, %v4292_v15  ;;  %3737 = vmatpush3.bf16.msra.mxu0 %v3936_v38 }
 0xf00   :  { %3738 = vmatprep.subr.bf16.mxu0 %v4292_v15 }
 0xf03   :  { %3739 = vmatpush3.bf16.msra.mxu0 %v3937_v40  ;;  %v3407_v40 = vld [vmem:[%s5127_s14] ss:$0 sm:$0xff] }
 0xf04   :  { %3740 = vmatprep.subr.bf16.mxu0 %v4292_v15 }
 0xf07   :  { %3741 = vmatpush3.bf16.msra.mxu0 %v3938_v41 }
 0xf08   :  { %3742 = vmatprep.subr.bf16.mxu0 %v4292_v15 }
 0xf0b   :  { %3743 = vmatpush3.bf16.msra.mxu0 %v3939_v43 }
 0xf0c   :  { %3762 = vmatprep.subr.bf16.mxu0 %v4292_v15 }
 0xfd1   :  { %v1454_v61 = vpop.f32.mrb[40].mxu0 }
 0xfd2   :  { %v1461_v0 = vadd.f32 %v1454_v61, %v1184_v21  ;;  %v3726_v1 = vpop.f32.mrb[41].mxu0 }
 0xfd3   :  { %v1457_v2 = vpop.f32.mrb[42].mxu0 }
 0xfd4   :  { %v1462_v3 = vadd.f32 %v1457_v2, %v1185_v24  ;;  %v3727_v4 = vpop.f32.mrb[43].mxu0  ;;  %v1463_v5 = vadd.f32 %v1461_v0, %v4563_v31 }
 0xfd6   :  { %v1467_v6 = vsel %vm212_vm0, %v1463_v5, 0.0  ;;  %v1464_v7 = vadd.f32 %v1462_v3, %v4565_v32  ;;  %v3934_v32 = vld [vmem:[%s5123_s10] sm:$0xff]  }
 0xfd7   :  { %1468 = vadd.xlane.f32.xlu1 %v1467_v6  ;;  %3729 = vmatpush3.bf16.msra.mxu1 %v3934_v32 }
 0xfd8   :  { %v1470_v9 = vsel %vm212_vm0, %v1464_v7, 0.0  ;;  %3730 = vmatprep.subr.bf16.mxu1 %v4292_v15 }
 0xfd9   :  { %1471 = vadd.xlane.f32.xlu0 %v1470_v9 }
 0xfdb   :  { %3731 = vmatpush3.bf16.msra.mxu1 %v3935_v23 }
 0xfdc   :  { %3748 = vmatprep.subr.bf16.mxu1 %v4292_v15 }
0x1064   :  { %v1469_v11 = vpop.xlane.xlu1 %1468 }
0x1065   :  { %v1473_v12 = vmul.f32 0.03125, %v1469_v11  ;;  %v3400_v11 = vld [vmem:[#allocation16] ss:$0 sm:$0xff] }
0x1066   :  { %v1472_v13 = vpop.xlane.xlu0 %1471 }
0x1067   :  { %v1475_v14 = vsub.f32 %v1463_v5, %v1473_v12  ;;  %v1474_v17 = vmul.f32 0.03125, %v1472_v13 }
0x1069   :  { %v1476_v18 = vsub.f32 %v1464_v7, %v1474_v17  ;;  %v1477_v20 = vmul.f32 %v1475_v14, %v1475_v14 }
0x106b   :  { %v1479_v21 = vsel %vm212_vm0, %v1477_v20, 0.0  ;;  %v1478_v22 = vmul.f32 %v1476_v18, %v1476_v18 }
0x106c   :  { %1480 = vadd.xlane.f32.xlu0 %v1479_v21 }
0x106d   :  { %v1482_v31 = vsel %vm212_vm0, %v1478_v22, 0.0 }
0x106e   :  { %1483 = vadd.xlane.f32.xlu1 %v1482_v31 }
0x10f9   :  { %v1481_v24 = vpop.xlane.xlu0 %1480 }
0x10fa   :  { %v1485_v25 = vmul.f32 0.03125, %v1481_v24 }
0x10fb   :  { %v1484_v26 = vpop.xlane.xlu1 %1483 }
0x10fc   :  { %v1487_v8 = vadd.f32 1e-07, %v1485_v25  ;;  %v1486_v10 = vmul.f32 0.03125, %v1484_v26 }
0x10fe   :  { %3986 = vrsqrt.f32 %v1487_v8  ;;  %v1488_v27 = vadd.f32 1e-07, %v1486_v10 }
0x1100   :  { %3988 = vrsqrt.f32 %v1488_v27 }
0x1108   :  { %v3987_v28 = vpop.eup %3986 }
0x1109   :  { %v1491_v30 = vmul.f32 %v3987_v28, %v1475_v14 }
0x110a   :  { %v3989_v16 = vpop.eup %3988 }
0x110b   :  { %v1499_v33 = vmul.f32 %v3393_v29, %v1491_v30  ;;  %v1492_v34 = vmul.f32 %v3989_v16, %v1476_v18  ;;  %v3940_v16 = vld [vmem:[%s5117_s4 + $0x10] sm:$0xff]  }
0x110d   :  { %v1500_v35 = vmul.f32 %v3393_v29, %v1492_v34  ;;  %v1507_v36 = vadd.f32 %v3394_v19, %v1499_v33  ;;  %v3941_v33 = vld [vmem:[%s5117_s4 + $0x18] sm:$0xff]  }
0x110f   :  { %v1508_v37 = vadd.f32 %v3394_v19, %v1500_v35 }
0x1111   :  { %v3486_v42 = vpack.c.bf16 %v1508_v37, %v1507_v36 }
0x1113   :  { %3733 = vmatmul.mubr.msk.bf16.vlgmr.msra.gmra.mrb[40].mxu1 %vm212_vm0, %v3486_v42 }
0x1114   :  { %3752 = vmatprep.mubr.msk.bf16.mxu1 %vm4293_vm1, %v4292_v15  ;;  %3749 = vmatpush3.bf16.msra.mxu1 %v3940_v16 }
0x1115   :  { %3750 = vmatprep.subr.bf16.mxu1 %v4292_v15 }
0x1118   :  { %3751 = vmatpush3.bf16.msra.mxu1 %v3941_v33  ;;  %v3418_v33 = vld [vmem:[%s5119_s6 + $0x20] sm:$0xff] }
0x1119   :  { %3756 = vmatprep.subr.bf16.mxu1 %v4292_v15 }
0x11e6   :  { %v1576_v45 = vpop.f32.mrb[40].mxu1 }
0x11e7   :  { %v1577_v39 = vadd.f32 %v3395_v44, %v1576_v45  ;;  %v3734_v46 = vpop.f32.mrb[41].mxu1 }
0x11e8   :  { %v1579_v47 = vpop.f32.mrb[42].mxu1 }
0x11e9   :  { %v1583_v48 = vmul.f32 %v1577_v39, %v1577_v39  ;;  %v1580_v49 = vadd.f32 %v3395_v44, %v1579_v47  ;;  %v3735_v50 = vpop.f32.mrb[43].mxu1 }
0x11ea   :  { %v3413_v50 = vld [vmem:[#allocation8 + $0x1] ss:$0 sm:$0xff] }
0x11eb   :  { %v1585_v52 = vmul.f32 %v1583_v48, %v1577_v39  ;;  %v1584_v53 = vmul.f32 %v1580_v49, %v1580_v49 }
0x11ed   :  { %v1587_v54 = vmul.f32 0.044715, %v1585_v52  ;;  %v1586_v55 = vmul.f32 %v1584_v53, %v1580_v49 }
0x11ef   :  { %v1589_v56 = vadd.f32 %v1587_v54, %v1577_v39  ;;  %v1588_v57 = vmul.f32 0.044715, %v1586_v55 }
0x11f1   :  { %v1591_v58 = vmul.f32 0.7978846, %v1589_v56  ;;  %v1590_v59 = vadd.f32 %v1588_v57, %v1580_v49 }
0x11f3   :  { %3990 = vtanh.f32 %v1591_v58  ;;  %v1592_v61 = vmul.f32 0.7978846, %v1590_v59 }
0x11f5   :  { %3992 = vtanh.f32 %v1592_v61 }
0x11fd   :  { %v3991_v0 = vpop.eup %3990 }
0x11fe   :  { %v1595_v1 = vadd.f32 1.0, %v3991_v0 }
0x11ff   :  { %v3993_v2 = vpop.eup %3992 }
0x1200   :  { %v1597_v3 = vmul.f32 0.5, %v1595_v1  ;;  %v1596_v4 = vadd.f32 1.0, %v3993_v2 }
0x1202   :  { %v1598_v5 = vmul.f32 0.5, %v1596_v4  ;;  %v1599_v6 = vmul.f32 %v1597_v3, %v1577_v39  ;;  %v3408_v39 = vld [vmem:[%s5128_s15] ss:$0 sm:$0xff] }
0x1204   :  { %v1600_v7 = vmul.f32 %v1598_v5, %v1580_v49 }
0x1206   :  { %v3487_v9 = vpack.c.bf16 %v1600_v7, %v1599_v6 }
0x1208   :  { %3745 = vmatmul.mubr.msk.bf16.vlgmr.msra.gmra.mrb[44].mxu0 %vm1647_vm4, %v3487_v9 }
0x1209   :  { %3764 = vmatprep.mubr.msk.bf16.mxu0 %vm4293_vm1, %v4292_v15 }
0x12db   :  { %v1685_v12 = vpop.f32.mrb[44].mxu0 }
0x12dc   :  { %v1686_v13 = vadd.f32 %v3400_v11, %v1685_v12  ;;  %v3746_v14 = vpop.f32.mrb[45].mxu0 }
0x12dd   :  { %v1688_v17 = vpop.f32.mrb[46].mxu0 }
0x12de   :  { %v1689_v18 = vadd.f32 %v3400_v11, %v1688_v17  ;;  %v3747_v20 = vpop.f32.mrb[47].mxu0  ;;  %v1692_v21 = vadd.f32 %v1686_v13, %v1507_v36 }
0x12e0   :  { %v1696_v22 = vsel %vm212_vm0, %v1692_v21, 0.0  ;;  %v1693_v31 = vadd.f32 %v1689_v18, %v1508_v37 }
0x12e1   :  { %1697 = vadd.xlane.f32.xlu0 %v1696_v22 }
0x12e2   :  { %v1699_v32 = vsel %vm212_vm0, %v1693_v31, 0.0 }
0x12e3   :  { %1700 = vadd.xlane.f32.xlu1 %v1699_v32 }
0x136e   :  { %v1698_v23 = vpop.xlane.xlu0 %1697 }
0x136f   :  { %v1702_v24 = vmul.f32 0.03125, %v1698_v23 }
0x1370   :  { %v1701_v25 = vpop.xlane.xlu1 %1700 }
0x1371   :  { %v1704_v26 = vsub.f32 %v1692_v21, %v1702_v24  ;;  %v1703_v8 = vmul.f32 0.03125, %v1701_v25 }
0x1373   :  { %v1705_v10 = vsub.f32 %v1693_v31, %v1703_v8  ;;  %v1706_v27 = vmul.f32 %v1704_v26, %v1704_v26 }
0x1375   :  { %v1708_v28 = vsel %vm212_vm0, %v1706_v27, 0.0  ;;  %v1707_v29 = vmul.f32 %v1705_v10, %v1705_v10 }
0x1376   :  { %1709 = vadd.xlane.f32.xlu0 %v1708_v28 }
0x1377   :  { %v1711_v30 = vsel %vm212_vm0, %v1707_v29, 0.0 }
0x1378   :  { %1712 = vadd.xlane.f32.xlu1 %v1711_v30 }
0x1403   :  { %v1710_v34 = vpop.xlane.xlu0 %1709 }
0x1404   :  { %v1714_v19 = vmul.f32 0.03125, %v1710_v34  ;;  %v2043_v34 = vpack.c.bf16 %v3418_v33, %v3418_v33 }
0x1405   :  { %v1713_v35 = vpop.xlane.xlu1 %1712 }
0x1406   :  { %v1716_v36 = vadd.f32 1e-07, %v1714_v19  ;;  %v1715_v37 = vmul.f32 0.03125, %v1713_v35 }
0x1408   :  { %3994 = vrsqrt.f32 %v1716_v36  ;;  %v1717_v42 = vadd.f32 1e-07, %v1715_v37 }
0x140a   :  { %3996 = vrsqrt.f32 %v1717_v42 }
0x1412   :  { %v3995_v38 = vpop.eup %3994 }
0x1413   :  { %v1720_v41 = vmul.f32 %v3995_v38, %v1704_v26  ;;  %v2053_v38 = vsel %vm477_vm3, %v2043_v34, 0 }
0x1414   :  { %v3997_v43 = vpop.eup %3996 }
0x1415   :  { %v1728_v44 = vmul.f32 %v3407_v40, %v1720_v41  ;;  %v1721_v45 = vmul.f32 %v3997_v43, %v1705_v10 }
0x1417   :  { %v1729_v46 = vmul.f32 %v3407_v40, %v1721_v45  ;;  %v4836_v47 = vadd.f32 %v3408_v39, %v1728_v44 }
0x1419   :  { %v4838_v48 = vadd.f32 %v3408_v39, %v1729_v46 }
0x141b   :  { %v3488_v49 = vpack.c.bf16 %v4838_v48, %v4836_v47 }
0x141d   :  { %3753 = vmatmul.mubr.msk.bf16.vlgmr.msra.gmra.mrb[44].mxu1 %vm212_vm0, %v3488_v49 }
0x141e   :  { %3758 = vmatprep.mubr.msk.bf16.mxu1 %vm4293_vm1, %v4292_v15 }
0x14f0   :  { %v1807_v52 = vpop.f32.mrb[44].mxu1 }
0x14f1   :  { %v1808_v53 = vadd.f32 %v3413_v50, %v1807_v52  ;;  %v3754_v54 = vpop.f32.mrb[45].mxu1 }
0x14f2   :  { %v1810_v55 = vpop.f32.mrb[46].mxu1 }
0x14f3   :  { %v4845_v56 = vpack.c.bf16 %v1808_v53, %v1808_v53  ;;  %v1811_v57 = vadd.f32 %v3413_v50, %v1810_v55  ;;  %v3755_v58 = vpop.f32.mrb[47].mxu1 }
0x14f5   :  { %v4847_v59 = vpack.c.bf16 %v1811_v57, %v1811_v57  ;;  %1824 = vrot.lane.b32.xlu0 %v4845_v56, %s4294_s20 }
0x14f7   :  { %1873 = vrot.lane.b32.xlu1 %v4847_v59, %s4294_s20  ;;  %s4306_s20 = smov [#allocation17]  }
0x1567   :  { %v1825_v61 = vpop.permute.xlu0 %1824 }
0x1568   :  { %v1830_v0 = vsel %vm352_vm2, %v1825_v61, 0 }
0x1569   :  { %3757 = vmatpush3.bf16.xpose.msra.mxu1 %v1830_v0  ;;  %v1874_v1 = vpop.permute.xlu1 %1873 }
0x156a   :  { %v1879_v2 = vsel %vm352_vm2, %v1874_v1, 0  ;;  %3768 = vmatprep.subr.bf16.mxu1 %v4292_v15 }
0x156b   :  { %3763 = vmatpush3.bf16.xpose.msra.mxu0 %v1879_v2 }
0x156c   :  { %3774 = vmatprep.subr.bf16.mxu0 %v4292_v15 }
0x1570   :  { %3759 = vmatmul.mubr.msk.bf16.vlgmr.msra.gmra.mrb[48].mxu1 %vm352_vm2, %v4845_v56 }
0x1571   :  { %3770 = vmatprep.mubr.msk.bf16.mxu1 %vm4293_vm1, %v4292_v15 }
0x1572   :  { %3765 = vmatmul.mubr.msk.bf16.vlgmr.msra.gmra.mrb[48].mxu0 %vm352_vm2, %v4847_v59 }
0x1573   :  { %3776 = vmatprep.mubr.msk.bf16.mxu0 %vm4293_vm1, %v4292_v15 }
0x1643   :  { %v1866_v3 = vpop.f32.mrb[48].mxu1 }
0x1644   :  { %v1867_v4 = vadd.f32 %v1866_v3, %v4599_v62  ;;  %v3760_v5 = vpop.f32.mrb[49].mxu1 }
0x1645   :  { %v1869_v6 = vpop.f32.mrb[50].mxu1  ;;  %v1915_v7 = vpop.f32.mrb[48].mxu0 }
0x1646   :  { %v1916_v9 = vadd.f32 %v1915_v7, %v4602_v63  ;;  %v3761_v11 = vpop.f32.mrb[51].mxu1  ;;  %v3766_v12 = vpop.f32.mrb[49].mxu0  ;;  %v1921_v13 = vsel %vm352_vm2, %v1867_v4, -inf }
0x1647   :  { %1922 = vmax.xlane.f32.xlu1 %v1921_v13  ;;  %v1918_v14 = vpop.f32.mrb[50].mxu0 }
0x1648   :  { %v3767_v17 = vpop.f32.mrb[51].mxu0  ;;  %v1924_v18 = vsel %vm352_vm2, %v1916_v9, -inf }
0x1649   :  { %1925 = vmax.xlane.f32.xlu0 %v1924_v18 }
0x16d4   :  { %v1923_v20 = vpop.xlane.xlu1 %1922 }
0x16d5   :  { %v1927_v21 = vsub.f32 %v1867_v4, %v1923_v20 }
0x16d6   :  { %v1926_v22 = vpop.xlane.xlu0 %1925 }
0x16d7   :  { %v1929_v31 = vmul.f32 1.442695, %v1927_v21  ;;  %v1928_v32 = vsub.f32 %v1916_v9, %v1926_v22 }
0x16d9   :  { %3998 = vpow2.f32 %v1929_v31  ;;  %v1931_v23 = vmul.f32 1.442695, %v1928_v32 }
0x16db   :  { %4000 = vpow2.f32 %v1931_v23 }
0x16e3   :  { %v3999_v24 = vpop.eup %3998 }
0x16e4   :  { %v1933_v25 = vsel %vm352_vm2, %v3999_v24, 0.0 }
0x16e5   :  { %v4001_v26 = vpop.eup %4000  ;;  %1934 = vadd.xlane.f32.xlu0 %v1933_v25 }
0x16e6   :  { %v1936_v8 = vsel %vm352_vm2, %v4001_v26, 0.0 }
0x16e7   :  { %1937 = vadd.xlane.f32.xlu1 %v1936_v8 }
0x16f8   :  { %1993 = vrot.lane.b32.xlu1 %v4847_v59, %s4296_s8 }
0x16fb   :  { %1945 = vrot.lane.b32.xlu0 %v4845_v56, %s4296_s8  ;;  %s3348_s8 = sshll.u32 %s4306_s20, 4  ;;  %s3349_s8 = int_to_ptr.vmem [resolvable:$true] %s3348_s8 }
0x16fc   :  { %2106 = vrot.lane.b32.xlu1 %v4845_v56, %s4297_s22  ;;  %p4250_p3 = scmp.lt.s32.totalorder %s3349_s8, %s3349_s8 }
0x16ff   :  { %2104 = vrot.lane.b32.xlu0 %v4845_v56, %s4298_s7 }
0x1700   :  { %2156 = vrot.lane.b32.xlu1 %v4847_v59, %s4297_s22  ;;  %s4245_s22 = scalar_lea.vmem %s3349_s8, 32 }
0x1701   :  { %p4246_p2 = scmp.ne.s32.totalorder %s3349_s8, %s4245_s22  ;;  %p4251_p4 = scmp.lt.s32.totalorder %s4245_s22, %s4245_s22 }
0x1703   :  { %p4252_p5 = por %p4251_p4, %p4250_p3 }
0x1704   :  { %2154 = vrot.lane.b32.xlu1 %v4847_v59, %s4298_s7 }
0x1705   :  { %p4253_p6 = pnand %p4252_p5, %p4246_p2 }
0x1772   :  { %v1935_v10 = vpop.xlane.xlu0 %1934 }
0x1773   :  { %4002 = vrcp.f32 %v1935_v10 }
0x1774   :  { %v1938_v27 = vpop.xlane.xlu1 %1937 }
0x1775   :  { %4004 = vrcp.f32 %v1938_v27 }
0x1776   :  { %v1946_v28 = vpop.permute.xlu0 %1945 }
0x1777   :  { %v1951_v29 = vsel %vm477_vm3, %v1946_v28, 0 }
0x1778   :  { %v1994_v30 = vpop.permute.xlu1 %1993  ;;  %3769 = vmatpush3.bf16.msra.mxu1 %v1951_v29 }
0x1779   :  { %v1999_v16 = vsel %vm477_vm3, %v1994_v30, 0  ;;  %3780 = vmatprep.subr.bf16.mxu1 %v4292_v15 }
0x177a   :  { %3775 = vmatpush3.bf16.msra.mxu0 %v1999_v16  ;;  %v2105_v44 = vpop.permute.xlu0 %2104 }
0x177b   :  { %3786 = vmatprep.subr.bf16.mxu0 %v4292_v15 }
0x177c   :  { %v2107_v40 = vpop.permute.xlu1 %2106 }
0x177d   :  { %v4003_v19 = vpop.eup %4002  ;;  %v2112_v43 = vsel %vm352_vm2, %v2107_v40, 0 }
0x177e   :  { %v1941_v35 = vmul.f32 %v4003_v19, %v3999_v24 }
0x177f   :  { %v4005_v36 = vpop.eup %4004 }
0x1780   :  { %v1942_v37 = vmul.f32 %v4005_v36, %v4001_v26  ;;  %v1943_v42 = vpack.c.bf16 %v1941_v35, %v1941_v35  ;;  %v2157_v39 = vpop.permute.xlu1 %2156 }
0x1781   :  { %v2162_v57 = vsel %vm352_vm2, %v2157_v39, 0 }
0x1782   :  { %3771 = vmatmul.mubr.msk.bf16.vlgmr.msra.gmra.mrb[52].mxu1 %vm352_vm2, %v1943_v42  ;;  %v1944_v41 = vpack.c.bf16 %v1942_v37, %v1942_v37 }
0x1783   :  { %3781 = vmatpush3.bf16.msra.mxu1 %v2053_v38  ;;  %3782 = vmatprep.mubr.msk.bf16.mxu1 %vm4293_vm1, %v4292_v15 }
0x1784   :  { %3777 = vmatmul.mubr.msk.bf16.vlgmr.msra.gmra.mrb[52].mxu0 %vm352_vm2, %v1944_v41  ;;  %3792 = vmatprep.subr.bf16.mxu1 %v4292_v15  ;;  %v2155_v2 = vpop.permute.xlu1 %2154 }
0x1785   :  { %3787 = vmatpush3.bf16.xpose.msra.mxu0 %v2112_v43  ;;  %3788 = vmatprep.mubr.msk.bf16.mxu0 %vm4293_vm1, %v4292_v15  ;;  %v3419_v43 = vld [vmem:[%s5119_s6 + $0x28] sm:$0xff] }
0x1786   :  { %3798 = vmatprep.subr.bf16.mxu0 %v4292_v15 }
0x178c   :  { %3789 = vmatmul.mubr.msk.bf16.vlgmr.msra.gmra.mrb[56].mxu0 %vm352_vm2, %v2105_v44  ;;  %v2326_v44 = vpack.c.bf16 %v3419_v43, %v3419_v43 }
0x178d   :  { %3800 = vmatprep.mubr.msk.bf16.mxu0 %vm4293_vm1, %v4292_v15 }
0x1855   :  { %v1987_v45 = vpop.f32.mrb[52].mxu1 }
0x1856   :  { %v3772_v46 = vpop.f32.mrb[53].mxu1 }
0x1857   :  { %v1990_v49 = vpop.f32.mrb[54].mxu1  ;;  %v2035_v50 = vpop.f32.mrb[52].mxu0 }
0x1858   :  { %v3489_v52 = vpack.c.bf16 %v2035_v50, %v1987_v45  ;;  %v3773_v53 = vpop.f32.mrb[55].mxu1  ;;  %v3778_v54 = vpop.f32.mrb[53].mxu0  ;;  %v2336_v45 = vsel %vm477_vm3, %v2326_v44, 0 }
0x1859   :  { %v2038_v55 = vpop.f32.mrb[54].mxu0 }
0x185a   :  { %v3779_v58 = vpop.f32.mrb[55].mxu0  ;;  %3783 = vmatmul.mubr.msk.bf16.vlgmr.msra.gmra.mrb[56].mxu1 %vm352_vm2, %v3489_v52 }
0x185b   :  { %3793 = vmatpush3.bf16.xpose.msra.mxu1 %v2162_v57  ;;  %3794 = vmatprep.mubr.msk.bf16.mxu1 %vm4293_vm1, %v4292_v15 }
0x185c   :  { %3804 = vmatprep.subr.bf16.mxu1 %v4292_v15 }
0x185f   :  { %v2148_v61 = vpop.f32.mrb[56].mxu0 }
0x1860   :  { %v2149_v0 = vadd.f32 %v2148_v61, %v4599_v62  ;;  %v3790_v1 = vpop.f32.mrb[57].mxu0 }
0x1861   :  { %v2151_v3 = vpop.f32.mrb[58].mxu0 }
0x1862   :  { %v3791_v4 = vpop.f32.mrb[59].mxu0  ;;  %3795 = vmatmul.mubr.msk.bf16.vlgmr.msra.gmra.mrb[60].mxu1 %vm352_vm2, %v2155_v2  ;;  %v2204_v5 = vsel %vm352_vm2, %v2149_v0, -inf }
0x1863   :  { %2205 = vmax.xlane.f32.xlu0 %v2204_v5  ;;  %3806 = vmatprep.mubr.msk.bf16.mxu1 %vm4293_vm1, %v4292_v15 }
0x18f0   :  { %v2206_v6 = vpop.xlane.xlu0 %2205 }
0x18f1   :  { %v2210_v7 = vsub.f32 %v2149_v0, %v2206_v6 }
0x18f3   :  { %v2212_v9 = vmul.f32 1.442695, %v2210_v7 }
0x18f5   :  { %4006 = vpow2.f32 %v2212_v9 }
0x18ff   :  { %v4007_v11 = vpop.eup %4006 }
0x1900   :  { %v2216_v12 = vsel %vm352_vm2, %v4007_v11, 0.0 }
0x1901   :  { %2217 = vadd.xlane.f32.xlu0 %v2216_v12 }
0x192d   :  { %v4914_v13 = vpop.f32.mrb[56].mxu1 }
0x192e   :  { %v3784_v14 = vpop.f32.mrb[57].mxu1 }
0x192f   :  { %v4916_v17 = vpop.f32.mrb[58].mxu1 }
0x1930   :  { %v3785_v18 = vpop.f32.mrb[59].mxu1 }
0x1931   :  { %v3428_v18 = vld [vmem:[#allocation10 + $0x1] ss:$0 sm:$0xff] }
0x1935   :  { %v2198_v20 = vpop.f32.mrb[60].mxu1 }
0x1936   :  { %v2199_v21 = vadd.f32 %v2198_v20, %v4602_v63  ;;  %v3796_v22 = vpop.f32.mrb[61].mxu1  ;;  %v2102_v20 = vadd.f32 %v3428_v18, %v4914_v13 }
0x1937   :  { %v2201_v31 = vpop.f32.mrb[62].mxu1  ;;  %v2103_v22 = vadd.f32 %v3428_v18, %v4916_v17 }
0x1938   :  { %v3797_v32 = vpop.f32.mrb[63].mxu1  ;;  %v2207_v23 = vsel %vm352_vm2, %v2199_v21, -inf }
0x1939   :  { %2208 = vmax.xlane.f32.xlu1 %v2207_v23 }
0x194a   :  { %2276 = vrot.lane.b32.xlu1 %v4847_v59, %s4299_s24 }
0x194e   :  { %2383 = vrot.lane.b32.xlu1 %v4845_v56, %s4300_s25 }
0x1952   :  { %2433 = vrot.lane.b32.xlu1 %v4847_v59, %s4300_s25 }
0x1956   :  { %2431 = vrot.lane.b32.xlu1 %v4847_v59, %s4301_s18 }
0x198e   :  { %v2218_v29 = vpop.xlane.xlu0 %2217 }
0x19c6   :  { %v2209_v24 = vpop.xlane.xlu1 %2208 }
0x19c7   :  { %v2211_v25 = vsub.f32 %v2199_v21, %v2209_v24 }
0x19c9   :  { %v2214_v26 = vmul.f32 1.442695, %v2211_v25 }
0x19ca   :  { %v2277_v8 = vpop.permute.xlu1 %2276 }
0x19cb   :  { %4008 = vpow2.f32 %v2214_v26  ;;  %v2282_v10 = vsel %vm477_vm3, %v2277_v8, 0 }
0x19cc   :  { %3805 = vmatpush3.bf16.msra.mxu1 %v2282_v10  ;;  %4010 = vrcp.f32 %v2218_v29 }
0x19cd   :  { %3816 = vmatprep.subr.bf16.mxu1 %v4292_v15 }
0x19ce   :  { %v2384_v42 = vpop.permute.xlu1 %2383 }
0x19cf   :  { %v2389_v40 = vsel %vm352_vm2, %v2384_v42, 0 }
0x19d2   :  { %v2434_v52 = vpop.permute.xlu1 %2433 }
0x19d3   :  { %v2439_v58 = vsel %vm352_vm2, %v2434_v52, 0 }
0x19d5   :  { %v4009_v27 = vpop.eup %4008 }
0x19d6   :  { %v2219_v28 = vsel %vm352_vm2, %v4009_v27, 0.0  ;;  %v4011_v30 = vpop.eup %4010  ;;  %v2432_v3 = vpop.permute.xlu1 %2431 }
0x19d7   :  { %2220 = vadd.xlane.f32.xlu0 %v2219_v28  ;;  %v2224_v33 = vmul.f32 %v4011_v30, %v4007_v11 }
0x19d9   :  { %v2226_v35 = vpack.c.bf16 %v2224_v33, %v2224_v33 }
0x19ed   :  { %2228 = vrot.lane.b32.xlu0 %v4845_v56, %s4299_s24 }
0x19f1   :  { %2381 = vrot.lane.b32.xlu0 %v4845_v56, %s4301_s18 }
0x1a64   :  { %v2221_v16 = vpop.xlane.xlu0 %2220 }
0x1a65   :  { %4012 = vrcp.f32 %v2221_v16 }
0x1a68   :  { %v2229_v34 = vpop.permute.xlu0 %2228 }
0x1a69   :  { %v2234_v19 = vsel %vm477_vm3, %v2229_v34, 0 }
0x1a6a   :  { %3799 = vmatpush3.bf16.msra.mxu0 %v2234_v19 }
0x1a6b   :  { %3810 = vmatprep.subr.bf16.mxu0 %v4292_v15 }
0x1a6c   :  { %v2382_v41 = vpop.permute.xlu0 %2381 }
0x1a6d   :  { %3801 = vmatmul.mubr.msk.bf16.vlgmr.msra.gmra.mrb[60].mxu0 %vm352_vm2, %v2226_v35 }
0x1a6e   :  { %3812 = vmatprep.mubr.msk.bf16.mxu0 %vm4293_vm1, %v4292_v15  ;;  %3811 = vmatpush3.bf16.msra.mxu0 %v2336_v45 }
0x1a6f   :  { %v4013_v36 = vpop.eup %4012  ;;  %3822 = vmatprep.subr.bf16.mxu0 %v4292_v15 }
0x1a70   :  { %v2225_v37 = vmul.f32 %v4013_v36, %v4009_v27 }
0x1a72   :  { %v2227_v38 = vpack.c.bf16 %v2225_v37, %v2225_v37 }
0x1a74   :  { %3807 = vmatmul.mubr.msk.bf16.vlgmr.msra.gmra.mrb[64].mxu1 %vm352_vm2, %v2227_v38 }
0x1a75   :  { %3817 = vmatpush3.bf16.xpose.msra.mxu1 %v2389_v40  ;;  %3818 = vmatprep.mubr.msk.bf16.mxu1 %vm4293_vm1, %v4292_v15 }
0x1a76   :  { %3828 = vmatprep.subr.bf16.mxu1 %v4292_v15 }
0x1a7c   :  { %3819 = vmatmul.mubr.msk.bf16.vlgmr.msra.gmra.mrb[68].mxu1 %vm352_vm2, %v2382_v41 }
0x1a7d   :  { %3830 = vmatprep.mubr.msk.bf16.mxu1 %vm4293_vm1, %v4292_v15 }
0x1b40   :  { %v2270_v39 = vpop.f32.mrb[60].mxu0 }
0x1b41   :  { %v3802_v46 = vpop.f32.mrb[61].mxu0 }
0x1b42   :  { %v2273_v49 = vpop.f32.mrb[62].mxu0 }
0x1b43   :  { %v3803_v50 = vpop.f32.mrb[63].mxu0 }
0x1b44   :  { %v3420_v50 = vld [vmem:[%s5119_s6 + $0x30] sm:$0xff] }
0x1b45   :  { %v2603_v52 = vpack.c.bf16 %v3420_v50, %v3420_v50 }
0x1b47   :  { %v2318_v53 = vpop.f32.mrb[64].mxu1 }
0x1b48   :  { %v3490_v54 = vpack.c.bf16 %v2318_v53, %v2270_v39  ;;  %v3808_v55 = vpop.f32.mrb[65].mxu1  ;;  %v2613_v53 = vsel %vm477_vm3, %v2603_v52, 0 }
0x1b49   :  { %v2321_v57 = vpop.f32.mrb[66].mxu1 }
0x1b4a   :  { %v3809_v61 = vpop.f32.mrb[67].mxu1  ;;  %3813 = vmatmul.mubr.msk.bf16.vlgmr.msra.gmra.mrb[64].mxu0 %vm352_vm2, %v3490_v54 }
0x1b4b   :  { %3823 = vmatpush3.bf16.xpose.msra.mxu0 %v2439_v58  ;;  %3824 = vmatprep.mubr.msk.bf16.mxu0 %vm4293_vm1, %v4292_v15 }
0x1b4c   :  { %3834 = vmatprep.subr.bf16.mxu0 %v4292_v15 }
0x1b4f   :  { %v2425_v0 = vpop.f32.mrb[68].mxu1 }
0x1b50   :  { %v2426_v1 = vadd.f32 %v2425_v0, %v4599_v62  ;;  %v3820_v2 = vpop.f32.mrb[69].mxu1 }
0x1b51   :  { %v2428_v4 = vpop.f32.mrb[70].mxu1 }
0x1b52   :  { %v3821_v5 = vpop.f32.mrb[71].mxu1  ;;  %3825 = vmatmul.mubr.msk.bf16.vlgmr.msra.gmra.mrb[68].mxu0 %vm352_vm2, %v2432_v3  ;;  %v2481_v6 = vsel %vm352_vm2, %v2426_v1, -inf }
0x1b53   :  { %2482 = vmax.xlane.f32.xlu0 %v2481_v6  ;;  %3836 = vmatprep.mubr.msk.bf16.mxu0 %vm4293_vm1, %v4292_v15 }
0x1be0   :  { %v2483_v7 = vpop.xlane.xlu0 %2482 }
0x1be1   :  { %v2487_v9 = vsub.f32 %v2426_v1, %v2483_v7 }
0x1be3   :  { %v2489_v11 = vmul.f32 1.442695, %v2487_v9 }
0x1be5   :  { %4014 = vpow2.f32 %v2489_v11 }
0x1bef   :  { %v4015_v12 = vpop.eup %4014 }
0x1bf0   :  { %v2493_v14 = vsel %vm352_vm2, %v4015_v12, 0.0 }
0x1bf1   :  { %2494 = vadd.xlane.f32.xlu0 %v2493_v14 }
0x1c1d   :  { %v2372_v21 = vpop.f32.mrb[64].mxu0 }
0x1c1e   :  { %v4966_v31 = vadd.f32 %v2372_v21, %v2102_v20  ;;  %v3814_v32 = vpop.f32.mrb[65].mxu0 }
0x1c1f   :  { %v2375_v23 = vpop.f32.mrb[66].mxu0 }
0x1c20   :  { %v4968_v24 = vadd.f32 %v2375_v23, %v2103_v22  ;;  %v3815_v25 = vpop.f32.mrb[67].mxu0 }
0x1c25   :  { %v2475_v26 = vpop.f32.mrb[68].mxu0 }
0x1c26   :  { %v2476_v8 = vadd.f32 %v2475_v26, %v4602_v63  ;;  %v3826_v10 = vpop.f32.mrb[69].mxu0 }
0x1c27   :  { %v2478_v27 = vpop.f32.mrb[70].mxu0 }
0x1c28   :  { %v3827_v28 = vpop.f32.mrb[71].mxu0  ;;  %v2484_v29 = vsel %vm352_vm2, %v2476_v8, -inf }
0x1c29   :  { %2485 = vmax.xlane.f32.xlu1 %v2484_v29 }
0x1c3a   :  { %2553 = vrot.lane.b32.xlu1 %v4847_v59, %s4302_s27 }
0x1c3e   :  { %2660 = vrot.lane.b32.xlu1 %v4845_v56, %s4303_s19 }
0x1c42   :  { %2710 = vrot.lane.b32.xlu1 %v4847_v59, %s4303_s19 }
0x1c46   :  { %2708 = vrot.lane.b32.xlu1 %v4847_v59, %s4304_s23 }
0x1c7e   :  { %v2495_v35 = vpop.xlane.xlu0 %2494 }
0x1cb6   :  { %v2486_v13 = vpop.xlane.xlu1 %2485 }
0x1cb7   :  { %v2488_v17 = vsub.f32 %v2476_v8, %v2486_v13 }
0x1cb9   :  { %v2491_v30 = vmul.f32 1.442695, %v2488_v17 }
0x1cba   :  { %v2554_v16 = vpop.permute.xlu1 %2553 }
0x1cbb   :  { %4016 = vpow2.f32 %v2491_v30  ;;  %v2559_v33 = vsel %vm477_vm3, %v2554_v16, 0 }
0x1cbc   :  { %3835 = vmatpush3.bf16.msra.mxu0 %v2559_v33  ;;  %4018 = vrcp.f32 %v2495_v35 }
0x1cbd   :  { %3846 = vmatprep.subr.bf16.mxu0 %v4292_v15 }
0x1cbe   :  { %v2661_v45 = vpop.permute.xlu1 %2660 }
0x1cbf   :  { %v2666_v46 = vsel %vm352_vm2, %v2661_v45, 0  ;;  %v3421_v45 = vld [vmem:[%s5119_s6 + $0x38] sm:$0xff] }
0x1cc2   :  { %v2711_v61 = vpop.permute.xlu1 %2710 }
0x1cc3   :  { %v2716_v4 = vsel %vm352_vm2, %v2711_v61, 0 }
0x1cc5   :  { %v4017_v34 = vpop.eup %4016 }
0x1cc6   :  { %v2496_v19 = vsel %vm352_vm2, %v4017_v34, 0.0  ;;  %v4019_v36 = vpop.eup %4018  ;;  %v2709_v11 = vpop.permute.xlu1 %2708 }
0x1cc7   :  { %2497 = vadd.xlane.f32.xlu0 %v2496_v19  ;;  %v2501_v42 = vmul.f32 %v4019_v36, %v4015_v12 }
0x1cc9   :  { %v2503_v41 = vpack.c.bf16 %v2501_v42, %v2501_v42 }
0x1cdd   :  { %2505 = vrot.lane.b32.xlu0 %v4845_v56, %s4302_s27 }
0x1ce1   :  { %2658 = vrot.lane.b32.xlu0 %v4845_v56, %s4304_s23 }
0x1d54   :  { %v2498_v37 = vpop.xlane.xlu0 %2497 }
0x1d55   :  { %4020 = vrcp.f32 %v2498_v37 }
0x1d58   :  { %v2506_v38 = vpop.permute.xlu0 %2505 }
0x1d59   :  { %v2511_v40 = vsel %vm477_vm3, %v2506_v38, 0 }
0x1d5a   :  { %3829 = vmatpush3.bf16.msra.mxu1 %v2511_v40 }
0x1d5b   :  { %3840 = vmatprep.subr.bf16.mxu1 %v4292_v15 }
0x1d5c   :  { %v2659_v49 = vpop.permute.xlu0 %2658 }
0x1d5d   :  { %3831 = vmatmul.mubr.msk.bf16.vlgmr.msra.gmra.mrb[72].mxu1 %vm352_vm2, %v2503_v41 }
0x1d5e   :  { %3842 = vmatprep.mubr.msk.bf16.mxu1 %vm4293_vm1, %v4292_v15  ;;  %3841 = vmatpush3.bf16.msra.mxu1 %v2613_v53 }
0x1d5f   :  { %v4021_v43 = vpop.eup %4020  ;;  %3852 = vmatprep.subr.bf16.mxu1 %v4292_v15 }
0x1d60   :  { %v2502_v44 = vmul.f32 %v4021_v43, %v4017_v34 }
0x1d62   :  { %v2504_v39 = vpack.c.bf16 %v2502_v44, %v2502_v44 }
0x1d64   :  { %3837 = vmatmul.mubr.msk.bf16.vlgmr.msra.gmra.mrb[72].mxu0 %vm352_vm2, %v2504_v39  ;;  %v2880_v39 = vpack.c.bf16 %v3421_v45, %v3421_v45 }
0x1d65   :  { %3847 = vmatpush3.bf16.xpose.msra.mxu0 %v2666_v46  ;;  %3848 = vmatprep.mubr.msk.bf16.mxu0 %vm4293_vm1, %v4292_v15 }
0x1d66   :  { %3858 = vmatprep.subr.bf16.mxu0 %v4292_v15  ;;  %v2890_v46 = vsel %vm477_vm3, %v2880_v39, 0 }
0x1d6c   :  { %3849 = vmatmul.mubr.msk.bf16.vlgmr.msra.gmra.mrb[76].mxu0 %vm352_vm2, %v2659_v49 }
0x1d6d   :  { %3860 = vmatprep.mubr.msk.bf16.mxu0 %vm4293_vm1, %v4292_v15 }
0x1e30   :  { %v2547_v54 = vpop.f32.mrb[72].mxu1 }
0x1e31   :  { %v3832_v55 = vpop.f32.mrb[73].mxu1 }
0x1e32   :  { %v2550_v57 = vpop.f32.mrb[74].mxu1 }
0x1e33   :  { %v3833_v58 = vpop.f32.mrb[75].mxu1 }
0x1e37   :  { %v2595_v0 = vpop.f32.mrb[72].mxu0 }
0x1e38   :  { %v3491_v1 = vpack.c.bf16 %v2595_v0, %v2547_v54  ;;  %v3838_v2 = vpop.f32.mrb[73].mxu0 }
0x1e39   :  { %v2598_v3 = vpop.f32.mrb[74].mxu0 }
0x1e3a   :  { %v3839_v5 = vpop.f32.mrb[75].mxu0  ;;  %3843 = vmatmul.mubr.msk.bf16.vlgmr.msra.gmra.mrb[76].mxu1 %vm352_vm2, %v3491_v1 }
0x1e3b   :  { %3853 = vmatpush3.bf16.xpose.msra.mxu1 %v2716_v4  ;;  %3854 = vmatprep.mubr.msk.bf16.mxu1 %vm4293_vm1, %v4292_v15 }
0x1e3c   :  { %3864 = vmatprep.subr.bf16.mxu1 %v4292_v15 }
0x1e3f   :  { %v2702_v6 = vpop.f32.mrb[76].mxu0 }
0x1e40   :  { %v2703_v7 = vadd.f32 %v2702_v6, %v4599_v62  ;;  %v3850_v9 = vpop.f32.mrb[77].mxu0 }
0x1e41   :  { %v2705_v12 = vpop.f32.mrb[78].mxu0 }
0x1e42   :  { %v3851_v14 = vpop.f32.mrb[79].mxu0  ;;  %3855 = vmatmul.mubr.msk.bf16.vlgmr.msra.gmra.mrb[80].mxu1 %vm352_vm2, %v2709_v11  ;;  %v2758_v18 = vsel %vm352_vm2, %v2703_v7, -inf }
0x1e43   :  { %2759 = vmax.xlane.f32.xlu0 %v2758_v18  ;;  %3866 = vmatprep.mubr.msk.bf16.mxu1 %vm4293_vm1, %v4292_v15 }
0x1ed0   :  { %v2760_v20 = vpop.xlane.xlu0 %2759 }
0x1ed1   :  { %v2764_v21 = vsub.f32 %v2703_v7, %v2760_v20 }
0x1ed3   :  { %v2766_v22 = vmul.f32 1.442695, %v2764_v21 }
0x1ed5   :  { %4022 = vpow2.f32 %v2766_v22 }
0x1edf   :  { %v4023_v32 = vpop.eup %4022 }
0x1ee0   :  { %v2770_v23 = vsel %vm352_vm2, %v4023_v32, 0.0 }
0x1ee1   :  { %2771 = vadd.xlane.f32.xlu0 %v2770_v23 }
0x1f0d   :  { %v2649_v62 = vpop.f32.mrb[76].mxu1 }
0x1f0e   :  { %v2656_v25 = vadd.f32 %v2649_v62, %v4966_v31  ;;  %v3844_v26 = vpop.f32.mrb[77].mxu1 }
0x1f0f   :  { %v2652_v8 = vpop.f32.mrb[78].mxu1 }
0x1f10   :  { %v2657_v10 = vadd.f32 %v2652_v8, %v4968_v24  ;;  %v3845_v27 = vpop.f32.mrb[79].mxu1 }
0x1f15   :  { %v2752_v28 = vpop.f32.mrb[80].mxu1 }
0x1f16   :  { %v2753_v29 = vadd.f32 %v2752_v28, %v4602_v63  ;;  %v3856_v13 = vpop.f32.mrb[81].mxu1 }
0x1f17   :  { %v2755_v17 = vpop.f32.mrb[82].mxu1 }
0x1f18   :  { %v3857_v30 = vpop.f32.mrb[83].mxu1  ;;  %v2761_v16 = vsel %vm352_vm2, %v2753_v29, -inf  ;;  %v3447_v17 = vld [vmem:[#allocation11 + $0x1] ss:$0 sm:$0xff] }
0x1f19   :  { %2762 = vmax.xlane.f32.xlu1 %v2761_v16 }
0x1f2a   :  { %2830 = vrot.lane.b32.xlu1 %v4847_v59, %s4305_s13 }
0x1f6e   :  { %v2772_v36 = vpop.xlane.xlu0 %2771 }
0x1fa6   :  { %v2763_v33 = vpop.xlane.xlu1 %2762 }
0x1fa7   :  { %v2765_v34 = vsub.f32 %v2753_v29, %v2763_v33 }
0x1fa9   :  { %v2768_v31 = vmul.f32 1.442695, %v2765_v34 }
0x1faa   :  { %v2831_v19 = vpop.permute.xlu1 %2830 }
0x1fab   :  { %4024 = vpow2.f32 %v2768_v31  ;;  %v2836_v24 = vsel %vm477_vm3, %v2831_v19, 0  ;;  %v3448_v31 = vld [vmem:[#allocation13 + $0x1] ss:$0 sm:$0xff] }
0x1fac   :  { %3865 = vmatpush3.bf16.msra.mxu1 %v2836_v24  ;;  %4026 = vrcp.f32 %v2772_v36  ;;  %v3944_v36 = vld [vmem:[%s5125_s12 + $0x20] sm:$0xff]  }
0x1fad   :  { %3876 = vmatprep.subr.bf16.mxu1 %v4292_v15 }
0x1fb5   :  { %v4025_v63 = vpop.eup %4024 }
0x1fb6   :  { %v2773_v35 = vsel %vm352_vm2, %v4025_v63, 0.0  ;;  %v4027_v59 = vpop.eup %4026 }
0x1fb7   :  { %2774 = vadd.xlane.f32.xlu0 %v2773_v35  ;;  %v2778_v42 = vmul.f32 %v4027_v59, %v4023_v32  ;;  %v3945_v59 = vld [vmem:[%s5125_s12 + $0x28] sm:$0xff]  }
0x1fb9   :  { %v2780_v41 = vpack.c.bf16 %v2778_v42, %v2778_v42  ;;  %v3947_v42 = vld [vmem:[%s5125_s12 + $0x38] sm:$0xff]  }
0x1fcd   :  { %2782 = vrot.lane.b32.xlu0 %v4845_v56, %s4305_s13 }
0x2044   :  { %v2775_v37 = vpop.xlane.xlu0 %2774 }
0x2045   :  { %4028 = vrcp.f32 %v2775_v37  ;;  %v3946_v37 = vld [vmem:[%s5125_s12 + $0x30] sm:$0xff]  }
0x2048   :  { %v2783_v38 = vpop.permute.xlu0 %2782 }
0x2049   :  { %v2788_v40 = vsel %vm477_vm3, %v2783_v38, 0  ;;  %v3453_v38 = vld [vmem:[#allocation14 + $0x1] ss:$0 sm:$0xff] }
0x204a   :  { %3859 = vmatpush3.bf16.msra.mxu0 %v2788_v40 }
0x204b   :  { %3870 = vmatprep.subr.bf16.mxu0 %v4292_v15 }
0x204d   :  { %3861 = vmatmul.mubr.msk.bf16.vlgmr.msra.gmra.mrb[80].mxu0 %vm352_vm2, %v2780_v41 }
0x204e   :  { %3872 = vmatprep.mubr.msk.bf16.mxu0 %vm4293_vm1, %v4292_v15  ;;  %3871 = vmatpush3.bf16.msra.mxu0 %v2890_v46 }
0x204f   :  { %v4029_v43 = vpop.eup %4028  ;;  %3884 = vmatprep.subr.bf16.mxu0 %v4292_v15 }
0x2050   :  { %v2779_v56 = vmul.f32 %v4029_v43, %v4025_v63 }
0x2052   :  { %v2781_v44 = vpack.c.bf16 %v2779_v56, %v2779_v56 }
0x2054   :  { %3867 = vmatmul.mubr.msk.bf16.vlgmr.msra.gmra.mrb[84].mxu1 %vm352_vm2, %v2781_v44 }
0x2055   :  { %3880 = vmatprep.mubr.msk.bf16.mxu1 %vm4293_vm1, %v4292_v15 }
0x2120   :  { %v2824_v49 = vpop.f32.mrb[80].mxu0 }
0x2121   :  { %v3862_v50 = vpop.f32.mrb[81].mxu0 }
0x2122   :  { %v2827_v52 = vpop.f32.mrb[82].mxu0 }
0x2123   :  { %v3863_v53 = vpop.f32.mrb[83].mxu0 }
0x2127   :  { %v2872_v54 = vpop.f32.mrb[84].mxu1 }
0x2128   :  { %v3492_v55 = vpack.c.bf16 %v2872_v54, %v2824_v49  ;;  %v3868_v57 = vpop.f32.mrb[85].mxu1 }
0x2129   :  { %v2875_v58 = vpop.f32.mrb[86].mxu1 }
0x212a   :  { %v3869_v61 = vpop.f32.mrb[87].mxu1  ;;  %3873 = vmatmul.mubr.msk.bf16.vlgmr.msra.gmra.mrb[84].mxu0 %vm352_vm2, %v3492_v55 }
0x212b   :  { %3892 = vmatprep.mubr.msk.bf16.mxu0 %vm4293_vm1, %v4292_v15  ;;  %3885 = vmatpush3.bf16.msra.mxu0 %v3944_v36 }
0x212c   :  { %3886 = vmatprep.subr.bf16.mxu0 %v4292_v15 }
0x212f   :  { %3887 = vmatpush3.bf16.msra.mxu0 %v3945_v59 }
0x2130   :  { %3888 = vmatprep.subr.bf16.mxu0 %v4292_v15 }
0x2133   :  { %3889 = vmatpush3.bf16.msra.mxu0 %v3946_v37 }
0x2134   :  { %3890 = vmatprep.subr.bf16.mxu0 %v4292_v15 }
0x2137   :  { %3891 = vmatpush3.bf16.msra.mxu0 %v3947_v42 }
0x21fd   :  { %v2926_v0 = vpop.f32.mrb[84].mxu0 }
0x21fe   :  { %v2933_v1 = vadd.f32 %v2926_v0, %v2656_v25  ;;  %v3874_v2 = vpop.f32.mrb[85].mxu0  ;;  %v3943_v25 = vld [vmem:[%s5123_s10 + $0x18] sm:$0xff]  }
0x21ff   :  { %v2929_v3 = vpop.f32.mrb[86].mxu0 }
0x2200   :  { %v2934_v4 = vadd.f32 %v2929_v3, %v2657_v10  ;;  %v3875_v5 = vpop.f32.mrb[87].mxu0  ;;  %v2935_v6 = vadd.f32 %v2933_v1, %v4836_v47 }
0x2202   :  { %v2941_v7 = vsel %vm212_vm0, %v2935_v6, 0.0  ;;  %v2936_v9 = vadd.f32 %v2934_v4, %v4838_v48  ;;  %v3942_v48 = vld [vmem:[%s5123_s10 + $0x10] sm:$0xff]  }
0x2203   :  { %2942 = vadd.xlane.f32.xlu1 %v2941_v7  ;;  %3877 = vmatpush3.bf16.msra.mxu1 %v3942_v48 }
0x2204   :  { %v2944_v11 = vsel %vm212_vm0, %v2936_v9, 0.0  ;;  %3878 = vmatprep.subr.bf16.mxu1 %v4292_v15 }
0x2205   :  { %2945 = vadd.xlane.f32.xlu0 %v2944_v11 }
0x2207   :  { %3879 = vmatpush3.bf16.msra.mxu1 %v3943_v25 }
0x2208   :  { %3896 = vmatprep.subr.bf16.mxu1 %v4292_v15 }
0x2290   :  { %v2943_v12 = vpop.xlane.xlu1 %2942 }
0x2291   :  { %v2947_v14 = vmul.f32 0.03125, %v2943_v12 }
0x2292   :  { %v2946_v18 = vpop.xlane.xlu0 %2945 }
0x2293   :  { %v2949_v20 = vsub.f32 %v2935_v6, %v2947_v14  ;;  %v2948_v21 = vmul.f32 0.03125, %v2946_v18 }
0x2295   :  { %v2950_v22 = vsub.f32 %v2936_v9, %v2948_v21  ;;  %v2951_v32 = vmul.f32 %v2949_v20, %v2949_v20  ;;  %v3466_v9 = vld [vmem:[#allocation16 + $0x1] ss:$0 sm:$0xff] }
0x2297   :  { %v2953_v23 = vsel %vm212_vm0, %v2951_v32, 0.0  ;;  %v2952_v62 = vmul.f32 %v2950_v22, %v2950_v22 }
0x2298   :  { %2954 = vadd.xlane.f32.xlu0 %v2953_v23 }
0x2299   :  { %v2956_v47 = vsel %vm212_vm0, %v2952_v62, 0.0 }
0x229a   :  { %2957 = vadd.xlane.f32.xlu1 %v2956_v47 }
0x2325   :  { %v2955_v26 = vpop.xlane.xlu0 %2954 }
0x2326   :  { %v2959_v8 = vmul.f32 0.03125, %v2955_v26 }
0x2327   :  { %v2958_v10 = vpop.xlane.xlu1 %2957 }
0x2328   :  { %v2961_v27 = vadd.f32 1e-07, %v2959_v8  ;;  %v2960_v28 = vmul.f32 0.03125, %v2958_v10 }
0x232a   :  { %4030 = vrsqrt.f32 %v2961_v27  ;;  %v2962_v29 = vadd.f32 1e-07, %v2960_v28 }
0x232c   :  { %4032 = vrsqrt.f32 %v2962_v29 }
0x2334   :  { %v4031_v13 = vpop.eup %4030 }
0x2335   :  { %v2965_v30 = vmul.f32 %v4031_v13, %v2949_v20 }
0x2336   :  { %v4033_v16 = vpop.eup %4032 }
0x2337   :  { %v2973_v33 = vmul.f32 %v3447_v17, %v2965_v30  ;;  %v2966_v34 = vmul.f32 %v4033_v16, %v2950_v22  ;;  %v4046_v30 = vld [vmem:[#allocation5] sm:$0x3] }
0x2339   :  { %v2974_v19 = vmul.f32 %v3447_v17, %v2966_v34  ;;  %v2981_v24 = vadd.f32 %v3448_v31, %v2973_v33  ;;  %v3226_v17 = vsub.s32 1, %v4592_v51  ;;  %v3220_v33 = vrot.slane %v4046_v30, %v4596_v60  ;;  %v3948_v34 = vld [vmem:[%s5129_s16] sm:$0xff]  }
0x233b   :  { %v2982_v63 = vadd.f32 %v3448_v31, %v2974_v19  ;;  %v3227_v16 = vrot.slane %v4046_v30, %v3226_v17  ;;  %v3949_v31 = vld [vmem:[%s5129_s16 + $0x8] sm:$0xff]   ;;  %v3477_v17 = vld [vmem:[%s5130_s17] ss:$0 sm:$0xff] }
0x233d   :  { %v3493_v35 = vpack.c.bf16 %v2982_v63, %v2981_v24 }
0x233f   :  { %3881 = vmatmul.mubr.msk.bf16.vlgmr.msra.gmra.mrb[88].mxu1 %vm212_vm0, %v3493_v35 }
0x2340   :  { %3900 = vmatprep.mubr.msk.bf16.mxu1 %vm4293_vm1, %v4292_v15  ;;  %3897 = vmatpush3.bf16.msra.mxu1 %v3948_v34 }
0x2341   :  { %3898 = vmatprep.subr.bf16.mxu1 %v4292_v15 }
0x2344   :  { %3899 = vmatpush3.bf16.msra.mxu1 %v3949_v31 }
0x2412   :  { %v3052_v40 = vpop.f32.mrb[88].mxu1 }
0x2413   :  { %v3053_v41 = vadd.f32 %v3453_v38, %v3052_v40  ;;  %v3882_v43 = vpop.f32.mrb[89].mxu1 }
0x2414   :  { %v3055_v56 = vpop.f32.mrb[90].mxu1 }
0x2415   :  { %v3059_v44 = vmul.f32 %v3053_v41, %v3053_v41  ;;  %v3056_v45 = vadd.f32 %v3453_v38, %v3055_v56  ;;  %v3883_v39 = vpop.f32.mrb[91].mxu1 }
0x2416   :  { %v3475_v39 = vld [vmem:[%s5127_s14 + $0x1] ss:$0 sm:$0xff] }
0x2417   :  { %v3061_v46 = vmul.f32 %v3059_v44, %v3053_v41  ;;  %v3060_v49 = vmul.f32 %v3056_v45, %v3056_v45 }
0x2419   :  { %v3063_v50 = vmul.f32 0.044715, %v3061_v46  ;;  %v3062_v52 = vmul.f32 %v3060_v49, %v3056_v45 }
0x241b   :  { %v3065_v53 = vadd.f32 %v3063_v50, %v3053_v41  ;;  %v3064_v54 = vmul.f32 0.044715, %v3062_v52  ;;  %v3476_v52 = vld [vmem:[%s5128_s15 + $0x1] ss:$0 sm:$0xff] }
0x241d   :  { %v3067_v55 = vmul.f32 0.7978846, %v3065_v53  ;;  %v3066_v57 = vadd.f32 %v3064_v54, %v3056_v45 }
0x241f   :  { %4034 = vtanh.f32 %v3067_v55  ;;  %v3068_v58 = vmul.f32 0.7978846, %v3066_v57 }
0x2421   :  { %4036 = vtanh.f32 %v3068_v58 }
0x2429   :  { %v4035_v61 = vpop.eup %4034 }
0x242a   :  { %v3071_v0 = vadd.f32 1.0, %v4035_v61 }
0x242b   :  { %v4037_v1 = vpop.eup %4036 }
0x242c   :  { %v3073_v2 = vmul.f32 0.5, %v3071_v0  ;;  %v3072_v3 = vadd.f32 1.0, %v4037_v1 }
0x242e   :  { %v3074_v4 = vmul.f32 0.5, %v3072_v3  ;;  %v3075_v5 = vmul.f32 %v3073_v2, %v3053_v41 }
0x2430   :  { %v3076_v6 = vmul.f32 %v3074_v4, %v3056_v45 }
0x2432   :  { %v3494_v7 = vpack.c.bf16 %v3076_v6, %v3075_v5 }
0x2434   :  { %3893 = vmatmul.mubr.msk.bf16.vlgmr.msra.gmra.mrb[88].mxu0 %vm1647_vm4, %v3494_v7 }
0x2507   :  { %v3162_v11 = vpop.f32.mrb[88].mxu0 }
0x2508   :  { %v3163_v12 = vadd.f32 %v3466_v9, %v3162_v11  ;;  %v3894_v14 = vpop.f32.mrb[89].mxu0 }
0x2509   :  { %v3165_v18 = vpop.f32.mrb[90].mxu0 }
0x250a   :  { %v3166_v20 = vadd.f32 %v3466_v9, %v3165_v18  ;;  %v3895_v21 = vpop.f32.mrb[91].mxu0  ;;  %v3169_v22 = vadd.f32 %v3163_v12, %v2981_v24 }
0x250c   :  { %v3175_v32 = vsel %vm212_vm0, %v3169_v22, 0.0  ;;  %v3170_v23 = vadd.f32 %v3166_v20, %v2982_v63 }
0x250d   :  { %3176 = vadd.xlane.f32.xlu0 %v3175_v32 }
0x250e   :  { %v3178_v62 = vsel %vm212_vm0, %v3170_v23, 0.0 }
0x250f   :  { %3179 = vadd.xlane.f32.xlu1 %v3178_v62 }
0x259a   :  { %v3177_v47 = vpop.xlane.xlu0 %3176 }
0x259b   :  { %v3181_v48 = vmul.f32 0.03125, %v3177_v47 }
0x259c   :  { %v3180_v25 = vpop.xlane.xlu1 %3179 }
0x259d   :  { %v3183_v26 = vsub.f32 %v3169_v22, %v3181_v48  ;;  %v3182_v8 = vmul.f32 0.03125, %v3180_v25 }
0x259f   :  { %v3184_v10 = vsub.f32 %v3170_v23, %v3182_v8  ;;  %v3185_v27 = vmul.f32 %v3183_v26, %v3183_v26 }
0x25a1   :  { %v3187_v28 = vsel %vm212_vm0, %v3185_v27, 0.0  ;;  %v3186_v29 = vmul.f32 %v3184_v10, %v3184_v10 }
0x25a2   :  { %3188 = vadd.xlane.f32.xlu0 %v3187_v28 }
0x25a3   :  { %v3190_v13 = vsel %vm212_vm0, %v3186_v29, 0.0 }
0x25a4   :  { %3191 = vadd.xlane.f32.xlu1 %v3190_v13 }
0x25b5   :  { %3229 = vbcast.lane.b32.xlu1 %v3227_v16, 256 }
0x25b8   :  { %3222 = vbcast.lane.b32.xlu0 %v3220_v33, 256 }
0x262f   :  { %v3189_v19 = vpop.xlane.xlu0 %3188 }
0x2630   :  { %v3193_v51 = vmul.f32 0.03125, %v3189_v19 }
0x2631   :  { %v3192_v24 = vpop.xlane.xlu1 %3191 }
0x2632   :  { %v3195_v63 = vadd.f32 1e-07, %v3193_v51  ;;  %v3194_v35 = vmul.f32 0.03125, %v3192_v24 }
0x2633   :  { %v3223_v60 = vpop.permute.xlu0 %3222 }
0x2634   :  { %4038 = vrsqrt.f32 %v3195_v63  ;;  %v3196_v36 = vadd.f32 1e-07, %v3194_v35  ;;  %v3247_v59 = vrot.slane %v3223_v60, 4 }
0x2635   :  { %v3230_v37 = vpop.permute.xlu1 %3229 }
0x2636   :  { %4040 = vrsqrt.f32 %v3196_v36  ;;  %v3248_v42 = vadd.f32 %v3247_v59, %v3223_v60  ;;  %v3253_v38 = vrot.slane %v3230_v37, 4 }
0x2638   :  { %v3249_v40 = vrot.slane %v3248_v42, 2  ;;  %v3254_v15 = vadd.f32 %v3253_v38, %v3230_v37 }
0x263a   :  { %v3250_v41 = vadd.f32 %v3249_v40, %v3248_v42  ;;  %v3255_v43 = vrot.slane %v3254_v15, 2 }
0x263c   :  { %v3256_v56 = vadd.f32 %v3255_v43, %v3254_v15  ;;  %v3251_v44 = vrot.slane %v3250_v41, 1 }
0x263e   :  { %v4039_v45 = vpop.eup %4038  ;;  %v3257_v49 = vrot.slane %v3256_v56, 1  ;;  %v3252_v54 = vadd.f32 %v3251_v44, %v3250_v41 }
0x263f   :  { %v3199_v46 = vmul.f32 %v4039_v45, %v3183_v26 }
0x2640   :  { %v4041_v50 = vpop.eup %4040  ;;  %v3258_v61 = vadd.f32 %v3257_v49, %v3256_v56  ;;  %v3259_v1 = vmax.f32 %v3252_v54, 1e-09 }
0x2641   :  { %v3207_v53 = vmul.f32 %v3475_v39, %v3199_v46  ;;  %v3200_v55 = vmul.f32 %v4041_v50, %v3184_v10 }
0x2642   :  { %v3260_v5 = vmax.f32 %v3258_v61, 1e-09  ;;  %4042 = vrcp.f32 %v3259_v1 }
0x2643   :  { %v3215_v57 = vadd.f32 %v3476_v52, %v3207_v53  ;;  %v3208_v58 = vmul.f32 %v3475_v39, %v3200_v55 }
0x2644   :  { %4044 = vrcp.f32 %v3260_v5 }
0x2645   :  { %v3231_v0 = vmul.f32 %v3223_v60, %v3215_v57  ;;  %v3216_v2 = vadd.f32 %v3476_v52, %v3208_v58 }
0x2647   :  { %v3233_v3 = vsel %vm212_vm0, %v3231_v0, 0.0  ;;  %v3232_v4 = vmul.f32 %v3230_v37, %v3216_v2 }
0x2648   :  { %v3234_v6 = vrot.slane %v3233_v3, 4 }
0x2649   :  { %v3240_v7 = vsel %vm212_vm0, %v3232_v4, 0.0 }
0x264a   :  { %v3235_v9 = vadd.f32 %v3234_v6, %v3233_v3  ;;  %v3241_v11 = vrot.slane %v3240_v7, 4 }
0x264c   :  { %v3236_v12 = vrot.slane %v3235_v9, 2  ;;  %v3242_v14 = vadd.f32 %v3241_v11, %v3240_v7  ;;  %v4043_v62 = vpop.eup %4042 }
0x264e   :  { %v3237_v18 = vadd.f32 %v3236_v12, %v3235_v9  ;;  %v3243_v20 = vrot.slane %v3242_v14, 2  ;;  %v4045_v25 = vpop.eup %4044 }
0x2650   :  { %v3238_v21 = vrot.slane %v3237_v18, 1  ;;  %v3244_v22 = vadd.f32 %v3243_v20, %v3242_v14 }
0x2652   :  { %v3239_v32 = vadd.f32 %v3238_v21, %v3237_v18  ;;  %v3245_v23 = vrot.slane %v3244_v22, 1 }
0x2654   :  { %v3263_v47 = vmul.f32 %v4043_v62, %v3239_v32  ;;  %v3246_v48 = vadd.f32 %v3245_v23, %v3244_v22 }
0x2656   :  { %v3265_v26 = vpack.c.bf16 %v3263_v47, %v3263_v47  ;;  %v3264_v8 = vmul.f32 %v4045_v25, %v3246_v48 }
0x2658   :  { %v3266_v10 = vpack.c.bf16 %v3264_v8, %v3264_v8  ;;  %v3280_v27 = vunpack.c.l.b16 %v3265_v26 }
0x265a   :  { %v3281_v28 = vunpack.c.l.b16 %v3266_v10 }
0x265c   :  { %v3283_v29 = vsel %vm3282_vm5, %v3281_v28, %v3280_v27 }
0x265d   :  { %v3284_v13 = vpack.c.b16 %v3283_v29, %v3283_v29 }
0x265f   :  { %3901 = vmatmul.mubr.msk.bf16.vlgmr.msra.gmra.mrb[92].mxu1 %vm212_vm0, %v3284_v13 }
0x2732   :  { %v3334_v30 = vpop.f32.mrb[92].mxu1 }
0x2733   :  { %v3335_v16 = vadd.f32 %v3477_v17, %v3334_v30  ;;  %v3902_v33 = vpop.f32.mrb[93].mxu1 }
0x2734   :  { %v3337_v34 = vpop.f32.mrb[94].mxu1 }
0x2735   :  { %v3903_v31 = vpop.f32.mrb[95].mxu1  ;;  %3341 = vst.msk [vmem:[#allocation17] sm:$0x3] %vm3340_vm6, %v3335_v16 }
0x2736   :  { %4256 = shalt.err (!%p4253_p6)
}
0x2737   :  { %s5142_s17 = sld [smem:[#allocation27_spill]] }
0x273d   :  { %s4257_s25 = scalar_lea.hbm %s5142_s17, 32 }
0x273e   :  { %p4258_p7 = scmp.ne.s32.totalorder %s5142_s17, %s4257_s25  ;;  %p4261_p8 = scmp.lt.u32.totalorder %s4257_s25, %s5142_s17 }
0x2740   :  { %p4263_p9 = pnand %p4261_p8, %p4258_p7 }
0x2742   :  { %4266 = shalt.err (!%p4263_p9)
}
0x2743   :  { %3351 = dma.vmem_to_hbm [thread:$0]  %s3349_s8, 32, %s5142_s17, [#allocation4]  }
0x2744   :  { %4277 = dma.done.wait [#allocation4], 32  }
0x2745   :  { %4278 = vsyncadd [#allocation4], 4294967264 }
0x2746   :  { %3355 = vsyncpa [#allocation3], 1 }
0x2747   :  { %3356 = vsyncpa [#allocation6], 1 }
0x2748   :  { %3357 = vsyncpa [#allocation9], 1 }
0x2749   :  { %3358 = vsyncpa [#allocation12], 1 }
0x274a   :  { %3359 = vsyncpa [#allocation15], 1 }
0x274b   :  { %3360 = vsyncpa [#allocation4], 1 }

</bundles_post_ra>
